<compile_context>
chip_gen: v7x
topology: tpu7x:2x2x1
jax: 0.10.0
libtpu: 0.0.40
codegen_flags: <defaults>
</compile_context>

<pallas_src>
import numpy as np
import jax
import jax.numpy as jnp
from jax.experimental import pallas as pl
from jax.experimental.pallas import tpu as pltpu


# Samples per grid step.  Must be a multiple of 8.  Raise to 16-64 for large N:
# VMEM per step is ~0.5 MB/sample, so B<=32 stays well inside v7x's 64 MiB physical /
# 32 MiB default scoped VMEM; on v6e/v5e raise vmem_limit_bytes before going larger,
# and keep N/B >= 2 (and even) so both v7x TensorCores get work.
BLOCK_B = 8


# ----------------------------- static helpers ------------------------------

def _build_mask_np():
    """(256, 9) float mask: 1 where the y1 position read by conv2 tap t2 is in-bounds.

    Row order m = (ph*4+pw)*16 + ih*4 + iw, conv2 output position (4*ph+ih, 4*pw+iw),
    so every 4x4 pool window is 16 consecutive rows.
    """
    m = np.arange(256)
    g, r = m // 16, m % 16
    ph, pw = g // 4, g % 4
    ih, iw = r // 4, r % 4
    oh2 = 4 * ph + ih
    ow2 = 4 * pw + iw
    ky2 = (np.arange(9) // 3)[:, None]
    kx2 = (np.arange(9) % 3)[:, None]
    r1 = 2 * oh2[None, :] + ky2 - 1
    c1 = 2 * ow2[None, :] + kx2 - 1
    valid = (r1 >= 0) & (r1 < 32) & (c1 >= 0) & (c1 < 32)
    return np.asarray(valid, np.float32).T          # (256, 9)


_CONV2_MASK = _build_mask_np()


def _build_patches(x, mask9):
    """(N,1,64,64) -> (N, 256, 90) bf16 patch tensor.

    Columns 0..80  : q[n, m, t2*9 + t1] = conv1 patch value (tap t1) at the y1 position
                     that conv2 tap t2 reads for output row m (zero where padding applies).
    Columns 81..89 : conv2 validity flag per tap t2 (folds the conv2 zero-pad mask and
                     the conv1 bias into the block-diagonal conv1 matmul).
    """
    n = x.shape[0]
    xp = jnp.pad(x.reshape(n, 64, 64), ((0, 0), (1, 1), (1, 1)))
    # conv1 im2col (k=3, stride=2, pad=1): p1[n, r1, c1, t1]
    p1 = jnp.stack([xp[:, ky:ky + 63:2, kx:kx + 63:2]
                    for ky in range(3) for kx in range(3)], axis=-1)       # (N,32,32,9)
    p1p = jnp.pad(p1, ((0, 0), (1, 1), (1, 1), (0, 0)))                    # (N,34,34,9)
    # expand per conv2 tap (k=3, stride=2, pad=1): q[n, t2, oh2, ow2, t1]
    q = jnp.stack([p1p[:, ky:ky + 31:2, kx:kx + 31:2, :]
                   for ky in range(3) for kx in range(3)], axis=1)         # (N,9,16,16,9)
    # raster (oh2, ow2) -> pool-grouped rows m = (ph*4+pw)*16 + ih*4 + iw
    q = q.reshape(n, 9, 4, 4, 4, 4, 9).transpose(0, 1, 2, 4, 3, 5, 6).reshape(n, 9, 256, 9)
    # merge the 9 conv2 taps into the contraction dim: column = t2*9 + t1
    q = q.transpose(0, 2, 1, 3).reshape(n, 256, 81)
    v = jnp.broadcast_to(mask9[None], (n, 256, 9))
    return jnp.concatenate([q, v], axis=-1).astype(jnp.bfloat16)           # (N, 256, 90)


def _prepare_params(params):
    """One-time weight layout transforms (all PyTorch layout folding lives here)."""
    # conv1: block-diagonal over the 9 conv2 taps, with the bias on 9 extra rows that
    # multiply the per-tap validity columns of the patch tensor.
    w1t = params["w1"].reshape(8, 9).T                                   # (t1, cout)
    b1 = params["b1"].reshape(8)
    eye = jnp.eye(9, dtype=jnp.float32)
    w1_bd = jnp.einsum('ij,tc->itjc', eye, w1t).reshape(81, 72)          # block diag
    b1_bd = jnp.einsum('ij,c->ijc', eye, b1).reshape(9, 72)              # bias rows
    w1a = jnp.concatenate([w1_bd, b1_bd], axis=0).astype(jnp.bfloat16)   # (90, 72)

    # conv2: (cout, cin, ky, kx) -> (t2*8 + cin, cout)
    w2r = params["w2"].reshape(16, 8, 9).transpose(2, 1, 0).reshape(72, 16)
    w2r = w2r.astype(jnp.bfloat16)
    b2r = params["b2"].reshape(1, 16).astype(jnp.float32)

    # fc1 with the max-pool / NCHW-flatten permutation folded in:
    # feats lane order f = g*16 + c  ->  wf_cat[g*16 + c, j] = wf[j, c*16 + g]
    wfr = params["wf"].reshape(10, 16, 16).transpose(2, 1, 0).reshape(256, 10)
    wfr = wfr.astype(jnp.float32)
    bfr = params["bf"].reshape(1, 10).astype(jnp.float32)
    return w1a, w2r, b2r, wfr, bfr


# -------------------------------- kernel -----------------------------------

def _cnn_fused_kernel(q_ref, w1_ref, w2_ref, b2_ref, wf_ref, bf_ref, out_ref):
    bb = out_ref.shape[0]                                   # samples in this block
    q = q_ref[...]                                          # (bb*256, 90) bf16

    # conv1 (+bias, +conv2 zero-pad mask via the validity columns) for all 9 conv2
    # taps in ONE K=90 matmul against the block-diagonal weight, then ReLU.
    y1 = jnp.dot(q, w1_ref[...], preferred_element_type=jnp.float32)      # (bb*256, 72)
    y1 = jnp.maximum(y1, 0.0).astype(jnp.bfloat16)

    # conv2: ONE K=72 matmul, bias, ReLU (fp32 accumulation / epilogue).
    y2 = jnp.dot(y1, w2_ref[...], preferred_element_type=jnp.float32)     # (bb*256, 16)
    y2 = jnp.maximum(y2 + b2_ref[...], 0.0)

    # 4x4 max-pool: rows are interleaved (g, r, b), so pooling is a single reduction
    # over the window-position axis.
    pooled = jnp.max(y2.reshape(16, 16, bb, 16), axis=1)                  # (16, bb, 16) [g,b,c]

    # Gather each sample's 256 pooled features onto one lane-dense row
    # (lane order f = g*16 + c; the NCHW flatten permutation lives in wf_ref).
    feats = jnp.concatenate([pooled[g] for g in range(16)], axis=-1)      # (bb, 256)

    # fc1 as ONE (bb,256)x(256,10) matmul + exact softmax (tiny, so no approx recip).
    logits = jnp.dot(feats, wf_ref[...], preferred_element_type=jnp.float32) + bf_ref[...]
    z = logits - jnp.max(logits, axis=-1, keepdims=True)
    e = jnp.exp(z)
    out_ref[...] = e / jnp.sum(e, axis=-1, keepdims=True)


# -------------------------------- wrapper -----------------------------------

def init_params():
    key = jax.random.PRNGKey(0)
    k1, k2, k3, k4, k5, k6 = jax.random.split(key, 6)
    return dict(
        w1=0.1 * jax.random.normal(k1, (8, 1, 3, 3), jnp.float32),
        b1=0.1 * jax.random.normal(k2, (8,), jnp.float32),
        w2=0.1 * jax.random.normal(k3, (16, 8, 3, 3), jnp.float32),
        b2=0.1 * jax.random.normal(k4, (16,), jnp.float32),
        wf=0.1 * jax.random.normal(k5, (10, 256), jnp.float32),
        bf=0.1 * jax.random.normal(k6, (10,), jnp.float32),
    )


def cnn_dmnist_forward(params, x, block_b=BLOCK_B):
    assert block_b % 8 == 0
    n = x.shape[0]
    nblk = -(-n // block_b)                                  # cdiv
    pn = nblk * block_b
    if pn != n:                                              # pad batch to a full block
        x = jnp.pad(x, ((0, pn - n), (0, 0), (0, 0), (0, 0)))

    mask9 = jnp.asarray(_CONV2_MASK)
    q = _build_patches(x, mask9)                             # (pn, 256, 90) bf16
    # Interleave rows inside each block as (pool-group g, window-pos r, sample b) so the
    # kernel's pooling / feature gather only touch leading (major) dims.
    q = q.reshape(nblk, block_b, 16, 16, 90).transpose(0, 2, 3, 1, 4)
    q = q.reshape(nblk * block_b * 256, 90)

    w1a, w2r, b2r, wfr, bfr = _prepare_params(params)

    rows = block_b * 256
    flops = nblk * (2 * rows * 90 * 72 + 2 * rows * 72 * 16 + 2 * block_b * 256 * 10)
    bytes_acc = (q.size * 2 + (w1a.size + w2r.size) * 2
                 + (b2r.size + wfr.size + bfr.size) * 4 + pn * 10 * 4)

    out = pl.pallas_call(
        _cnn_fused_kernel,
        out_shape=jax.ShapeDtypeStruct((pn, 10), jnp.float32),
        grid=(nblk,),
        in_specs=[
            pl.BlockSpec((rows, 90), lambda i: (i, 0)),      # patches (one B-sample block)
            pl.BlockSpec((90, 72), lambda i: (0, 0)),        # block-diag conv1 w (+bias rows)
            pl.BlockSpec((72, 16), lambda i: (0, 0)),        # conv2 weight
            pl.BlockSpec((1, 16), lambda i: (0, 0)),         # conv2 bias
            pl.BlockSpec((256, 10), lambda i: (0, 0)),       # fc weight (pool/flatten folded)
            pl.BlockSpec((1, 10), lambda i: (0, 0)),         # fc bias
        ],
        out_specs=pl.BlockSpec((block_b, 10), lambda i: (i, 0)),
        compiler_params=pltpu.CompilerParams(
            dimension_semantics=("parallel",)),
        cost_estimate=pl.CostEstimate(flops=int(flops),
                                      transcendentals=int(pn * 10),
                                      bytes_accessed=int(bytes_acc)),
    )(q, w1a, w2r, b2r, wfr, bfr)
    return out[:n]


# ------------------------- plain-XLA reference ------------------------------

def _reference_forward(params, x):
    y = jax.lax.conv_general_dilated(
        x, params["w1"], window_strides=(2, 2), padding=((1, 1), (1, 1)),
        dimension_numbers=("NCHW", "OIHW", "NCHW"))
    y = jax.nn.relu(y + params["b1"].reshape(1, 8, 1, 1))
    y = jax.lax.conv_general_dilated(
        y, params["w2"], window_strides=(2, 2), padding=((1, 1), (1, 1)),
        dimension_numbers=("NCHW", "OIHW", "NCHW"))
    y = jax.nn.relu(y + params["b2"].reshape(1, 16, 1, 1))
    y = jax.lax.reduce_window(y, -jnp.inf, jax.lax.max,
                              (1, 1, 4, 4), (1, 1, 4, 4), "VALID")
    feat = y.reshape(x.shape[0], 256)
    logits = feat @ params["wf"].T + params["bf"]
    return jax.nn.softmax(logits, axis=-1)


if __name__ == "__main__":
    params = init_params()
    x = jax.random.normal(jax.random.PRNGKey(0), (2, 1, 64, 64), jnp.float32)

    out = jax.block_until_ready(jax.jit(cnn_dmnist_forward)(params, x))

    assert out.shape == (2, 10)
    assert out.dtype == jnp.float32
    # exact softmax divide -> rows sum to 1 tightly
    assert bool(jnp.all(jnp.abs(jnp.sum(out, axis=1) - 1.0) < 1e-5))
    # match the PyTorch-equivalent fp32 XLA reference (bf16 conv inputs, fp32 accumulation)
    ref = jax.jit(_reference_forward)(params, x)
    err = float(jnp.max(jnp.abs(out - ref)))
    assert err < 5e-3, err
    print("KERNEL_OK")
</pallas_src>

<mosaic_0001>
module attributes {stable_mosaic.version = 11 : i64} {
  func.func @_cnn_fused_kernel(%arg0: i32, %arg1: memref<2048x90xbf16, #tpu.memory_space<vmem>>, %arg2: memref<90x72xbf16, #tpu.memory_space<vmem>>, %arg3: memref<72x16xbf16, #tpu.memory_space<vmem>>, %arg4: memref<1x16xf32, #tpu.memory_space<vmem>>, %arg5: memref<256x10xf32, #tpu.memory_space<vmem>>, %arg6: memref<1x10xf32, #tpu.memory_space<vmem>>, %arg7: memref<8x10xf32, #tpu.memory_space<vmem>>) attributes {dimension_semantics = [#tpu.dimension_semantics<parallel>], iteration_bounds = array<i64: 1>, scalar_prefetch = 0 : i64, scratch_operands = 0 : i64, tpu.core_type = #tpu.core_type<tc>, window_params = [{transform_indices = @transform_0, window_bounds = array<i64: 2048, 90>}, {pipeline_mode = #tpu.pipeline_mode<synchronous>, transform_indices = @transform_1, window_bounds = array<i64: 90, 72>}, {pipeline_mode = #tpu.pipeline_mode<synchronous>, transform_indices = @transform_2, window_bounds = array<i64: 72, 16>}, {pipeline_mode = #tpu.pipeline_mode<synchronous>, transform_indices = @transform_3, window_bounds = array<i64: 1, 16>}, {pipeline_mode = #tpu.pipeline_mode<synchronous>, transform_indices = @transform_4, window_bounds = array<i64: 256, 10>}, {pipeline_mode = #tpu.pipeline_mode<synchronous>, transform_indices = @transform_5, window_bounds = array<i64: 1, 10>}, {transform_indices = @transform_6, window_bounds = array<i64: 8, 10>}]} {
    %c0 = arith.constant 0 : index
    %c0_0 = arith.constant 0 : index
    %0 = vector.load %arg1[%c0, %c0_0] : memref<2048x90xbf16, #tpu.memory_space<vmem>>, vector<2048x90xbf16>
    %c0_1 = arith.constant 0 : index
    %c0_2 = arith.constant 0 : index
    %1 = vector.load %arg2[%c0_1, %c0_2] : memref<90x72xbf16, #tpu.memory_space<vmem>>, vector<90x72xbf16>
    %cst = arith.constant dense<0.000000e+00> : vector<2048x72xf32>
    %2 = tpu.matmul %0, %1, %cst {dimension_numbers = #tpu.dot_dimension_numbers<[1], [0], [0], [1], [0, 0, 1, 1], [], []>} : vector<2048x90xbf16>, vector<90x72xbf16>, vector<2048x72xf32> -> vector<2048x72xf32>
    %cst_3 = arith.constant 0.000000e+00 : f32
    %3 = vector.broadcast %cst_3 : f32 to vector<2048x72xf32>
    %4 = arith.maximumf %2, %3 : vector<2048x72xf32>
    %5 = arith.truncf %4 : vector<2048x72xf32> to vector<2048x72xbf16>
    %c0_4 = arith.constant 0 : index
    %c0_5 = arith.constant 0 : index
    %6 = vector.load %arg3[%c0_4, %c0_5] : memref<72x16xbf16, #tpu.memory_space<vmem>>, vector<72x16xbf16>
    %cst_6 = arith.constant dense<0.000000e+00> : vector<2048x16xf32>
    %7 = tpu.matmul %5, %6, %cst_6 {dimension_numbers = #tpu.dot_dimension_numbers<[1], [0], [0], [1], [0, 0, 1, 1], [], []>} : vector<2048x72xbf16>, vector<72x16xbf16>, vector<2048x16xf32> -> vector<2048x16xf32>
    %c0_7 = arith.constant 0 : index
    %c0_8 = arith.constant 0 : index
    %8 = vector.load %arg4[%c0_7, %c0_8] : memref<1x16xf32, #tpu.memory_space<vmem>>, vector<1x16xf32>
    %9 = vector.broadcast %8 : vector<1x16xf32> to vector<2048x16xf32>
    %10 = arith.addf %7, %9 : vector<2048x16xf32>
    %cst_9 = arith.constant 0.000000e+00 : f32
    %11 = vector.broadcast %cst_9 : f32 to vector<2048x16xf32>
    %12 = arith.maximumf %10, %11 : vector<2048x16xf32>
    %13 = vector.shape_cast %12 : vector<2048x16xf32> to vector<16x16x8x16xf32>
    %cst_10 = arith.constant dense<0xFF800000> : vector<16x8x16xf32>
    %14 = vector.multi_reduction <maximumf>, %13, %cst_10 [1] : vector<16x16x8x16xf32> to vector<16x8x16xf32>
    %15 = vector.extract_strided_slice %14 {offsets = [0, 0, 0], sizes = [1, 8, 16], strides = [1, 1, 1]} : vector<16x8x16xf32> to vector<1x8x16xf32>
    %16 = vector.shape_cast %15 : vector<1x8x16xf32> to vector<8x16xf32>
    %17 = vector.extract_strided_slice %14 {offsets = [1, 0, 0], sizes = [1, 8, 16], strides = [1, 1, 1]} : vector<16x8x16xf32> to vector<1x8x16xf32>
    %18 = vector.shape_cast %17 : vector<1x8x16xf32> to vector<8x16xf32>
    %19 = vector.extract_strided_slice %14 {offsets = [2, 0, 0], sizes = [1, 8, 16], strides = [1, 1, 1]} : vector<16x8x16xf32> to vector<1x8x16xf32>
    %20 = vector.shape_cast %19 : vector<1x8x16xf32> to vector<8x16xf32>
    %21 = vector.extract_strided_slice %14 {offsets = [3, 0, 0], sizes = [1, 8, 16], strides = [1, 1, 1]} : vector<16x8x16xf32> to vector<1x8x16xf32>
    %22 = vector.shape_cast %21 : vector<1x8x16xf32> to vector<8x16xf32>
    %23 = vector.extract_strided_slice %14 {offsets = [4, 0, 0], sizes = [1, 8, 16], strides = [1, 1, 1]} : vector<16x8x16xf32> to vector<1x8x16xf32>
    %24 = vector.shape_cast %23 : vector<1x8x16xf32> to vector<8x16xf32>
    %25 = vector.extract_strided_slice %14 {offsets = [5, 0, 0], sizes = [1, 8, 16], strides = [1, 1, 1]} : vector<16x8x16xf32> to vector<1x8x16xf32>
    %26 = vector.shape_cast %25 : vector<1x8x16xf32> to vector<8x16xf32>
    %27 = vector.extract_strided_slice %14 {offsets = [6, 0, 0], sizes = [1, 8, 16], strides = [1, 1, 1]} : vector<16x8x16xf32> to vector<1x8x16xf32>
    %28 = vector.shape_cast %27 : vector<1x8x16xf32> to vector<8x16xf32>
    %29 = vector.extract_strided_slice %14 {offsets = [7, 0, 0], sizes = [1, 8, 16], strides = [1, 1, 1]} : vector<16x8x16xf32> to vector<1x8x16xf32>
    %30 = vector.shape_cast %29 : vector<1x8x16xf32> to vector<8x16xf32>
    %31 = vector.extract_strided_slice %14 {offsets = [8, 0, 0], sizes = [1, 8, 16], strides = [1, 1, 1]} : vector<16x8x16xf32> to vector<1x8x16xf32>
    %32 = vector.shape_cast %31 : vector<1x8x16xf32> to vector<8x16xf32>
    %33 = vector.extract_strided_slice %14 {offsets = [9, 0, 0], sizes = [1, 8, 16], strides = [1, 1, 1]} : vector<16x8x16xf32> to vector<1x8x16xf32>
    %34 = vector.shape_cast %33 : vector<1x8x16xf32> to vector<8x16xf32>
    %35 = vector.extract_strided_slice %14 {offsets = [10, 0, 0], sizes = [1, 8, 16], strides = [1, 1, 1]} : vector<16x8x16xf32> to vector<1x8x16xf32>
    %36 = vector.shape_cast %35 : vector<1x8x16xf32> to vector<8x16xf32>
    %37 = vector.extract_strided_slice %14 {offsets = [11, 0, 0], sizes = [1, 8, 16], strides = [1, 1, 1]} : vector<16x8x16xf32> to vector<1x8x16xf32>
    %38 = vector.shape_cast %37 : vector<1x8x16xf32> to vector<8x16xf32>
    %39 = vector.extract_strided_slice %14 {offsets = [12, 0, 0], sizes = [1, 8, 16], strides = [1, 1, 1]} : vector<16x8x16xf32> to vector<1x8x16xf32>
    %40 = vector.shape_cast %39 : vector<1x8x16xf32> to vector<8x16xf32>
    %41 = vector.extract_strided_slice %14 {offsets = [13, 0, 0], sizes = [1, 8, 16], strides = [1, 1, 1]} : vector<16x8x16xf32> to vector<1x8x16xf32>
    %42 = vector.shape_cast %41 : vector<1x8x16xf32> to vector<8x16xf32>
    %43 = vector.extract_strided_slice %14 {offsets = [14, 0, 0], sizes = [1, 8, 16], strides = [1, 1, 1]} : vector<16x8x16xf32> to vector<1x8x16xf32>
    %44 = vector.shape_cast %43 : vector<1x8x16xf32> to vector<8x16xf32>
    %45 = vector.extract_strided_slice %14 {offsets = [15, 0, 0], sizes = [1, 8, 16], strides = [1, 1, 1]} : vector<16x8x16xf32> to vector<1x8x16xf32>
    %46 = vector.shape_cast %45 : vector<1x8x16xf32> to vector<8x16xf32>
    %47 = tpu.concatenate %16, %18, %20, %22, %24, %26, %28, %30, %32, %34, %36, %38, %40, %42, %44, %46 in 1 : vector<8x16xf32>, vector<8x16xf32>, vector<8x16xf32>, vector<8x16xf32>, vector<8x16xf32>, vector<8x16xf32>, vector<8x16xf32>, vector<8x16xf32>, vector<8x16xf32>, vector<8x16xf32>, vector<8x16xf32>, vector<8x16xf32>, vector<8x16xf32>, vector<8x16xf32>, vector<8x16xf32>, vector<8x16xf32> -> vector<8x256xf32>
    %c0_11 = arith.constant 0 : index
    %c0_12 = arith.constant 0 : index
    %48 = vector.load %arg5[%c0_11, %c0_12] : memref<256x10xf32, #tpu.memory_space<vmem>>, vector<256x10xf32>
    %cst_13 = arith.constant dense<0.000000e+00> : vector<8x10xf32>
    %49 = tpu.matmul %47, %48, %cst_13 {dimension_numbers = #tpu.dot_dimension_numbers<[1], [0], [0], [1], [0, 0, 1, 1], [], []>} : vector<8x256xf32>, vector<256x10xf32>, vector<8x10xf32> -> vector<8x10xf32>
    %c0_14 = arith.constant 0 : index
    %c0_15 = arith.constant 0 : index
    %50 = vector.load %arg6[%c0_14, %c0_15] : memref<1x10xf32, #tpu.memory_space<vmem>>, vector<1x10xf32>
    %51 = vector.broadcast %50 : vector<1x10xf32> to vector<8x10xf32>
    %52 = arith.addf %49, %51 : vector<8x10xf32>
    %cst_16 = arith.constant dense<0xFF800000> : vector<8xf32>
    %53 = vector.multi_reduction <maximumf>, %52, %cst_16 [1] : vector<8x10xf32> to vector<8xf32>
    %54 = vector.shape_cast %53 : vector<8xf32> to vector<8x1xf32>
    %55 = vector.broadcast %54 : vector<8x1xf32> to vector<8x10xf32>
    %56 = arith.subf %52, %55 : vector<8x10xf32>
    %57 = math.exp %56 : vector<8x10xf32>
    %cst_17 = arith.constant dense<0.000000e+00> : vector<8xf32>
    %58 = vector.multi_reduction <add>, %57, %cst_17 [1] : vector<8x10xf32> to vector<8xf32>
    %59 = vector.shape_cast %58 : vector<8xf32> to vector<8x1xf32>
    %60 = vector.broadcast %59 : vector<8x1xf32> to vector<8x10xf32>
    %61 = arith.divf %57, %60 : vector<8x10xf32>
    %c0_18 = arith.constant 0 : index
    %c0_19 = arith.constant 0 : index
    %62 = vector.load %arg7[%c0_18, %c0_19] : memref<8x10xf32, #tpu.memory_space<vmem>>, vector<8x10xf32>
    tpu.vector_store %arg7[%c0_18, %c0_19], %61 {strides = array<i32>} : memref<8x10xf32, #tpu.memory_space<vmem>>, vector<8x10xf32>,
    return
  }
  func.func @transform_0(%arg0: i32) -> (i32, i32) {
    %c0_i32 = arith.constant 0 : i32
    %c0_i32_0 = arith.constant 0 : i32
    return %arg0, %c0_i32 : i32, i32
  }
  func.func @transform_1(%arg0: i32) -> (i32, i32) {
    %c0_i32 = arith.constant 0 : i32
    %c0_i32_0 = arith.constant 0 : i32
    %c0_i32_1 = arith.constant 0 : i32
    return %c0_i32, %c0_i32_0 : i32, i32
  }
  func.func @transform_2(%arg0: i32) -> (i32, i32) {
    %c0_i32 = arith.constant 0 : i32
    %c0_i32_0 = arith.constant 0 : i32
    %c0_i32_1 = arith.constant 0 : i32
    return %c0_i32, %c0_i32_0 : i32, i32
  }
  func.func @transform_3(%arg0: i32) -> (i32, i32) {
    %c0_i32 = arith.constant 0 : i32
    %c0_i32_0 = arith.constant 0 : i32
    %c0_i32_1 = arith.constant 0 : i32
    return %c0_i32, %c0_i32_0 : i32, i32
  }
  func.func @transform_4(%arg0: i32) -> (i32, i32) {
    %c0_i32 = arith.constant 0 : i32
    %c0_i32_0 = arith.constant 0 : i32
    %c0_i32_1 = arith.constant 0 : i32
    return %c0_i32, %c0_i32_0 : i32, i32
  }
  func.func @transform_5(%arg0: i32) -> (i32, i32) {
    %c0_i32 = arith.constant 0 : i32
    %c0_i32_0 = arith.constant 0 : i32
    %c0_i32_1 = arith.constant 0 : i32
    return %c0_i32, %c0_i32_0 : i32, i32
  }
  func.func @transform_6(%arg0: i32) -> (i32, i32) {
    %c0_i32 = arith.constant 0 : i32
    %c0_i32_0 = arith.constant 0 : i32
    return %arg0, %c0_i32 : i32, i32
  }
}

</mosaic_0001>

<bundles_post_ra>
// kernel: cnn_dmnist_forward.1
= control target key start
LH: loop header
LB: loop body
LE: loop exit
PB: predicated region body
PF: predicated region fallthrough
CT: control target
= control target key end

     0   :  { %vm967_vm0 = vcmask 736256   ;;  %vm1352_vm1 = vcmask 1044480   ;;  %vm3225_vm2 = vcmask 1043456   ;;  %vm2840_vm3 = vcmask 588800   ;;  %s6697_s17 = smov 32   ;;  %s6698_s25 = smov 48   ;;  %s8137_s1 = inlined_call_operand.vmem [shape: bf16[90,72], index: 1, kind: input, shape index: {}]   ;;  %s8138_s0 = inlined_call_operand.vmem [shape: bf16[2048,90], index: 0, kind: input, shape index: {}]   ;;  %s8139_s2 = inlined_call_operand.vmem [shape: bf16[72,16], index: 2, kind: input, shape index: {}]   ;;  %s8140_s3 = inlined_call_operand.vmem [shape: f32[1,16], index: 3, kind: input, shape index: {}]   ;;  %s8141_s4 = inlined_call_operand.vmem [shape: f32[256,10], index: 4, kind: input, shape index: {}]   ;;  %s8142_s5 = inlined_call_operand.vmem [shape: f32[1,10], index: 5, kind: input, shape index: {}]   ;;  %s8143_s6 = inlined_call_operand.vmem [shape: f32[8,10], index: 6, kind: output, shape index: {}]  }
   0x1   :  { %v6550_v0 = vld [vmem:[%s8137_s1] sm:$0xff]   ;;  %v6551_v1 = vld [vmem:[%s8137_s1 + $0x8] sm:$0xff]   ;;  %v6552_v2 = vld [vmem:[%s8137_s1 + $0x10] sm:$0xff]   ;;  %vm4542_vm4 = vcmask 130048   ;;  %s6701_s11 = smov 96   ;;  %s6702_s12 = smov 112  }
   0x2   :  { %5940 = vmatprep.subr.bf16.mxu0 %v6550_v0  ;;  %v6556_v3 = vld [vmem:[%s8138_s0] sm:$0xff]   ;;  %v6553_v4 = vld [vmem:[%s8137_s1 + $0x18] sm:$0xff]   ;;  %v6555_v6 = vld [vmem:[%s8137_s1 + $0x28] sm:$0x1f]   ;;  %vm5096_vm5 = vcmask 261120   ;;  %vm5098_vm6 = vcmask 392192  }
   0x3   :  { %5941 = vmatpush3.bf16.msra.mxu0 %v6550_v0  ;;  %5952 = vmatprep.mubr.msk.bf16.mxu0 %vm967_vm0, %v6556_v3  ;;  %v6554_v5 = vld [vmem:[%s8137_s1 + $0x20] sm:$0xff]   ;;  %v1354_v7 = vsel %vm1352_vm1, %v6555_v6, 0  ;;  %v6557_v8 = vld [vmem:[%s8138_s0 + $0x8] sm:$0xff]   ;;  %v6558_v9 = vld [vmem:[%s8138_s0 + $0x10] sm:$0xff]   ;;  %s6696_s1 = smov 16   ;;  %vm5100_vm7 = vcmask 523264  }
   0x4   :  { %5942 = vmatprep.subr.bf16.mxu0 %v6551_v1  ;;  %v6559_v10 = vld [vmem:[%s8138_s0 + $0x18] sm:$0xff]   ;;  %v6560_v11 = vld [vmem:[%s8138_s0 + $0x20] sm:$0xff]   ;;  %v6561_v12 = vld [vmem:[%s8138_s0 + $0x28] sm:$0xff]   ;;  %vm5102_vm8 = vcmask 654336   ;;  %vm5104_vm9 = vcmask 785408   ;;  %vm5106_vm10 = vcmask 916480  }
   0x5   :  { %v6562_v13 = vld [vmem:[%s8138_s0 + $0x30] sm:$0xff]   ;;  %v6563_v14 = vld [vmem:[%s8138_s0 + $0x38] sm:$0xff]   ;;  %v6564_v15 = vld [vmem:[%s8138_s0 + $0x40] sm:$0xff]   ;;  %vm5224_vm11 = vcmask 80896  }
   0x6   :  { %v6565_v16 = vld [vmem:[%s8138_s0 + $0x48] sm:$0xff]   ;;  %v6566_v17 = vld [vmem:[%s8138_s0 + $0x50] sm:$0xff]   ;;  %v6567_v18 = vld [vmem:[%s8138_s0 + $0x58] sm:$0xff]  }
   0x7   :  { %5943 = vmatpush3.bf16.msra.mxu0 %v6551_v1  ;;  %v6568_v19 = vld [vmem:[%s8138_s0 + $0x60] sm:$0xff]   ;;  %v6569_v20 = vld [vmem:[%s8138_s0 + $0x68] sm:$0xff]   ;;  %v6570_v21 = vld [vmem:[%s8138_s0 + $0x70] sm:$0xff]  }
   0x8   :  { %5944 = vmatprep.subr.bf16.mxu0 %v6552_v2  ;;  %v6571_v22 = vld [vmem:[%s8138_s0 + $0x78] sm:$0xff]   ;;  %v6572_v23 = vld [vmem:[%s8138_s0 + $0x80] sm:$0xff]   ;;  %v6573_v24 = vld [vmem:[%s8138_s0 + $0x88] sm:$0xff]  }
   0x9   :  { %v6574_v25 = vld [vmem:[%s8138_s0 + $0x90] sm:$0xff]   ;;  %v6575_v26 = vld [vmem:[%s8138_s0 + $0x98] sm:$0xff]   ;;  %v6576_v27 = vld [vmem:[%s8138_s0 + $0xa0] sm:$0xff]  }
   0xa   :  { %v6608_v28 = vld [vmem:[%s8139_s2] sm:$0xff]   ;;  %v6609_v29 = vld [vmem:[%s8139_s2 + $0x8] sm:$0xff]   ;;  %v6578_v31 = vld [vmem:[%s8138_s0 + $0xb0] sm:$0xff]  }
   0xb   :  { %5945 = vmatpush3.bf16.msra.mxu0 %v6552_v2  ;;  %6208 = vmatprep.subr.bf16.mxu1 %v6608_v28  ;;  %v6577_v30 = vld [vmem:[%s8138_s0 + $0xa8] sm:$0xff]   ;;  %v6612_v32 = vld [vmem:[%s8139_s2 + $0x10] sm:$0xff]   ;;  %v6579_v33 = vld [vmem:[%s8138_s0 + $0xb8] sm:$0xff]  }
   0xc   :  { %5946 = vmatprep.subr.bf16.mxu0 %v6553_v4  ;;  %6209 = vmatpush3.bf16.msra.mxu1 %v6608_v28  ;;  %v6613_v34 = vld [vmem:[%s8139_s2 + $0x18] sm:$0xff]   ;;  %v6580_v35 = vld [vmem:[%s8138_s0 + $0xc0] sm:$0xff]   ;;  %v6581_v38 = vld [vmem:[%s8138_s0 + $0xc8] sm:$0xff]  }
   0xd   :  { %6210 = vmatprep.subr.bf16.mxu1 %v6609_v29  ;;  %v6616_v36 = vld [vmem:[%s8139_s2 + $0x20] ss:$0 sps:$4 sm:$0xff]   ;;  %v6582_v39 = vld [vmem:[%s8138_s0 + $0xd0] sm:$0xff]   ;;  %v6583_v40 = vld [vmem:[%s8138_s0 + $0xd8] sm:$0xff]  }
   0xe   :  { %v3227_v37 = vsel %vm3225_vm2, %v6616_v36, 0  ;;  %v6584_v41 = vld [vmem:[%s8138_s0 + $0xe0] sm:$0xff]   ;;  %v6585_v42 = vld [vmem:[%s8138_s0 + $0xe8] sm:$0xff]   ;;  %v6586_v43 = vld [vmem:[%s8138_s0 + $0xf0] sm:$0xff]  }
   0xf   :  { %5947 = vmatpush3.bf16.msra.mxu0 %v6553_v4  ;;  %v6587_v44 = vld [vmem:[%s8138_s0 + $0xf8] sm:$0xff]   ;;  %v6588_v45 = vld [vmem:[%s8138_s0 + $0x100] sm:$0xff]   ;;  %v6589_v46 = vld [vmem:[%s8138_s0 + $0x108] sm:$0xff]  }
  0x10   :  { %5948 = vmatprep.subr.bf16.mxu0 %v6554_v5  ;;  %6211 = vmatpush3.bf16.msra.mxu1 %v6609_v29  ;;  %v6590_v47 = vld [vmem:[%s8138_s0 + $0x110] sm:$0xff]   ;;  %v6591_v48 = vld [vmem:[%s8138_s0 + $0x118] sm:$0xff]   ;;  %v6592_v49 = vld [vmem:[%s8138_s0 + $0x120] sm:$0xff]  }
  0x11   :  { %6212 = vmatprep.subr.bf16.mxu1 %v6612_v32  ;;  %v6593_v50 = vld [vmem:[%s8138_s0 + $0x128] sm:$0xff]   ;;  %v6594_v51 = vld [vmem:[%s8138_s0 + $0x130] sm:$0xff]   ;;  %v6595_v52 = vld [vmem:[%s8138_s0 + $0x138] sm:$0xff]  }
  0x12   :  { %v6596_v53 = vld [vmem:[%s8138_s0 + $0x140] sm:$0xff]   ;;  %v6597_v54 = vld [vmem:[%s8138_s0 + $0x148] sm:$0xff]   ;;  %v6598_v55 = vld [vmem:[%s8138_s0 + $0x150] sm:$0xff]  }
  0x13   :  { %5949 = vmatpush3.bf16.msra.mxu0 %v6554_v5  ;;  %v6599_v56 = vld [vmem:[%s8138_s0 + $0x158] sm:$0xff]   ;;  %v6600_v57 = vld [vmem:[%s8138_s0 + $0x160] sm:$0xff]   ;;  %v6601_v58 = vld [vmem:[%s8138_s0 + $0x168] sm:$0xff]  }
  0x14   :  { %6506 = vmatprep.subr.msk.bf16.mxu0 %vm1352_vm1, %v6555_v6  ;;  %6213 = vmatpush3.bf16.msra.mxu1 %v6612_v32  ;;  %v6602_v59 = vld [vmem:[%s8138_s0 + $0x170] sm:$0xff]   ;;  %v6603_v60 = vld [vmem:[%s8138_s0 + $0x178] sm:$0xff]   ;;  %v6604_v61 = vld [vmem:[%s8138_s0 + $0x180] sm:$0xff]  }
  0x15   :  { %6214 = vmatprep.subr.bf16.mxu1 %v6613_v34  ;;  %v6605_v62 = vld [vmem:[%s8138_s0 + $0x188] sm:$0xff]   ;;  %v6606_v63 = vld [vmem:[%s8138_s0 + $0x190] sm:$0xff]   ;;  %v6607_v0 = vld [vmem:[%s8138_s0 + $0x198] sm:$0xff]  }
  0x16   :  { %v6610_v1 = vld [vmem:[%s8138_s0 + $0x1a0] sm:$0xff]   ;;  %v6611_v2 = vld [vmem:[%s8138_s0 + $0x1a8] sm:$0xff]   ;;  %v6614_v3 = vld [vmem:[%s8138_s0 + $0x1b0] sm:$0xff]  }
  0x17   :  { %5951 = vmatpush3.bf16.msra.mxu0 %v1354_v7  ;;  %v6615_v6 = vld [vmem:[%s8138_s0 + $0x1b8] sm:$0xff]   ;;  %v6621_v32 = vld [vmem:[%s8138_s0 + $0x1e0] sm:$0xff]  }
  0x18   :  { %6215 = vmatpush3.bf16.msra.mxu1 %v6613_v34 }
  0x19   :  { %6507 = vmatprep.subr.msk.bf16.mxu1 %vm3225_vm2, %v6616_v36 }
  0x1a   :  { %5953 = vmatmul.mubr.msk.bf16.vlgmr.msra.gmra.mrb[0].mxu0 %vm967_vm0, %v6557_v8  ;;  %v6617_v8 = vld [vmem:[%s8138_s0 + $0x1c0] sm:$0xff]  }
  0x1b   :  { %5956 = vmatprep.mubr.msk.bf16.mxu0 %vm967_vm0, %v6558_v9 }
  0x1c   :  { %6217 = vmatpush3.bf16.msra.mxu1 %v3227_v37 }
  0x22   :  { %5957 = vmatmul.mubr.msk.bf16.gmra.mrb[4].mxu0 %vm967_vm0, %v6559_v10 }
  0x23   :  { %5960 = vmatprep.mubr.msk.bf16.mxu0 %vm967_vm0, %v6560_v11 }
  0x2a   :  { %5961 = vmatmul.mubr.msk.bf16.gmra.mrb[8].mxu0 %vm967_vm0, %v6561_v12 }
  0x2b   :  { %5964 = vmatprep.mubr.msk.bf16.mxu0 %vm967_vm0, %v6562_v13 }
  0x32   :  { %5965 = vmatmul.mubr.msk.bf16.gmra.mrb[12].mxu0 %vm967_vm0, %v6563_v14 }
  0x33   :  { %5968 = vmatprep.mubr.msk.bf16.mxu0 %vm967_vm0, %v6564_v15 }
  0x3a   :  { %5969 = vmatmul.mubr.msk.bf16.gmra.mrb[16].mxu0 %vm967_vm0, %v6565_v16 }
  0x3b   :  { %5972 = vmatprep.mubr.msk.bf16.mxu0 %vm967_vm0, %v6566_v17 }
  0x42   :  { %5973 = vmatmul.mubr.msk.bf16.gmra.mrb[20].mxu0 %vm967_vm0, %v6567_v18  ;;  %v6618_v18 = vld [vmem:[%s8138_s0 + $0x1c8] sm:$0xff]  }
  0x43   :  { %5976 = vmatprep.mubr.msk.bf16.mxu0 %vm967_vm0, %v6568_v19 }
  0x4a   :  { %5977 = vmatmul.mubr.msk.bf16.gmra.mrb[24].mxu0 %vm967_vm0, %v6569_v20  ;;  %v6619_v20 = vld [vmem:[%s8138_s0 + $0x1d0] sm:$0xff]  }
  0x4b   :  { %5980 = vmatprep.mubr.msk.bf16.mxu0 %vm967_vm0, %v6570_v21 }
  0x52   :  { %5981 = vmatmul.mubr.msk.bf16.gmra.mrb[28].mxu0 %vm967_vm0, %v6571_v22 }
  0x53   :  { %5984 = vmatprep.mubr.msk.bf16.mxu0 %vm967_vm0, %v6572_v23 }
  0x5a   :  { %5985 = vmatmul.mubr.msk.bf16.gmra.mrb[32].mxu0 %vm967_vm0, %v6573_v24 }
  0x5b   :  { %5988 = vmatprep.mubr.msk.bf16.mxu0 %vm967_vm0, %v6574_v25 }
  0x62   :  { %5989 = vmatmul.mubr.msk.bf16.gmra.mrb[36].mxu0 %vm967_vm0, %v6575_v26 }
  0x63   :  { %5992 = vmatprep.mubr.msk.bf16.mxu0 %vm967_vm0, %v6576_v27 }
  0x6a   :  { %5993 = vmatmul.mubr.msk.bf16.gmra.mrb[40].mxu0 %vm967_vm0, %v6577_v30  ;;  %v6620_v30 = vld [vmem:[%s8138_s0 + $0x1d8] sm:$0xff]  }
  0x6b   :  { %5996 = vmatprep.mubr.msk.bf16.mxu0 %vm967_vm0, %v6578_v31 }
  0x72   :  { %5997 = vmatmul.mubr.msk.bf16.gmra.mrb[44].mxu0 %vm967_vm0, %v6579_v33 }
  0x73   :  { %6000 = vmatprep.mubr.msk.bf16.mxu0 %vm967_vm0, %v6580_v35 }
  0x7a   :  { %6001 = vmatmul.mubr.msk.bf16.gmra.mrb[48].mxu0 %vm967_vm0, %v6581_v38 }
  0x7b   :  { %6004 = vmatprep.mubr.msk.bf16.mxu0 %vm967_vm0, %v6582_v39 }
  0x82   :  { %6005 = vmatmul.mubr.msk.bf16.gmra.mrb[52].mxu0 %vm967_vm0, %v6583_v40 }
  0x83   :  { %6008 = vmatprep.mubr.msk.bf16.mxu0 %vm967_vm0, %v6584_v41 }
  0x8a   :  { %6009 = vmatmul.mubr.msk.bf16.gmra.mrb[56].mxu0 %vm967_vm0, %v6585_v42  ;;  %v6622_v42 = vld [vmem:[%s8138_s0 + $0x1e8] sm:$0xff]  }
  0x8b   :  { %6012 = vmatprep.mubr.msk.bf16.mxu0 %vm967_vm0, %v6586_v43 }
  0x92   :  { %6013 = vmatmul.mubr.msk.bf16.gmra.mrb[60].mxu0 %vm967_vm0, %v6587_v44  ;;  %v6623_v44 = vld [vmem:[%s8138_s0 + $0x1f0] sm:$0xff]  }
  0x93   :  { %6016 = vmatprep.mubr.msk.bf16.mxu0 %vm967_vm0, %v6588_v45 }
  0x9a   :  { %6017 = vmatmul.mubr.msk.bf16.gmra.mrb[64].mxu0 %vm967_vm0, %v6589_v46 }
  0x9b   :  { %6020 = vmatprep.mubr.msk.bf16.mxu0 %vm967_vm0, %v6590_v47 }
  0xa2   :  { %6021 = vmatmul.mubr.msk.bf16.gmra.mrb[68].mxu0 %vm967_vm0, %v6591_v48 }
  0xa3   :  { %6024 = vmatprep.mubr.msk.bf16.mxu0 %vm967_vm0, %v6592_v49 }
  0xaa   :  { %6025 = vmatmul.mubr.msk.bf16.gmra.mrb[72].mxu0 %vm967_vm0, %v6593_v50 }
  0xab   :  { %6028 = vmatprep.mubr.msk.bf16.mxu0 %vm967_vm0, %v6594_v51 }
  0xb2   :  { %6029 = vmatmul.mubr.msk.bf16.gmra.mrb[76].mxu0 %vm967_vm0, %v6595_v52 }
  0xb3   :  { %6032 = vmatprep.mubr.msk.bf16.mxu0 %vm967_vm0, %v6596_v53 }
  0xba   :  { %6033 = vmatmul.mubr.msk.bf16.gmra.mrb[80].mxu0 %vm967_vm0, %v6597_v54  ;;  %v6624_v54 = vld [vmem:[%s8138_s0 + $0x1f8] sm:$0xff]  }
  0xbb   :  { %6036 = vmatprep.mubr.msk.bf16.mxu0 %vm967_vm0, %v6598_v55 }
  0xc2   :  { %6037 = vmatmul.mubr.msk.bf16.gmra.mrb[84].mxu0 %vm967_vm0, %v6599_v56  ;;  %v6625_v56 = vld [vmem:[%s8138_s0 + $0x200] sm:$0xff]  }
  0xc3   :  { %6040 = vmatprep.mubr.msk.bf16.mxu0 %vm967_vm0, %v6600_v57 }
  0xca   :  { %6041 = vmatmul.mubr.msk.bf16.gmra.mrb[88].mxu0 %vm967_vm0, %v6601_v58 }
  0xcb   :  { %6044 = vmatprep.mubr.msk.bf16.mxu0 %vm967_vm0, %v6602_v59 }
  0xd2   :  { %6045 = vmatmul.mubr.msk.bf16.gmra.mrb[92].mxu0 %vm967_vm0, %v6603_v60 }
  0xd3   :  { %6048 = vmatprep.mubr.msk.bf16.mxu0 %vm967_vm0, %v6604_v61 }
  0xda   :  { %6049 = vmatmul.mubr.msk.bf16.gmra.mrb[96].mxu0 %vm967_vm0, %v6605_v62 }
  0xdb   :  { %6052 = vmatprep.mubr.msk.bf16.mxu0 %vm967_vm0, %v6606_v63 }
  0xe2   :  { %6053 = vmatmul.mubr.msk.bf16.gmra.mrb[100].mxu0 %vm967_vm0, %v6607_v0 }
  0xe3   :  { %6056 = vmatprep.mubr.msk.bf16.mxu0 %vm967_vm0, %v6610_v1 }
  0xea   :  { %6057 = vmatmul.mubr.msk.bf16.gmra.mrb[104].mxu0 %vm967_vm0, %v6611_v2  ;;  %v6626_v2 = vld [vmem:[%s8138_s0 + $0x208] sm:$0xff]  }
  0xeb   :  { %6060 = vmatprep.mubr.msk.bf16.mxu0 %vm967_vm0, %v6614_v3 }
  0xed   :  { %v5954_v4 = vpop.f32.mrb[0].mxu0 }
  0xee   :  { %v1390_v5 = vpop.f32.mrb[1].mxu0  ;;  %v2415_v9 = vmax.f32 %v5954_v4, 0.0  ;;  %v6627_v4 = vld [vmem:[%s8138_s0 + $0x210] sm:$0xff]  }
  0xef   :  { %v5955_v7 = vpop.f32.mrb[2].mxu0  ;;  %v2413_v12 = vmax.f32 %v1390_v5, 0.0 }
  0xf0   :  { %v2416_v10 = vmax.f32 %v5955_v7, 0.0  ;;  %v1393_v11 = vpop.f32.mrb[3].mxu0 }
  0xf1   :  { %v2414_v13 = vmax.f32 %v1393_v11, 0.0 }
  0xf2   :  { %v2670_v14 = vpack.c.bf16 %v2416_v10, %v2415_v9  ;;  %6061 = vmatmul.mubr.msk.bf16.gmra.mrb[108].mxu0 %vm967_vm0, %v6615_v6 }
  0xf3   :  { %v2669_v15 = vpack.c.bf16 %v2414_v13, %v2413_v12  ;;  %6064 = vmatprep.mubr.msk.bf16.mxu0 %vm967_vm0, %v6617_v8 }
  0xf5   :  { %v5958_v16 = vpop.f32.mrb[4].mxu0  ;;  %6218 = vmatprep.mubr.msk.bf16.mxu1 %vm2840_vm3, %v2669_v15 }
  0xf6   :  { %v1406_v17 = vpop.f32.mrb[5].mxu0  ;;  %6219 = vmatmul.mubr.msk.bf16.vlgmr.msra.gmra.mrb[0].mxu1 %vm2840_vm3, %v2670_v14  ;;  %v2419_v21 = vmax.f32 %v5958_v16, 0.0  ;;  %v6628_v14 = vld [vmem:[%s8138_s0 + $0x218] sm:$0xff]   ;;  %v6629_v16 = vld [vmem:[%s8138_s0 + $0x220] sm:$0xff]  }
  0xf7   :  { %v5959_v19 = vpop.f32.mrb[6].mxu0  ;;  %v2417_v24 = vmax.f32 %v1406_v17, 0.0 }
  0xf8   :  { %v2420_v22 = vmax.f32 %v5959_v19, 0.0  ;;  %v1409_v23 = vpop.f32.mrb[7].mxu0 }
  0xf9   :  { %v2418_v25 = vmax.f32 %v1409_v23, 0.0 }
  0xfa   :  { %v2672_v26 = vpack.c.bf16 %v2420_v22, %v2419_v21  ;;  %6065 = vmatmul.mubr.msk.bf16.gmra.mrb[112].mxu0 %vm967_vm0, %v6618_v18 }
  0xfb   :  { %v2671_v27 = vpack.c.bf16 %v2418_v25, %v2417_v24  ;;  %6068 = vmatprep.mubr.msk.bf16.mxu0 %vm967_vm0, %v6619_v20 }
  0xfd   :  { %v5962_v28 = vpop.f32.mrb[8].mxu0  ;;  %6222 = vmatprep.mubr.msk.bf16.mxu1 %vm2840_vm3, %v2671_v27 }
  0xfe   :  { %v1422_v29 = vpop.f32.mrb[9].mxu0  ;;  %6223 = vmatmul.mubr.msk.bf16.gmra.mrb[4].mxu1 %vm2840_vm3, %v2672_v26  ;;  %v2423_v33 = vmax.f32 %v5962_v28, 0.0  ;;  %v6630_v26 = vld [vmem:[%s8138_s0 + $0x228] sm:$0xff]   ;;  %v6631_v28 = vld [vmem:[%s8138_s0 + $0x230] sm:$0xff]  }
  0xff   :  { %v5963_v31 = vpop.f32.mrb[10].mxu0  ;;  %v2421_v36 = vmax.f32 %v1422_v29, 0.0 }
 0x100   :  { %v2424_v34 = vmax.f32 %v5963_v31, 0.0  ;;  %v1425_v35 = vpop.f32.mrb[11].mxu0 }
 0x101   :  { %v2422_v37 = vmax.f32 %v1425_v35, 0.0 }
 0x102   :  { %v2674_v38 = vpack.c.bf16 %v2424_v34, %v2423_v33  ;;  %6069 = vmatmul.mubr.msk.bf16.gmra.mrb[116].mxu0 %vm967_vm0, %v6620_v30 }
 0x103   :  { %v2673_v39 = vpack.c.bf16 %v2422_v37, %v2421_v36  ;;  %6072 = vmatprep.mubr.msk.bf16.mxu0 %vm967_vm0, %v6621_v32 }
 0x105   :  { %v5966_v40 = vpop.f32.mrb[12].mxu0  ;;  %6226 = vmatprep.mubr.msk.bf16.mxu1 %vm2840_vm3, %v2673_v39 }
 0x106   :  { %v1438_v41 = vpop.f32.mrb[13].mxu0  ;;  %6227 = vmatmul.mubr.msk.bf16.gmra.mrb[8].mxu1 %vm2840_vm3, %v2674_v38  ;;  %v2427_v45 = vmax.f32 %v5966_v40, 0.0  ;;  %v6632_v38 = vld [vmem:[%s8138_s0 + $0x238] sm:$0xff]   ;;  %v6633_v40 = vld [vmem:[%s8138_s0 + $0x240] sm:$0xff]  }
 0x107   :  { %v5967_v43 = vpop.f32.mrb[14].mxu0  ;;  %v2425_v48 = vmax.f32 %v1438_v41, 0.0 }
 0x108   :  { %v2428_v46 = vmax.f32 %v5967_v43, 0.0  ;;  %v1441_v47 = vpop.f32.mrb[15].mxu0 }
 0x109   :  { %v2426_v49 = vmax.f32 %v1441_v47, 0.0 }
 0x10a   :  { %v2676_v50 = vpack.c.bf16 %v2428_v46, %v2427_v45  ;;  %6073 = vmatmul.mubr.msk.bf16.gmra.mrb[120].mxu0 %vm967_vm0, %v6622_v42 }
 0x10b   :  { %v2675_v51 = vpack.c.bf16 %v2426_v49, %v2425_v48  ;;  %6076 = vmatprep.mubr.msk.bf16.mxu0 %vm967_vm0, %v6623_v44 }
 0x10d   :  { %v5970_v52 = vpop.f32.mrb[16].mxu0  ;;  %6230 = vmatprep.mubr.msk.bf16.mxu1 %vm2840_vm3, %v2675_v51 }
 0x10e   :  { %v1454_v53 = vpop.f32.mrb[17].mxu0  ;;  %6231 = vmatmul.mubr.msk.bf16.gmra.mrb[12].mxu1 %vm2840_vm3, %v2676_v50  ;;  %v2431_v57 = vmax.f32 %v5970_v52, 0.0  ;;  %v6634_v50 = vld [vmem:[%s8138_s0 + $0x248] sm:$0xff]   ;;  %v6635_v52 = vld [vmem:[%s8138_s0 + $0x250] sm:$0xff]  }
 0x10f   :  { %v5971_v55 = vpop.f32.mrb[18].mxu0  ;;  %v2429_v60 = vmax.f32 %v1454_v53, 0.0 }
 0x110   :  { %v2432_v58 = vmax.f32 %v5971_v55, 0.0  ;;  %v1457_v59 = vpop.f32.mrb[19].mxu0 }
 0x111   :  { %v2430_v61 = vmax.f32 %v1457_v59, 0.0 }
 0x112   :  { %v2678_v62 = vpack.c.bf16 %v2432_v58, %v2431_v57  ;;  %6077 = vmatmul.mubr.msk.bf16.gmra.mrb[124].mxu0 %vm967_vm0, %v6624_v54 }
 0x113   :  { %v2677_v63 = vpack.c.bf16 %v2430_v61, %v2429_v60  ;;  %6080 = vmatprep.mubr.msk.bf16.mxu0 %vm967_vm0, %v6625_v56 }
 0x115   :  { %v5974_v0 = vpop.f32.mrb[20].mxu0  ;;  %6234 = vmatprep.mubr.msk.bf16.mxu1 %vm2840_vm3, %v2677_v63 }
 0x116   :  { %v1470_v1 = vpop.f32.mrb[21].mxu0  ;;  %6235 = vmatmul.mubr.msk.bf16.gmra.mrb[16].mxu1 %vm2840_vm3, %v2678_v62  ;;  %v2435_v5 = vmax.f32 %v5974_v0, 0.0  ;;  %v6636_v62 = vld [vmem:[%s8138_s0 + $0x258] sm:$0xff]   ;;  %v6637_v0 = vld [vmem:[%s8138_s0 + $0x260] sm:$0xff]  }
 0x117   :  { %v5975_v3 = vpop.f32.mrb[22].mxu0  ;;  %v2433_v8 = vmax.f32 %v1470_v1, 0.0 }
 0x118   :  { %v2436_v6 = vmax.f32 %v5975_v3, 0.0  ;;  %v1473_v7 = vpop.f32.mrb[23].mxu0 }
 0x119   :  { %v2434_v9 = vmax.f32 %v1473_v7, 0.0 }
 0x11a   :  { %v2680_v10 = vpack.c.bf16 %v2436_v6, %v2435_v5  ;;  %6081 = vmatmul.mubr.msk.bf16.gmra.mrb[128].mxu0 %vm967_vm0, %v6626_v2 }
 0x11b   :  { %v2679_v11 = vpack.c.bf16 %v2434_v9, %v2433_v8  ;;  %6084 = vmatprep.mubr.msk.bf16.mxu0 %vm967_vm0, %v6627_v4 }
 0x11d   :  { %v5978_v12 = vpop.f32.mrb[24].mxu0  ;;  %6238 = vmatprep.mubr.msk.bf16.mxu1 %vm2840_vm3, %v2679_v11 }
 0x11e   :  { %v1486_v13 = vpop.f32.mrb[25].mxu0  ;;  %6239 = vmatmul.mubr.msk.bf16.gmra.mrb[20].mxu1 %vm2840_vm3, %v2680_v10  ;;  %v2439_v17 = vmax.f32 %v5978_v12, 0.0  ;;  %v6638_v10 = vld [vmem:[%s8138_s0 + $0x268] sm:$0xff]   ;;  %v6639_v12 = vld [vmem:[%s8138_s0 + $0x270] sm:$0xff]  }
 0x11f   :  { %v5979_v15 = vpop.f32.mrb[26].mxu0  ;;  %v2437_v20 = vmax.f32 %v1486_v13, 0.0 }
 0x120   :  { %v2440_v18 = vmax.f32 %v5979_v15, 0.0  ;;  %v1489_v19 = vpop.f32.mrb[27].mxu0 }
 0x121   :  { %v2438_v21 = vmax.f32 %v1489_v19, 0.0 }
 0x122   :  { %v2682_v22 = vpack.c.bf16 %v2440_v18, %v2439_v17  ;;  %6085 = vmatmul.mubr.msk.bf16.gmra.mrb[132].mxu0 %vm967_vm0, %v6628_v14 }
 0x123   :  { %v2681_v23 = vpack.c.bf16 %v2438_v21, %v2437_v20  ;;  %6088 = vmatprep.mubr.msk.bf16.mxu0 %vm967_vm0, %v6629_v16 }
 0x125   :  { %v5982_v24 = vpop.f32.mrb[28].mxu0  ;;  %6242 = vmatprep.mubr.msk.bf16.mxu1 %vm2840_vm3, %v2681_v23 }
 0x126   :  { %v1502_v25 = vpop.f32.mrb[29].mxu0  ;;  %6243 = vmatmul.mubr.msk.bf16.gmra.mrb[24].mxu1 %vm2840_vm3, %v2682_v22  ;;  %v2443_v29 = vmax.f32 %v5982_v24, 0.0  ;;  %v6640_v22 = vld [vmem:[%s8138_s0 + $0x278] sm:$0xff]   ;;  %v6641_v24 = vld [vmem:[%s8138_s0 + $0x280] sm:$0xff]  }
 0x127   :  { %v5983_v27 = vpop.f32.mrb[30].mxu0  ;;  %v2441_v32 = vmax.f32 %v1502_v25, 0.0 }
 0x128   :  { %v2444_v30 = vmax.f32 %v5983_v27, 0.0  ;;  %v1505_v31 = vpop.f32.mrb[31].mxu0 }
 0x129   :  { %v2442_v33 = vmax.f32 %v1505_v31, 0.0 }
 0x12a   :  { %v2684_v34 = vpack.c.bf16 %v2444_v30, %v2443_v29  ;;  %6089 = vmatmul.mubr.msk.bf16.gmra.mrb[136].mxu0 %vm967_vm0, %v6630_v26 }
 0x12b   :  { %v2683_v35 = vpack.c.bf16 %v2442_v33, %v2441_v32  ;;  %6092 = vmatprep.mubr.msk.bf16.mxu0 %vm967_vm0, %v6631_v28 }
 0x12d   :  { %v5986_v36 = vpop.f32.mrb[32].mxu0  ;;  %6246 = vmatprep.mubr.msk.bf16.mxu1 %vm2840_vm3, %v2683_v35 }
 0x12e   :  { %v1518_v37 = vpop.f32.mrb[33].mxu0  ;;  %6247 = vmatmul.mubr.msk.bf16.gmra.mrb[28].mxu1 %vm2840_vm3, %v2684_v34  ;;  %v2447_v41 = vmax.f32 %v5986_v36, 0.0  ;;  %v6642_v34 = vld [vmem:[%s8138_s0 + $0x288] sm:$0xff]   ;;  %v6643_v36 = vld [vmem:[%s8138_s0 + $0x290] sm:$0xff]  }
 0x12f   :  { %v5987_v39 = vpop.f32.mrb[34].mxu0  ;;  %v2445_v44 = vmax.f32 %v1518_v37, 0.0 }
 0x130   :  { %v2448_v42 = vmax.f32 %v5987_v39, 0.0  ;;  %v1521_v43 = vpop.f32.mrb[35].mxu0 }
 0x131   :  { %v2446_v45 = vmax.f32 %v1521_v43, 0.0 }
 0x132   :  { %v2686_v46 = vpack.c.bf16 %v2448_v42, %v2447_v41  ;;  %6093 = vmatmul.mubr.msk.bf16.gmra.mrb[140].mxu0 %vm967_vm0, %v6632_v38 }
 0x133   :  { %v2685_v47 = vpack.c.bf16 %v2446_v45, %v2445_v44  ;;  %6096 = vmatprep.mubr.msk.bf16.mxu0 %vm967_vm0, %v6633_v40 }
 0x135   :  { %v5990_v48 = vpop.f32.mrb[36].mxu0  ;;  %6250 = vmatprep.mubr.msk.bf16.mxu1 %vm2840_vm3, %v2685_v47 }
 0x136   :  { %v1534_v49 = vpop.f32.mrb[37].mxu0  ;;  %6251 = vmatmul.mubr.msk.bf16.gmra.mrb[32].mxu1 %vm2840_vm3, %v2686_v46  ;;  %v2451_v53 = vmax.f32 %v5990_v48, 0.0  ;;  %v6644_v46 = vld [vmem:[%s8138_s0 + $0x298] sm:$0xff]   ;;  %v6645_v48 = vld [vmem:[%s8138_s0 + $0x2a0] sm:$0xff]  }
 0x137   :  { %v5991_v51 = vpop.f32.mrb[38].mxu0  ;;  %v2449_v56 = vmax.f32 %v1534_v49, 0.0 }
 0x138   :  { %v2452_v54 = vmax.f32 %v5991_v51, 0.0  ;;  %v1537_v55 = vpop.f32.mrb[39].mxu0 }
 0x139   :  { %v2450_v57 = vmax.f32 %v1537_v55, 0.0 }
 0x13a   :  { %v2688_v58 = vpack.c.bf16 %v2452_v54, %v2451_v53  ;;  %6097 = vmatmul.mubr.msk.bf16.gmra.mrb[144].mxu0 %vm967_vm0, %v6634_v50 }
 0x13b   :  { %v2687_v59 = vpack.c.bf16 %v2450_v57, %v2449_v56  ;;  %6100 = vmatprep.mubr.msk.bf16.mxu0 %vm967_vm0, %v6635_v52 }
 0x13d   :  { %v5994_v60 = vpop.f32.mrb[40].mxu0  ;;  %6254 = vmatprep.mubr.msk.bf16.mxu1 %vm2840_vm3, %v2687_v59 }
 0x13e   :  { %v1550_v61 = vpop.f32.mrb[41].mxu0  ;;  %6255 = vmatmul.mubr.msk.bf16.gmra.mrb[36].mxu1 %vm2840_vm3, %v2688_v58  ;;  %v2455_v1 = vmax.f32 %v5994_v60, 0.0  ;;  %v6646_v58 = vld [vmem:[%s8138_s0 + $0x2a8] sm:$0xff]   ;;  %v6647_v60 = vld [vmem:[%s8138_s0 + $0x2b0] sm:$0xff]  }
 0x13f   :  { %v5995_v63 = vpop.f32.mrb[42].mxu0  ;;  %v2453_v4 = vmax.f32 %v1550_v61, 0.0 }
 0x140   :  { %v2456_v2 = vmax.f32 %v5995_v63, 0.0  ;;  %v1553_v3 = vpop.f32.mrb[43].mxu0 }
 0x141   :  { %v2454_v5 = vmax.f32 %v1553_v3, 0.0 }
 0x142   :  { %v2690_v6 = vpack.c.bf16 %v2456_v2, %v2455_v1  ;;  %6101 = vmatmul.mubr.msk.bf16.gmra.mrb[148].mxu0 %vm967_vm0, %v6636_v62 }
 0x143   :  { %v2689_v7 = vpack.c.bf16 %v2454_v5, %v2453_v4  ;;  %6104 = vmatprep.mubr.msk.bf16.mxu0 %vm967_vm0, %v6637_v0 }
 0x145   :  { %v5998_v8 = vpop.f32.mrb[44].mxu0  ;;  %6258 = vmatprep.mubr.msk.bf16.mxu1 %vm2840_vm3, %v2689_v7 }
 0x146   :  { %v1566_v9 = vpop.f32.mrb[45].mxu0  ;;  %6259 = vmatmul.mubr.msk.bf16.gmra.mrb[40].mxu1 %vm2840_vm3, %v2690_v6  ;;  %v2459_v13 = vmax.f32 %v5998_v8, 0.0  ;;  %v6648_v6 = vld [vmem:[%s8138_s0 + $0x2b8] sm:$0xff]   ;;  %v6649_v8 = vld [vmem:[%s8138_s0 + $0x2c0] sm:$0xff]  }
 0x147   :  { %v5999_v11 = vpop.f32.mrb[46].mxu0  ;;  %v2457_v16 = vmax.f32 %v1566_v9, 0.0 }
 0x148   :  { %v2460_v14 = vmax.f32 %v5999_v11, 0.0  ;;  %v1569_v15 = vpop.f32.mrb[47].mxu0 }
 0x149   :  { %v2458_v17 = vmax.f32 %v1569_v15, 0.0 }
 0x14a   :  { %v2692_v18 = vpack.c.bf16 %v2460_v14, %v2459_v13  ;;  %6105 = vmatmul.mubr.msk.bf16.gmra.mrb[152].mxu0 %vm967_vm0, %v6638_v10 }
 0x14b   :  { %v2691_v19 = vpack.c.bf16 %v2458_v17, %v2457_v16  ;;  %6108 = vmatprep.mubr.msk.bf16.mxu0 %vm967_vm0, %v6639_v12 }
 0x14d   :  { %v6002_v20 = vpop.f32.mrb[48].mxu0  ;;  %6262 = vmatprep.mubr.msk.bf16.mxu1 %vm2840_vm3, %v2691_v19 }
 0x14e   :  { %v1582_v21 = vpop.f32.mrb[49].mxu0  ;;  %6263 = vmatmul.mubr.msk.bf16.gmra.mrb[44].mxu1 %vm2840_vm3, %v2692_v18  ;;  %v2463_v25 = vmax.f32 %v6002_v20, 0.0  ;;  %v6650_v18 = vld [vmem:[%s8138_s0 + $0x2c8] sm:$0xff]   ;;  %v6651_v20 = vld [vmem:[%s8138_s0 + $0x2d0] sm:$0xff]  }
 0x14f   :  { %v6003_v23 = vpop.f32.mrb[50].mxu0  ;;  %v2461_v28 = vmax.f32 %v1582_v21, 0.0 }
 0x150   :  { %v2464_v26 = vmax.f32 %v6003_v23, 0.0  ;;  %v1585_v27 = vpop.f32.mrb[51].mxu0 }
 0x151   :  { %v2462_v29 = vmax.f32 %v1585_v27, 0.0 }
 0x152   :  { %v2694_v30 = vpack.c.bf16 %v2464_v26, %v2463_v25  ;;  %6109 = vmatmul.mubr.msk.bf16.gmra.mrb[156].mxu0 %vm967_vm0, %v6640_v22 }
 0x153   :  { %v2693_v31 = vpack.c.bf16 %v2462_v29, %v2461_v28  ;;  %6112 = vmatprep.mubr.msk.bf16.mxu0 %vm967_vm0, %v6641_v24 }
 0x155   :  { %v6006_v32 = vpop.f32.mrb[52].mxu0  ;;  %6266 = vmatprep.mubr.msk.bf16.mxu1 %vm2840_vm3, %v2693_v31 }
 0x156   :  { %v1598_v33 = vpop.f32.mrb[53].mxu0  ;;  %6267 = vmatmul.mubr.msk.bf16.gmra.mrb[48].mxu1 %vm2840_vm3, %v2694_v30  ;;  %v2467_v37 = vmax.f32 %v6006_v32, 0.0  ;;  %v6652_v30 = vld [vmem:[%s8138_s0 + $0x2d8] sm:$0xff]   ;;  %v6653_v32 = vld [vmem:[%s8138_s0 + $0x2e0] sm:$0xff]  }
 0x157   :  { %v6007_v35 = vpop.f32.mrb[54].mxu0  ;;  %v2465_v40 = vmax.f32 %v1598_v33, 0.0 }
 0x158   :  { %v2468_v38 = vmax.f32 %v6007_v35, 0.0  ;;  %v1601_v39 = vpop.f32.mrb[55].mxu0 }
 0x159   :  { %v2466_v41 = vmax.f32 %v1601_v39, 0.0 }
 0x15a   :  { %v2696_v42 = vpack.c.bf16 %v2468_v38, %v2467_v37  ;;  %6113 = vmatmul.mubr.msk.bf16.gmra.mrb[160].mxu0 %vm967_vm0, %v6642_v34 }
 0x15b   :  { %v2695_v43 = vpack.c.bf16 %v2466_v41, %v2465_v40  ;;  %6116 = vmatprep.mubr.msk.bf16.mxu0 %vm967_vm0, %v6643_v36 }
 0x15d   :  { %v6010_v44 = vpop.f32.mrb[56].mxu0  ;;  %6270 = vmatprep.mubr.msk.bf16.mxu1 %vm2840_vm3, %v2695_v43 }
 0x15e   :  { %v1614_v45 = vpop.f32.mrb[57].mxu0  ;;  %6271 = vmatmul.mubr.msk.bf16.gmra.mrb[52].mxu1 %vm2840_vm3, %v2696_v42  ;;  %v2471_v49 = vmax.f32 %v6010_v44, 0.0  ;;  %v6654_v42 = vld [vmem:[%s8138_s0 + $0x2e8] sm:$0xff]   ;;  %v6655_v44 = vld [vmem:[%s8138_s0 + $0x2f0] sm:$0xff]  }
 0x15f   :  { %v6011_v47 = vpop.f32.mrb[58].mxu0  ;;  %v2469_v52 = vmax.f32 %v1614_v45, 0.0 }
 0x160   :  { %v2472_v50 = vmax.f32 %v6011_v47, 0.0  ;;  %v1617_v51 = vpop.f32.mrb[59].mxu0 }
 0x161   :  { %v2470_v53 = vmax.f32 %v1617_v51, 0.0 }
 0x162   :  { %v2698_v54 = vpack.c.bf16 %v2472_v50, %v2471_v49  ;;  %6117 = vmatmul.mubr.msk.bf16.gmra.mrb[164].mxu0 %vm967_vm0, %v6644_v46 }
 0x163   :  { %v2697_v55 = vpack.c.bf16 %v2470_v53, %v2469_v52  ;;  %6120 = vmatprep.mubr.msk.bf16.mxu0 %vm967_vm0, %v6645_v48 }
 0x165   :  { %v6014_v56 = vpop.f32.mrb[60].mxu0  ;;  %6274 = vmatprep.mubr.msk.bf16.mxu1 %vm2840_vm3, %v2697_v55 }
 0x166   :  { %v1630_v57 = vpop.f32.mrb[61].mxu0  ;;  %6275 = vmatmul.mubr.msk.bf16.gmra.mrb[56].mxu1 %vm2840_vm3, %v2698_v54  ;;  %v2475_v61 = vmax.f32 %v6014_v56, 0.0  ;;  %v6656_v54 = vld [vmem:[%s8138_s0 + $0x2f8] sm:$0xff]   ;;  %v6657_v56 = vld [vmem:[%s8138_s0 + $0x300] sm:$0xff]  }
 0x167   :  { %v6015_v59 = vpop.f32.mrb[62].mxu0  ;;  %v2473_v0 = vmax.f32 %v1630_v57, 0.0 }
 0x168   :  { %v2476_v62 = vmax.f32 %v6015_v59, 0.0  ;;  %v1633_v63 = vpop.f32.mrb[63].mxu0 }
 0x169   :  { %v2474_v1 = vmax.f32 %v1633_v63, 0.0 }
 0x16a   :  { %v2700_v2 = vpack.c.bf16 %v2476_v62, %v2475_v61  ;;  %6121 = vmatmul.mubr.msk.bf16.gmra.mrb[168].mxu0 %vm967_vm0, %v6646_v58 }
 0x16b   :  { %v2699_v3 = vpack.c.bf16 %v2474_v1, %v2473_v0  ;;  %6124 = vmatprep.mubr.msk.bf16.mxu0 %vm967_vm0, %v6647_v60 }
 0x16d   :  { %v6018_v4 = vpop.f32.mrb[64].mxu0  ;;  %6278 = vmatprep.mubr.msk.bf16.mxu1 %vm2840_vm3, %v2699_v3 }
 0x16e   :  { %v1646_v5 = vpop.f32.mrb[65].mxu0  ;;  %6279 = vmatmul.mubr.msk.bf16.gmra.mrb[60].mxu1 %vm2840_vm3, %v2700_v2  ;;  %v2479_v9 = vmax.f32 %v6018_v4, 0.0  ;;  %v6658_v2 = vld [vmem:[%s8138_s0 + $0x308] sm:$0xff]   ;;  %v6659_v4 = vld [vmem:[%s8138_s0 + $0x310] sm:$0xff]  }
 0x16f   :  { %v6019_v7 = vpop.f32.mrb[66].mxu0  ;;  %v2477_v12 = vmax.f32 %v1646_v5, 0.0 }
 0x170   :  { %v2480_v10 = vmax.f32 %v6019_v7, 0.0  ;;  %v1649_v11 = vpop.f32.mrb[67].mxu0 }
 0x171   :  { %v2478_v13 = vmax.f32 %v1649_v11, 0.0 }
 0x172   :  { %v2702_v14 = vpack.c.bf16 %v2480_v10, %v2479_v9  ;;  %6125 = vmatmul.mubr.msk.bf16.gmra.mrb[172].mxu0 %vm967_vm0, %v6648_v6 }
 0x173   :  { %v2701_v15 = vpack.c.bf16 %v2478_v13, %v2477_v12  ;;  %6128 = vmatprep.mubr.msk.bf16.mxu0 %vm967_vm0, %v6649_v8 }
 0x175   :  { %v6022_v16 = vpop.f32.mrb[68].mxu0  ;;  %6282 = vmatprep.mubr.msk.bf16.mxu1 %vm2840_vm3, %v2701_v15 }
 0x176   :  { %v1662_v17 = vpop.f32.mrb[69].mxu0  ;;  %6283 = vmatmul.mubr.msk.bf16.gmra.mrb[64].mxu1 %vm2840_vm3, %v2702_v14  ;;  %v2483_v21 = vmax.f32 %v6022_v16, 0.0  ;;  %v6660_v14 = vld [vmem:[%s8138_s0 + $0x318] sm:$0xff]   ;;  %v6661_v16 = vld [vmem:[%s8138_s0 + $0x320] sm:$0xff]  }
 0x177   :  { %v6023_v19 = vpop.f32.mrb[70].mxu0  ;;  %v2481_v24 = vmax.f32 %v1662_v17, 0.0 }
 0x178   :  { %v2484_v22 = vmax.f32 %v6023_v19, 0.0  ;;  %v1665_v23 = vpop.f32.mrb[71].mxu0 }
 0x179   :  { %v2482_v25 = vmax.f32 %v1665_v23, 0.0 }
 0x17a   :  { %v2704_v26 = vpack.c.bf16 %v2484_v22, %v2483_v21  ;;  %6129 = vmatmul.mubr.msk.bf16.gmra.mrb[176].mxu0 %vm967_vm0, %v6650_v18 }
 0x17b   :  { %v2703_v27 = vpack.c.bf16 %v2482_v25, %v2481_v24  ;;  %6132 = vmatprep.mubr.msk.bf16.mxu0 %vm967_vm0, %v6651_v20 }
 0x17d   :  { %v6026_v28 = vpop.f32.mrb[72].mxu0  ;;  %6286 = vmatprep.mubr.msk.bf16.mxu1 %vm2840_vm3, %v2703_v27 }
 0x17e   :  { %v1678_v29 = vpop.f32.mrb[73].mxu0  ;;  %6287 = vmatmul.mubr.msk.bf16.gmra.mrb[68].mxu1 %vm2840_vm3, %v2704_v26  ;;  %v2487_v33 = vmax.f32 %v6026_v28, 0.0  ;;  %v6662_v26 = vld [vmem:[%s8138_s0 + $0x328] sm:$0xff]   ;;  %v6663_v28 = vld [vmem:[%s8138_s0 + $0x330] sm:$0xff]  }
 0x17f   :  { %v6027_v31 = vpop.f32.mrb[74].mxu0  ;;  %v2485_v36 = vmax.f32 %v1678_v29, 0.0 }
 0x180   :  { %v2488_v34 = vmax.f32 %v6027_v31, 0.0  ;;  %v1681_v35 = vpop.f32.mrb[75].mxu0 }
 0x181   :  { %v2486_v37 = vmax.f32 %v1681_v35, 0.0 }
 0x182   :  { %v2706_v38 = vpack.c.bf16 %v2488_v34, %v2487_v33  ;;  %6133 = vmatmul.mubr.msk.bf16.gmra.mrb[180].mxu0 %vm967_vm0, %v6652_v30 }
 0x183   :  { %v2705_v39 = vpack.c.bf16 %v2486_v37, %v2485_v36  ;;  %6136 = vmatprep.mubr.msk.bf16.mxu0 %vm967_vm0, %v6653_v32 }
 0x185   :  { %v6030_v40 = vpop.f32.mrb[76].mxu0  ;;  %6290 = vmatprep.mubr.msk.bf16.mxu1 %vm2840_vm3, %v2705_v39 }
 0x186   :  { %v1694_v41 = vpop.f32.mrb[77].mxu0  ;;  %6291 = vmatmul.mubr.msk.bf16.gmra.mrb[72].mxu1 %vm2840_vm3, %v2706_v38  ;;  %v2491_v45 = vmax.f32 %v6030_v40, 0.0  ;;  %v6664_v38 = vld [vmem:[%s8138_s0 + $0x338] sm:$0xff]   ;;  %v6665_v40 = vld [vmem:[%s8138_s0 + $0x340] sm:$0xff]  }
 0x187   :  { %v6031_v43 = vpop.f32.mrb[78].mxu0  ;;  %v2489_v48 = vmax.f32 %v1694_v41, 0.0 }
 0x188   :  { %v2492_v46 = vmax.f32 %v6031_v43, 0.0  ;;  %v1697_v47 = vpop.f32.mrb[79].mxu0 }
 0x189   :  { %v2490_v49 = vmax.f32 %v1697_v47, 0.0 }
 0x18a   :  { %v2708_v50 = vpack.c.bf16 %v2492_v46, %v2491_v45  ;;  %6137 = vmatmul.mubr.msk.bf16.gmra.mrb[184].mxu0 %vm967_vm0, %v6654_v42 }
 0x18b   :  { %v2707_v51 = vpack.c.bf16 %v2490_v49, %v2489_v48  ;;  %6140 = vmatprep.mubr.msk.bf16.mxu0 %vm967_vm0, %v6655_v44 }
 0x18d   :  { %v6034_v52 = vpop.f32.mrb[80].mxu0  ;;  %6294 = vmatprep.mubr.msk.bf16.mxu1 %vm2840_vm3, %v2707_v51 }
 0x18e   :  { %v1710_v53 = vpop.f32.mrb[81].mxu0  ;;  %6295 = vmatmul.mubr.msk.bf16.gmra.mrb[76].mxu1 %vm2840_vm3, %v2708_v50  ;;  %v2495_v57 = vmax.f32 %v6034_v52, 0.0  ;;  %v6666_v50 = vld [vmem:[%s8138_s0 + $0x348] sm:$0xff]   ;;  %v6667_v52 = vld [vmem:[%s8138_s0 + $0x350] sm:$0xff]  }
 0x18f   :  { %v6035_v55 = vpop.f32.mrb[82].mxu0  ;;  %v2493_v60 = vmax.f32 %v1710_v53, 0.0 }
 0x190   :  { %v2496_v58 = vmax.f32 %v6035_v55, 0.0  ;;  %v1713_v59 = vpop.f32.mrb[83].mxu0 }
 0x191   :  { %v2494_v61 = vmax.f32 %v1713_v59, 0.0 }
 0x192   :  { %v2710_v62 = vpack.c.bf16 %v2496_v58, %v2495_v57  ;;  %6141 = vmatmul.mubr.msk.bf16.gmra.mrb[188].mxu0 %vm967_vm0, %v6656_v54 }
 0x193   :  { %v2709_v63 = vpack.c.bf16 %v2494_v61, %v2493_v60  ;;  %6144 = vmatprep.mubr.msk.bf16.mxu0 %vm967_vm0, %v6657_v56 }
 0x195   :  { %v6038_v0 = vpop.f32.mrb[84].mxu0  ;;  %6298 = vmatprep.mubr.msk.bf16.mxu1 %vm2840_vm3, %v2709_v63 }
 0x196   :  { %v1726_v1 = vpop.f32.mrb[85].mxu0  ;;  %6299 = vmatmul.mubr.msk.bf16.gmra.mrb[80].mxu1 %vm2840_vm3, %v2710_v62  ;;  %v2499_v5 = vmax.f32 %v6038_v0, 0.0  ;;  %v6668_v62 = vld [vmem:[%s8138_s0 + $0x358] sm:$0xff]   ;;  %v6669_v0 = vld [vmem:[%s8138_s0 + $0x360] sm:$0xff]  }
 0x197   :  { %v6039_v3 = vpop.f32.mrb[86].mxu0  ;;  %v2497_v8 = vmax.f32 %v1726_v1, 0.0 }
 0x198   :  { %v2500_v6 = vmax.f32 %v6039_v3, 0.0  ;;  %v1729_v7 = vpop.f32.mrb[87].mxu0 }
 0x199   :  { %v2498_v9 = vmax.f32 %v1729_v7, 0.0 }
 0x19a   :  { %v2712_v10 = vpack.c.bf16 %v2500_v6, %v2499_v5  ;;  %6145 = vmatmul.mubr.msk.bf16.gmra.mrb[192].mxu0 %vm967_vm0, %v6658_v2 }
 0x19b   :  { %v2711_v11 = vpack.c.bf16 %v2498_v9, %v2497_v8  ;;  %6148 = vmatprep.mubr.msk.bf16.mxu0 %vm967_vm0, %v6659_v4 }
 0x19d   :  { %v6042_v12 = vpop.f32.mrb[88].mxu0  ;;  %6302 = vmatprep.mubr.msk.bf16.mxu1 %vm2840_vm3, %v2711_v11 }
 0x19e   :  { %v1742_v13 = vpop.f32.mrb[89].mxu0  ;;  %6303 = vmatmul.mubr.msk.bf16.gmra.mrb[84].mxu1 %vm2840_vm3, %v2712_v10  ;;  %v2503_v17 = vmax.f32 %v6042_v12, 0.0  ;;  %v6670_v10 = vld [vmem:[%s8138_s0 + $0x368] sm:$0xff]   ;;  %v6671_v12 = vld [vmem:[%s8138_s0 + $0x370] sm:$0xff]  }
 0x19f   :  { %v6043_v15 = vpop.f32.mrb[90].mxu0  ;;  %v2501_v20 = vmax.f32 %v1742_v13, 0.0 }
 0x1a0   :  { %v2504_v18 = vmax.f32 %v6043_v15, 0.0  ;;  %v1745_v19 = vpop.f32.mrb[91].mxu0 }
 0x1a1   :  { %v2502_v21 = vmax.f32 %v1745_v19, 0.0 }
 0x1a2   :  { %v2714_v22 = vpack.c.bf16 %v2504_v18, %v2503_v17  ;;  %6149 = vmatmul.mubr.msk.bf16.gmra.mrb[196].mxu0 %vm967_vm0, %v6660_v14 }
 0x1a3   :  { %v2713_v23 = vpack.c.bf16 %v2502_v21, %v2501_v20  ;;  %6152 = vmatprep.mubr.msk.bf16.mxu0 %vm967_vm0, %v6661_v16  ;;  %v7270_v16 = vld [vmem:[%s8140_s3] ss:$0 sm:$0xff] }
 0x1a5   :  { %v6046_v24 = vpop.f32.mrb[92].mxu0  ;;  %6306 = vmatprep.mubr.msk.bf16.mxu1 %vm2840_vm3, %v2713_v23 }
 0x1a6   :  { %v1758_v25 = vpop.f32.mrb[93].mxu0  ;;  %6307 = vmatmul.mubr.msk.bf16.gmra.mrb[88].mxu1 %vm2840_vm3, %v2714_v22  ;;  %v2507_v29 = vmax.f32 %v6046_v24, 0.0 }
 0x1a7   :  { %v6047_v27 = vpop.f32.mrb[94].mxu0  ;;  %v2505_v32 = vmax.f32 %v1758_v25, 0.0 }
 0x1a8   :  { %v2508_v30 = vmax.f32 %v6047_v27, 0.0  ;;  %v1761_v31 = vpop.f32.mrb[95].mxu0 }
 0x1a9   :  { %v2506_v33 = vmax.f32 %v1761_v31, 0.0 }
 0x1aa   :  { %v2716_v34 = vpack.c.bf16 %v2508_v30, %v2507_v29  ;;  %6153 = vmatmul.mubr.msk.bf16.gmra.mrb[200].mxu0 %vm967_vm0, %v6662_v26  ;;  %v5132_v29 = vld [vmem:[%s8141_s4 + $0x88] sm:$0xff] }
 0x1ab   :  { %v2715_v35 = vpack.c.bf16 %v2506_v33, %v2505_v32  ;;  %6156 = vmatprep.mubr.msk.bf16.mxu0 %vm967_vm0, %v6663_v28  ;;  %v5131_v28 = vld [vmem:[%s8141_s4 + $0x80] sm:$0xff] }
 0x1ac   :  { %v6474_v33 = vpack.c.bf16 %v5132_v29, %v5131_v28 }
 0x1ad   :  { %v6050_v36 = vpop.f32.mrb[96].mxu0  ;;  %6310 = vmatprep.mubr.msk.bf16.mxu1 %vm2840_vm3, %v2715_v35  ;;  %v6672_v35 = vld [vmem:[%s8138_s0 + $0x378] sm:$0xff]  }
 0x1ae   :  { %v1774_v37 = vpop.f32.mrb[97].mxu0  ;;  %6311 = vmatmul.mubr.msk.bf16.gmra.mrb[92].mxu1 %vm2840_vm3, %v2716_v34  ;;  %v2511_v41 = vmax.f32 %v6050_v36, 0.0  ;;  %v5115_v36 = vld [vmem:[%s8141_s4] sm:$0xff]  ;;  %6475 = vmatprep.subr.bf16.mxu1 %v6474_v33 }
 0x1af   :  { %v6051_v39 = vpop.f32.mrb[98].mxu0  ;;  %v2509_v44 = vmax.f32 %v1774_v37, 0.0  ;;  %v5116_v37 = vld [vmem:[%s8141_s4 + $0x8] sm:$0xff] }
 0x1b0   :  { %v2512_v42 = vmax.f32 %v6051_v39, 0.0  ;;  %v1777_v43 = vpop.f32.mrb[99].mxu0 }
 0x1b1   :  { %v2510_v45 = vmax.f32 %v1777_v43, 0.0 }
 0x1b2   :  { %v2718_v46 = vpack.c.bf16 %v2512_v42, %v2511_v41  ;;  %6157 = vmatmul.mubr.msk.bf16.gmra.mrb[204].mxu0 %vm967_vm0, %v6664_v38  ;;  %v6673_v41 = vld [vmem:[%s8138_s0 + $0x380] sm:$0xff]   ;;  %v6476_v42 = vpack.c.bf16 %v5116_v37, %v5115_v36 }
 0x1b3   :  { %v2717_v47 = vpack.c.bf16 %v2510_v45, %v2509_v44  ;;  %6160 = vmatprep.mubr.msk.bf16.mxu0 %vm967_vm0, %v6665_v40 }
 0x1b4   :  { %6477 = vmatpush3.bf16.msra.mxu1 %v6476_v42 }
 0x1b5   :  { %v6054_v48 = vpop.f32.mrb[100].mxu0  ;;  %6314 = vmatprep.mubr.msk.bf16.mxu1 %vm2840_vm3, %v2717_v47 }
 0x1b6   :  { %v1790_v49 = vpop.f32.mrb[101].mxu0  ;;  %6315 = vmatmul.mubr.msk.bf16.gmra.mrb[96].mxu1 %vm2840_vm3, %v2718_v46  ;;  %v2515_v53 = vmax.f32 %v6054_v48, 0.0 }
 0x1b7   :  { %v6055_v51 = vpop.f32.mrb[102].mxu0  ;;  %v2513_v56 = vmax.f32 %v1790_v49, 0.0 }
 0x1b8   :  { %v2516_v54 = vmax.f32 %v6055_v51, 0.0  ;;  %v1793_v55 = vpop.f32.mrb[103].mxu0 }
 0x1b9   :  { %v2514_v57 = vmax.f32 %v1793_v55, 0.0 }
 0x1ba   :  { %v2720_v58 = vpack.c.bf16 %v2516_v54, %v2515_v53  ;;  %6161 = vmatmul.mubr.msk.bf16.gmra.mrb[208].mxu0 %vm967_vm0, %v6666_v50 }
 0x1bb   :  { %v2719_v59 = vpack.c.bf16 %v2514_v57, %v2513_v56  ;;  %6164 = vmatprep.mubr.msk.bf16.mxu0 %vm967_vm0, %v6667_v52 }
 0x1bd   :  { %v6058_v60 = vpop.f32.mrb[104].mxu0  ;;  %6318 = vmatprep.mubr.msk.bf16.mxu1 %vm2840_vm3, %v2719_v59 }
 0x1be   :  { %v1806_v61 = vpop.f32.mrb[105].mxu0  ;;  %6319 = vmatmul.mubr.msk.bf16.gmra.mrb[100].mxu1 %vm2840_vm3, %v2720_v58  ;;  %v2519_v1 = vmax.f32 %v6058_v60, 0.0 }
 0x1bf   :  { %v6059_v63 = vpop.f32.mrb[106].mxu0  ;;  %v2517_v4 = vmax.f32 %v1806_v61, 0.0 }
 0x1c0   :  { %v2520_v2 = vmax.f32 %v6059_v63, 0.0  ;;  %v1809_v3 = vpop.f32.mrb[107].mxu0 }
 0x1c1   :  { %v2518_v5 = vmax.f32 %v1809_v3, 0.0 }
 0x1c2   :  { %v2722_v6 = vpack.c.bf16 %v2520_v2, %v2519_v1  ;;  %6165 = vmatmul.mubr.msk.bf16.gmra.mrb[212].mxu0 %vm967_vm0, %v6668_v62 }
 0x1c3   :  { %v2721_v7 = vpack.c.bf16 %v2518_v5, %v2517_v4  ;;  %6168 = vmatprep.mubr.msk.bf16.mxu0 %vm967_vm0, %v6669_v0  ;;  %v6674_v5 = vld [vmem:[%s8138_s0 + $0x388] sm:$0xff]  }
 0x1c5   :  { %v6062_v8 = vpop.f32.mrb[108].mxu0  ;;  %6322 = vmatprep.mubr.msk.bf16.mxu1 %vm2840_vm3, %v2721_v7 }
 0x1c6   :  { %v1822_v9 = vpop.f32.mrb[109].mxu0  ;;  %6323 = vmatmul.mubr.msk.bf16.gmra.mrb[104].mxu1 %vm2840_vm3, %v2722_v6  ;;  %v2523_v13 = vmax.f32 %v6062_v8, 0.0 }
 0x1c7   :  { %v6063_v11 = vpop.f32.mrb[110].mxu0  ;;  %v2521_v17 = vmax.f32 %v1822_v9, 0.0 }
 0x1c8   :  { %v2524_v14 = vmax.f32 %v6063_v11, 0.0  ;;  %v1825_v15 = vpop.f32.mrb[111].mxu0 }
 0x1c9   :  { %v2522_v18 = vmax.f32 %v1825_v15, 0.0  ;;  %v6220_v19 = vpop.f32.mrb[0].mxu1 }
 0x1ca   :  { %v2724_v20 = vpack.c.bf16 %v2524_v14, %v2523_v13  ;;  %6169 = vmatmul.mubr.msk.bf16.gmra.mrb[216].mxu0 %vm967_vm0, %v6670_v10  ;;  %v3263_v21 = vpop.f32.mrb[1].mxu1  ;;  %v3272_v23 = vadd.f32 %v6220_v19, %v7270_v16  ;;  %v6675_v10 = vld [vmem:[%s8138_s0 + $0x390] sm:$0xff]  }
 0x1cb   :  { %v2723_v22 = vpack.c.bf16 %v2522_v18, %v2521_v17  ;;  %v3264_v24 = vadd.f32 %v7270_v16, %v3263_v21  ;;  %v6221_v25 = vpop.f32.mrb[2].mxu1  ;;  %6172 = vmatprep.mubr.msk.bf16.mxu0 %vm967_vm0, %v6671_v12 }
 0x1cc   :  { %v3275_v26 = vadd.f32 %v6221_v25, %v7270_v16  ;;  %v3266_v27 = vpop.f32.mrb[3].mxu1  ;;  %v4288_v38 = vmax.f32 %v3272_v23, 0.0 }
 0x1cd   :  { %v4286_v30 = vmax.f32 %v3264_v24, 0.0  ;;  %v3267_v31 = vadd.f32 %v7270_v16, %v3266_v27  ;;  %v6066_v32 = vpop.f32.mrb[112].mxu0  ;;  %6326 = vmatprep.mubr.msk.bf16.mxu1 %vm2840_vm3, %v2723_v22 }
 0x1ce   :  { %v1838_v34 = vpop.f32.mrb[113].mxu0  ;;  %6327 = vmatmul.mubr.msk.bf16.gmra.mrb[108].mxu1 %vm2840_vm3, %v2724_v20  ;;  %v4289_v43 = vmax.f32 %v3275_v26, 0.0  ;;  %v2527_v44 = vmax.f32 %v6066_v32, 0.0  ;;  %v4546_v55 = vsel %vm4542_vm4, %v4288_v38, -inf  ;;  %v6676_v38 = vld [vmem:[%s8138_s0 + $0x398] sm:$0xff]  }
 0x1cf   :  { %v4287_v39 = vmax.f32 %v3267_v31, 0.0  ;;  %v6067_v40 = vpop.f32.mrb[114].mxu0  ;;  %v4543_v47 = vsel %vm4542_vm4, %v4286_v30, -inf  ;;  %v2525_v49 = vmax.f32 %v1838_v34, 0.0 }
 0x1d0   :  { %v2528_v45 = vmax.f32 %v6067_v40, 0.0  ;;  %v1841_v46 = vpop.f32.mrb[115].mxu0  ;;  %v4548_v62 = vsel %vm4542_vm4, %v4289_v43, -inf  ;;  %v6677_v43 = vld [vmem:[%s8138_s0 + $0x3a0] sm:$0xff]  }
 0x1d1   :  { %v4544_v48 = vsel %vm4542_vm4, %v4287_v39, -inf  ;;  %v2526_v50 = vmax.f32 %v1841_v46, 0.0  ;;  %v6224_v51 = vpop.f32.mrb[4].mxu1 }
 0x1d2   :  { %v4545_v52 = vmax.f32 %v4543_v47, %v4544_v48  ;;  %v2726_v53 = vpack.c.bf16 %v2528_v45, %v2527_v44  ;;  %6173 = vmatmul.mubr.msk.bf16.gmra.mrb[220].mxu0 %vm967_vm0, %v6672_v35  ;;  %v3279_v54 = vpop.f32.mrb[5].mxu1  ;;  %v3288_v57 = vadd.f32 %v6224_v51, %v7270_v16 }
 0x1d3   :  { %v2725_v56 = vpack.c.bf16 %v2526_v50, %v2525_v49  ;;  %v3280_v58 = vadd.f32 %v7270_v16, %v3279_v54  ;;  %v6225_v59 = vpop.f32.mrb[6].mxu1  ;;  %6176 = vmatprep.mubr.msk.bf16.mxu0 %vm967_vm0, %v6673_v41 }
 0x1d4   :  { %v4547_v60 = vmax.f32 %v4545_v52, %v4546_v55  ;;  %v3282_v61 = vpop.f32.mrb[7].mxu1  ;;  %v3291_v0 = vadd.f32 %v6225_v59, %v7270_v16  ;;  %v4292_v6 = vmax.f32 %v3288_v57, 0.0 }
 0x1d5   :  { %v4290_v63 = vmax.f32 %v3280_v58, 0.0  ;;  %v3283_v1 = vadd.f32 %v7270_v16, %v3282_v61  ;;  %v6070_v2 = vpop.f32.mrb[116].mxu0  ;;  %6330 = vmatprep.mubr.msk.bf16.mxu1 %vm2840_vm3, %v2725_v56 }
 0x1d6   :  { %v4549_v3 = vmax.f32 %v4547_v60, %v4548_v62  ;;  %v1854_v4 = vpop.f32.mrb[117].mxu0  ;;  %6331 = vmatmul.mubr.msk.bf16.gmra.mrb[112].mxu1 %vm2840_vm3, %v2726_v53  ;;  %v2531_v12 = vmax.f32 %v6070_v2, 0.0  ;;  %v4293_v15 = vmax.f32 %v3291_v0, 0.0  ;;  %v4554_v24 = vsel %vm4542_vm4, %v4292_v6, -inf  ;;  %v6678_v6 = vld [vmem:[%s8138_s0 + $0x3a8] sm:$0xff]  }
 0x1d7   :  { %v4550_v7 = vsel %vm4542_vm4, %v4290_v63, -inf  ;;  %v4291_v8 = vmax.f32 %v3283_v1, 0.0  ;;  %v6071_v9 = vpop.f32.mrb[118].mxu0  ;;  %v2529_v18 = vmax.f32 %v1854_v4, 0.0 }
 0x1d8   :  { %v4551_v11 = vmax.f32 %v4549_v3, %v4550_v7  ;;  %v2532_v13 = vmax.f32 %v6071_v9, 0.0  ;;  %v1857_v14 = vpop.f32.mrb[119].mxu0  ;;  %v4556_v31 = vsel %vm4542_vm4, %v4293_v15, -inf }
 0x1d9   :  { %v4552_v17 = vsel %vm4542_vm4, %v4291_v8, -inf  ;;  %v2530_v19 = vmax.f32 %v1857_v14, 0.0  ;;  %v6228_v20 = vpop.f32.mrb[8].mxu1 }
 0x1da   :  { %v4553_v21 = vmax.f32 %v4551_v11, %v4552_v17  ;;  %v2728_v22 = vpack.c.bf16 %v2532_v13, %v2531_v12  ;;  %6177 = vmatmul.mubr.msk.bf16.gmra.mrb[224].mxu0 %vm967_vm0, %v6674_v5  ;;  %v3295_v23 = vpop.f32.mrb[9].mxu1  ;;  %v3304_v26 = vadd.f32 %v6228_v20, %v7270_v16  ;;  %v6679_v11 = vld [vmem:[%s8138_s0 + $0x3b0] sm:$0xff]  }
 0x1db   :  { %v2727_v25 = vpack.c.bf16 %v2530_v19, %v2529_v18  ;;  %v3296_v27 = vadd.f32 %v7270_v16, %v3295_v23  ;;  %v6229_v28 = vpop.f32.mrb[10].mxu1  ;;  %6180 = vmatprep.mubr.msk.bf16.mxu0 %vm967_vm0, %v6675_v10 }
 0x1dc   :  { %v4555_v29 = vmax.f32 %v4553_v21, %v4554_v24  ;;  %v3298_v30 = vpop.f32.mrb[11].mxu1  ;;  %v3307_v33 = vadd.f32 %v6229_v28, %v7270_v16  ;;  %v4296_v39 = vmax.f32 %v3304_v26, 0.0 }
 0x1dd   :  { %v4294_v32 = vmax.f32 %v3296_v27, 0.0  ;;  %v3299_v34 = vadd.f32 %v7270_v16, %v3298_v30  ;;  %v6074_v35 = vpop.f32.mrb[120].mxu0  ;;  %6334 = vmatprep.mubr.msk.bf16.mxu1 %vm2840_vm3, %v2727_v25 }
 0x1de   :  { %v4557_v36 = vmax.f32 %v4555_v29, %v4556_v31  ;;  %v1870_v37 = vpop.f32.mrb[121].mxu0  ;;  %6335 = vmatmul.mubr.msk.bf16.gmra.mrb[116].mxu1 %vm2840_vm3, %v2728_v22  ;;  %v2535_v45 = vmax.f32 %v6074_v35, 0.0  ;;  %v4297_v48 = vmax.f32 %v3307_v33, 0.0  ;;  %v4562_v56 = vsel %vm4542_vm4, %v4296_v39, -inf  ;;  %v6680_v39 = vld [vmem:[%s8138_s0 + $0x3b8] sm:$0xff]  }
 0x1df   :  { %v4558_v40 = vsel %vm4542_vm4, %v4294_v32, -inf  ;;  %v4295_v41 = vmax.f32 %v3299_v34, 0.0  ;;  %v6075_v42 = vpop.f32.mrb[122].mxu0  ;;  %v2533_v50 = vmax.f32 %v1870_v37, 0.0 }
 0x1e0   :  { %v4559_v44 = vmax.f32 %v4557_v36, %v4558_v40  ;;  %v2536_v46 = vmax.f32 %v6075_v42, 0.0  ;;  %v1873_v47 = vpop.f32.mrb[123].mxu0  ;;  %v4564_v63 = vsel %vm4542_vm4, %v4297_v48, -inf }
 0x1e1   :  { %v4560_v49 = vsel %vm4542_vm4, %v4295_v41, -inf  ;;  %v2534_v51 = vmax.f32 %v1873_v47, 0.0  ;;  %v6232_v52 = vpop.f32.mrb[12].mxu1 }
 0x1e2   :  { %v4561_v53 = vmax.f32 %v4559_v44, %v4560_v49  ;;  %v2730_v54 = vpack.c.bf16 %v2536_v46, %v2535_v45  ;;  %6181 = vmatmul.mubr.msk.bf16.gmra.mrb[228].mxu0 %vm967_vm0, %v6676_v38  ;;  %v3311_v55 = vpop.f32.mrb[13].mxu1  ;;  %v3320_v58 = vadd.f32 %v6232_v52, %v7270_v16 }
 0x1e3   :  { %v2729_v57 = vpack.c.bf16 %v2534_v51, %v2533_v50  ;;  %v3312_v59 = vadd.f32 %v7270_v16, %v3311_v55  ;;  %v6233_v60 = vpop.f32.mrb[14].mxu1  ;;  %6184 = vmatprep.mubr.msk.bf16.mxu0 %vm967_vm0, %v6677_v43  ;;  %v6681_v43 = vld [vmem:[%s8138_s0 + $0x3c0] sm:$0xff]  }
 0x1e4   :  { %v4563_v61 = vmax.f32 %v4561_v53, %v4562_v56  ;;  %v3314_v62 = vpop.f32.mrb[15].mxu1  ;;  %v3323_v1 = vadd.f32 %v6233_v60, %v7270_v16  ;;  %v4300_v7 = vmax.f32 %v3320_v58, 0.0 }
 0x1e5   :  { %v4298_v0 = vmax.f32 %v3312_v59, 0.0  ;;  %v3315_v2 = vadd.f32 %v7270_v16, %v3314_v62  ;;  %v6078_v3 = vpop.f32.mrb[124].mxu0  ;;  %6338 = vmatprep.mubr.msk.bf16.mxu1 %vm2840_vm3, %v2729_v57 }
 0x1e6   :  { %v4565_v4 = vmax.f32 %v4563_v61, %v4564_v63  ;;  %v1886_v5 = vpop.f32.mrb[125].mxu0  ;;  %6339 = vmatmul.mubr.msk.bf16.gmra.mrb[120].mxu1 %vm2840_vm3, %v2730_v54  ;;  %v2539_v13 = vmax.f32 %v6078_v3, 0.0  ;;  %v4301_v17 = vmax.f32 %v3323_v1, 0.0  ;;  %v4570_v25 = vsel %vm4542_vm4, %v4300_v7, -inf }
 0x1e7   :  { %v4566_v8 = vsel %vm4542_vm4, %v4298_v0, -inf  ;;  %v4299_v9 = vmax.f32 %v3315_v2, 0.0  ;;  %v6079_v10 = vpop.f32.mrb[126].mxu0  ;;  %v2537_v19 = vmax.f32 %v1886_v5, 0.0 }
 0x1e8   :  { %v4567_v12 = vmax.f32 %v4565_v4, %v4566_v8  ;;  %v2540_v14 = vmax.f32 %v6079_v10, 0.0  ;;  %v1889_v15 = vpop.f32.mrb[127].mxu0  ;;  %v7363_v33 = vsel %vm4542_vm4, %v4301_v17, -inf }
 0x1e9   :  { %v4568_v18 = vsel %vm4542_vm4, %v4299_v9, -inf  ;;  %v2538_v20 = vmax.f32 %v1889_v15, 0.0  ;;  %v6236_v21 = vpop.f32.mrb[16].mxu1 }
 0x1ea   :  { %v4569_v22 = vmax.f32 %v4567_v12, %v4568_v18  ;;  %v2732_v23 = vpack.c.bf16 %v2540_v14, %v2539_v13  ;;  %6185 = vmatmul.mubr.msk.bf16.gmra.mrb[232].mxu0 %vm967_vm0, %v6678_v6  ;;  %v3327_v24 = vpop.f32.mrb[17].mxu1  ;;  %v3336_v27 = vadd.f32 %v6236_v21, %v7270_v16  ;;  %v6682_v6 = vld [vmem:[%s8138_s0 + $0x3c8] sm:$0xff]  }
 0x1eb   :  { %v2731_v26 = vpack.c.bf16 %v2538_v20, %v2537_v19  ;;  %v3328_v28 = vadd.f32 %v7270_v16, %v3327_v24  ;;  %v6237_v29 = vpop.f32.mrb[18].mxu1  ;;  %6188 = vmatprep.mubr.msk.bf16.mxu0 %vm967_vm0, %v6679_v11  ;;  %v6683_v11 = vld [vmem:[%s8138_s0 + $0x3d0] sm:$0xff]  }
 0x1ec   :  { %v7359_v30 = vmax.f32 %v4569_v22, %v4570_v25  ;;  %v3339_v31 = vadd.f32 %v6237_v29, %v7270_v16  ;;  %v3330_v32 = vpop.f32.mrb[19].mxu1  ;;  %v4304_v40 = vmax.f32 %v3336_v27, 0.0 }
 0x1ed   :  { %v4302_v34 = vmax.f32 %v3328_v28, 0.0  ;;  %v3331_v35 = vadd.f32 %v7270_v16, %v3330_v32  ;;  %v6082_v36 = vpop.f32.mrb[128].mxu0  ;;  %6342 = vmatprep.mubr.msk.bf16.mxu1 %vm2840_vm3, %v2731_v26 }
 0x1ee   :  { %v4573_v37 = vmax.f32 %v7359_v30, %v7363_v33  ;;  %v1902_v38 = vpop.f32.mrb[129].mxu0  ;;  %6343 = vmatmul.mubr.msk.bf16.gmra.mrb[124].mxu1 %vm2840_vm3, %v2732_v23  ;;  %v4305_v44 = vmax.f32 %v3339_v31, 0.0  ;;  %v2543_v45 = vmax.f32 %v6082_v36, 0.0  ;;  %v4577_v56 = vsel %vm4542_vm4, %v4304_v40, -inf }
 0x1ef   :  { %v4303_v41 = vmax.f32 %v3331_v35, 0.0  ;;  %v6083_v42 = vpop.f32.mrb[130].mxu0  ;;  %v4574_v48 = vsel %vm4542_vm4, %v4302_v34, -inf  ;;  %v2541_v50 = vmax.f32 %v1902_v38, 0.0 }
 0x1f0   :  { %v2544_v46 = vmax.f32 %v6083_v42, 0.0  ;;  %v1905_v47 = vpop.f32.mrb[131].mxu0  ;;  %v4579_v63 = vsel %vm4542_vm4, %v4305_v44, -inf  ;;  %v6684_v42 = vld [vmem:[%s8138_s0 + $0x3d8] sm:$0xff]  }
 0x1f1   :  { %v4575_v49 = vsel %vm4542_vm4, %v4303_v41, -inf  ;;  %v2542_v51 = vmax.f32 %v1905_v47, 0.0  ;;  %v6240_v52 = vpop.f32.mrb[20].mxu1  ;;  %v6685_v47 = vld [vmem:[%s8138_s0 + $0x3e0] sm:$0xff]  }
 0x1f2   :  { %v4576_v53 = vmax.f32 %v4574_v48, %v4575_v49  ;;  %v2734_v54 = vpack.c.bf16 %v2544_v46, %v2543_v45  ;;  %6189 = vmatmul.mubr.msk.bf16.gmra.mrb[236].mxu0 %vm967_vm0, %v6680_v39  ;;  %v3343_v55 = vpop.f32.mrb[21].mxu1  ;;  %v3352_v58 = vadd.f32 %v6240_v52, %v7270_v16 }
 0x1f3   :  { %v2733_v57 = vpack.c.bf16 %v2542_v51, %v2541_v50  ;;  %v3344_v59 = vadd.f32 %v7270_v16, %v3343_v55  ;;  %v6241_v60 = vpop.f32.mrb[22].mxu1  ;;  %6192 = vmatprep.mubr.msk.bf16.mxu0 %vm967_vm0, %v6681_v43 }
 0x1f4   :  { %v4578_v61 = vmax.f32 %v4576_v53, %v4577_v56  ;;  %v3346_v62 = vpop.f32.mrb[23].mxu1  ;;  %v3355_v1 = vadd.f32 %v6241_v60, %v7270_v16  ;;  %v4308_v7 = vmax.f32 %v3352_v58, 0.0 }
 0x1f5   :  { %v4306_v0 = vmax.f32 %v3344_v59, 0.0  ;;  %v3347_v2 = vadd.f32 %v7270_v16, %v3346_v62  ;;  %v6086_v3 = vpop.f32.mrb[132].mxu0  ;;  %6346 = vmatprep.mubr.msk.bf16.mxu1 %vm2840_vm3, %v2733_v57 }
 0x1f6   :  { %v4580_v4 = vmax.f32 %v4578_v61, %v4579_v63  ;;  %v1918_v5 = vpop.f32.mrb[133].mxu0  ;;  %6347 = vmatmul.mubr.msk.bf16.gmra.mrb[128].mxu1 %vm2840_vm3, %v2734_v54  ;;  %v2547_v13 = vmax.f32 %v6086_v3, 0.0  ;;  %v4309_v17 = vmax.f32 %v3355_v1, 0.0  ;;  %v4585_v25 = vsel %vm4542_vm4, %v4308_v7, -inf }
 0x1f7   :  { %v4581_v8 = vsel %vm4542_vm4, %v4306_v0, -inf  ;;  %v4307_v9 = vmax.f32 %v3347_v2, 0.0  ;;  %v6087_v10 = vpop.f32.mrb[134].mxu0  ;;  %v2545_v19 = vmax.f32 %v1918_v5, 0.0 }
 0x1f8   :  { %v4582_v12 = vmax.f32 %v4580_v4, %v4581_v8  ;;  %v2548_v14 = vmax.f32 %v6087_v10, 0.0  ;;  %v1921_v15 = vpop.f32.mrb[135].mxu0  ;;  %v4587_v34 = vsel %vm4542_vm4, %v4309_v17, -inf  ;;  %v6686_v10 = vld [vmem:[%s8138_s0 + $0x3e8] sm:$0xff]  }
 0x1f9   :  { %v4583_v18 = vsel %vm4542_vm4, %v4307_v9, -inf  ;;  %v2546_v20 = vmax.f32 %v1921_v15, 0.0  ;;  %v6244_v21 = vpop.f32.mrb[24].mxu1  ;;  %v6687_v15 = vld [vmem:[%s8138_s0 + $0x3f0] sm:$0xff]  }
 0x1fa   :  { %v4584_v22 = vmax.f32 %v4582_v12, %v4583_v18  ;;  %v2736_v23 = vpack.c.bf16 %v2548_v14, %v2547_v13  ;;  %6193 = vmatmul.mubr.msk.bf16.gmra.mrb[240].mxu0 %vm967_vm0, %v6682_v6  ;;  %v3359_v24 = vpop.f32.mrb[25].mxu1  ;;  %v3368_v27 = vadd.f32 %v6244_v21, %v7270_v16 }
 0x1fb   :  { %v2735_v26 = vpack.c.bf16 %v2546_v20, %v2545_v19  ;;  %v3360_v28 = vadd.f32 %v7270_v16, %v3359_v24  ;;  %v6245_v29 = vpop.f32.mrb[26].mxu1  ;;  %6196 = vmatprep.mubr.msk.bf16.mxu0 %vm967_vm0, %v6683_v11 }
 0x1fc   :  { %v4586_v31 = vmax.f32 %v4584_v22, %v4585_v25  ;;  %v3362_v32 = vpop.f32.mrb[27].mxu1  ;;  %v3371_v36 = vadd.f32 %v6245_v29, %v7270_v16  ;;  %v4312_v43 = vmax.f32 %v3368_v27, 0.0 }
 0x1fd   :  { %v4310_v35 = vmax.f32 %v3360_v28, 0.0  ;;  %v3363_v38 = vadd.f32 %v7270_v16, %v3362_v32  ;;  %v6090_v39 = vpop.f32.mrb[136].mxu0  ;;  %6350 = vmatprep.mubr.msk.bf16.mxu1 %vm2840_vm3, %v2735_v26 }
 0x1fe   :  { %v4588_v40 = vmax.f32 %v4586_v31, %v4587_v34  ;;  %v1934_v41 = vpop.f32.mrb[137].mxu0  ;;  %6351 = vmatmul.mubr.msk.bf16.gmra.mrb[132].mxu1 %vm2840_vm3, %v2736_v23  ;;  %v2551_v49 = vmax.f32 %v6090_v39, 0.0  ;;  %v4313_v52 = vmax.f32 %v3371_v36, 0.0  ;;  %v4593_v60 = vsel %vm4542_vm4, %v4312_v43, -inf  ;;  %v5133_v39 = vld [vmem:[%s8141_s4 + $0x90] sm:$0xff] }
 0x1ff   :  { %v4589_v44 = vsel %vm4542_vm4, %v4310_v35, -inf  ;;  %v4311_v45 = vmax.f32 %v3363_v38, 0.0  ;;  %v6091_v46 = vpop.f32.mrb[138].mxu0  ;;  %v2549_v54 = vmax.f32 %v1934_v41, 0.0 }
 0x200   :  { %v4590_v48 = vmax.f32 %v4588_v40, %v4589_v44  ;;  %v2552_v50 = vmax.f32 %v6091_v46, 0.0  ;;  %v1937_v51 = vpop.f32.mrb[139].mxu0  ;;  %v4595_v3 = vsel %vm4542_vm4, %v4313_v52, -inf  ;;  %v5134_v40 = vld [vmem:[%s8141_s4 + $0x98] sm:$0xff] }
 0x201   :  { %v4591_v53 = vsel %vm4542_vm4, %v4311_v45, -inf  ;;  %v2550_v55 = vmax.f32 %v1937_v51, 0.0  ;;  %v6248_v56 = vpop.f32.mrb[28].mxu1  ;;  %v6478_v46 = vpack.c.bf16 %v5134_v40, %v5133_v39 }
 0x202   :  { %v4592_v57 = vmax.f32 %v4590_v48, %v4591_v53  ;;  %v2738_v58 = vpack.c.bf16 %v2552_v50, %v2551_v49  ;;  %6197 = vmatmul.mubr.msk.bf16.gmra.mrb[244].mxu0 %vm967_vm0, %v6684_v42  ;;  %v3375_v59 = vpop.f32.mrb[29].mxu1  ;;  %v3384_v62 = vadd.f32 %v6248_v56, %v7270_v16  ;;  %v6688_v48 = vld [vmem:[%s8138_s0 + $0x3f8] sm:$0xff]   ;;  %v5117_v49 = vld [vmem:[%s8141_s4 + $0x10] sm:$0xff] }
 0x203   :  { %v2737_v61 = vpack.c.bf16 %v2550_v55, %v2549_v54  ;;  %v3376_v63 = vadd.f32 %v7270_v16, %v3375_v59  ;;  %v6249_v0 = vpop.f32.mrb[30].mxu1  ;;  %6200 = vmatprep.mubr.msk.bf16.mxu0 %vm967_vm0, %v6685_v47  ;;  %v5118_v50 = vld [vmem:[%s8141_s4 + $0x18] sm:$0xff]  ;;  %6479 = vmatprep.subr.bf16.mxu1 %v6478_v46 }
 0x204   :  { %v4594_v1 = vmax.f32 %v4592_v57, %v4593_v60  ;;  %v3378_v2 = vpop.f32.mrb[31].mxu1  ;;  %v3387_v5 = vadd.f32 %v6249_v0, %v7270_v16  ;;  %v4316_v11 = vmax.f32 %v3384_v62, 0.0  ;;  %v6480_v55 = vpack.c.bf16 %v5118_v50, %v5117_v49 }
 0x205   :  { %v4314_v4 = vmax.f32 %v3376_v63, 0.0  ;;  %v3379_v6 = vadd.f32 %v7270_v16, %v3378_v2  ;;  %v6094_v7 = vpop.f32.mrb[140].mxu0  ;;  %6354 = vmatprep.mubr.msk.bf16.mxu1 %vm2840_vm3, %v2737_v61 }
 0x206   :  { %v4596_v8 = vmax.f32 %v4594_v1, %v4595_v3  ;;  %v1950_v9 = vpop.f32.mrb[141].mxu0  ;;  %6355 = vmatmul.mubr.msk.bf16.gmra.mrb[136].mxu1 %vm2840_vm3, %v2738_v58  ;;  %v2555_v18 = vmax.f32 %v6094_v7, 0.0  ;;  %v4317_v21 = vmax.f32 %v3387_v5, 0.0  ;;  %v4601_v29 = vsel %vm4542_vm4, %v4316_v11, -inf }
 0x207   :  { %v4597_v12 = vsel %vm4542_vm4, %v4314_v4, -inf  ;;  %v4315_v13 = vmax.f32 %v3379_v6, 0.0  ;;  %v6095_v14 = vpop.f32.mrb[142].mxu0  ;;  %v2553_v23 = vmax.f32 %v1950_v9, 0.0  ;;  %6481 = vmatpush3.bf16.msra.mxu1 %v6480_v55 }
 0x208   :  { %v4598_v17 = vmax.f32 %v4596_v8, %v4597_v12  ;;  %v2556_v19 = vmax.f32 %v6095_v14, 0.0  ;;  %v1953_v20 = vpop.f32.mrb[143].mxu0  ;;  %v7447_v42 = vsel %vm4542_vm4, %v4317_v21, -inf }
 0x209   :  { %v4599_v22 = vsel %vm4542_vm4, %v4315_v13, -inf  ;;  %v2554_v24 = vmax.f32 %v1953_v20, 0.0  ;;  %v6252_v25 = vpop.f32.mrb[32].mxu1 }
 0x20a   :  { %v4600_v26 = vmax.f32 %v4598_v17, %v4599_v22  ;;  %v2740_v27 = vpack.c.bf16 %v2556_v19, %v2555_v18  ;;  %6201 = vmatmul.mubr.msk.bf16.gmra.mrb[248].mxu0 %vm967_vm0, %v6686_v10  ;;  %v3391_v28 = vpop.f32.mrb[33].mxu1  ;;  %v3400_v32 = vadd.f32 %v6252_v25, %v7270_v16 }
 0x20b   :  { %v2739_v31 = vpack.c.bf16 %v2554_v24, %v2553_v23  ;;  %v3392_v34 = vadd.f32 %v7270_v16, %v3391_v28  ;;  %v6253_v35 = vpop.f32.mrb[34].mxu1  ;;  %6204 = vmatprep.mubr.msk.bf16.mxu0 %vm967_vm0, %v6687_v15 }
 0x20c   :  { %v3403_v36 = vadd.f32 %v6253_v35, %v7270_v16  ;;  %v3394_v38 = vpop.f32.mrb[35].mxu1  ;;  %v7444_v41 = vmax.f32 %v4600_v26, %v4601_v29  ;;  %v4320_v52 = vmax.f32 %v3400_v32, 0.0 }
 0x20d   :  { %v4318_v43 = vmax.f32 %v3392_v34, 0.0  ;;  %v3395_v44 = vadd.f32 %v7270_v16, %v3394_v38  ;;  %v6098_v45 = vpop.f32.mrb[144].mxu0  ;;  %6358 = vmatprep.mubr.msk.bf16.mxu1 %vm2840_vm3, %v2739_v31 }
 0x20e   :  { %v1966_v47 = vpop.f32.mrb[145].mxu0  ;;  %6359 = vmatmul.mubr.msk.bf16.gmra.mrb[140].mxu1 %vm2840_vm3, %v2740_v27  ;;  %v4604_v51 = vmax.f32 %v7444_v41, %v7447_v42  ;;  %v4321_v56 = vmax.f32 %v3403_v36, 0.0  ;;  %v2559_v57 = vmax.f32 %v6098_v45, 0.0  ;;  %v4608_v4 = vsel %vm4542_vm4, %v4320_v52, -inf }
 0x20f   :  { %v4319_v53 = vmax.f32 %v3395_v44, 0.0  ;;  %v6099_v54 = vpop.f32.mrb[146].mxu0  ;;  %v4605_v60 = vsel %vm4542_vm4, %v4318_v43, -inf  ;;  %v2557_v62 = vmax.f32 %v1966_v47, 0.0 }
 0x210   :  { %v2560_v58 = vmax.f32 %v6099_v54, 0.0  ;;  %v1969_v59 = vpop.f32.mrb[147].mxu0  ;;  %v4610_v11 = vsel %vm4542_vm4, %v4321_v56, -inf }
 0x211   :  { %v4606_v61 = vsel %vm4542_vm4, %v4319_v53, -inf  ;;  %v2558_v63 = vmax.f32 %v1969_v59, 0.0  ;;  %v6256_v0 = vpop.f32.mrb[36].mxu1 }
 0x212   :  { %v4607_v1 = vmax.f32 %v4605_v60, %v4606_v61  ;;  %v2742_v2 = vpack.c.bf16 %v2560_v58, %v2559_v57  ;;  %6205 = vmatmul.mubr.msk.bf16.gmra.mrb[252].mxu0 %vm967_vm0, %v6688_v48  ;;  %v3407_v3 = vpop.f32.mrb[37].mxu1  ;;  %v3416_v6 = vadd.f32 %v6256_v0, %v7270_v16 }
 0x213   :  { %v2741_v5 = vpack.c.bf16 %v2558_v63, %v2557_v62  ;;  %v3408_v7 = vadd.f32 %v7270_v16, %v3407_v3  ;;  %v6257_v8 = vpop.f32.mrb[38].mxu1 }
 0x214   :  { %v4609_v9 = vmax.f32 %v4607_v1, %v4608_v4  ;;  %v3410_v10 = vpop.f32.mrb[39].mxu1  ;;  %v3419_v13 = vadd.f32 %v6257_v8, %v7270_v16  ;;  %v4324_v19 = vmax.f32 %v3416_v6, 0.0 }
 0x215   :  { %v4322_v12 = vmax.f32 %v3408_v7, 0.0  ;;  %v3411_v14 = vadd.f32 %v7270_v16, %v3410_v10  ;;  %v6102_v15 = vpop.f32.mrb[148].mxu0  ;;  %6362 = vmatprep.mubr.msk.bf16.mxu1 %vm2840_vm3, %v2741_v5 }
 0x216   :  { %v4611_v17 = vmax.f32 %v4609_v9, %v4610_v11  ;;  %v1982_v18 = vpop.f32.mrb[149].mxu0  ;;  %6363 = vmatmul.mubr.msk.bf16.gmra.mrb[144].mxu1 %vm2840_vm3, %v2742_v2  ;;  %v2563_v24 = vmax.f32 %v6102_v15, 0.0  ;;  %v4325_v27 = vmax.f32 %v3419_v13, 0.0  ;;  %v4616_v38 = vsel %vm4542_vm4, %v4324_v19, -inf }
 0x217   :  { %v4612_v20 = vsel %vm4542_vm4, %v4322_v12, -inf  ;;  %v4323_v21 = vmax.f32 %v3411_v14, 0.0  ;;  %v6103_v22 = vpop.f32.mrb[150].mxu0  ;;  %v2561_v29 = vmax.f32 %v1982_v18, 0.0 }
 0x218   :  { %v4613_v23 = vmax.f32 %v4611_v17, %v4612_v20  ;;  %v2564_v25 = vmax.f32 %v6103_v22, 0.0  ;;  %v1985_v26 = vpop.f32.mrb[151].mxu0  ;;  %v4618_v47 = vsel %vm4542_vm4, %v4325_v27, -inf }
 0x219   :  { %v4614_v28 = vsel %vm4542_vm4, %v4323_v21, -inf  ;;  %v2562_v31 = vmax.f32 %v1985_v26, 0.0  ;;  %v6260_v32 = vpop.f32.mrb[40].mxu1 }
 0x21a   :  { %v4615_v34 = vmax.f32 %v4613_v23, %v4614_v28  ;;  %v2744_v35 = vpack.c.bf16 %v2564_v25, %v2563_v24  ;;  %v3423_v36 = vpop.f32.mrb[41].mxu1  ;;  %v3432_v40 = vadd.f32 %v6260_v32, %v7270_v16 }
 0x21b   :  { %v2743_v39 = vpack.c.bf16 %v2562_v31, %v2561_v29  ;;  %v3424_v43 = vadd.f32 %v7270_v16, %v3423_v36  ;;  %v6261_v44 = vpop.f32.mrb[42].mxu1 }
 0x21c   :  { %v4617_v45 = vmax.f32 %v4615_v34, %v4616_v38  ;;  %v3426_v46 = vpop.f32.mrb[43].mxu1  ;;  %v3435_v49 = vadd.f32 %v6261_v44, %v7270_v16  ;;  %v4328_v55 = vmax.f32 %v3432_v40, 0.0 }
 0x21d   :  { %v4326_v48 = vmax.f32 %v3424_v43, 0.0  ;;  %v3427_v50 = vadd.f32 %v7270_v16, %v3426_v46  ;;  %v6106_v52 = vpop.f32.mrb[152].mxu0  ;;  %6366 = vmatprep.mubr.msk.bf16.mxu1 %vm2840_vm3, %v2743_v39 }
 0x21e   :  { %v4619_v53 = vmax.f32 %v4617_v45, %v4618_v47  ;;  %v1998_v54 = vpop.f32.mrb[153].mxu0  ;;  %6367 = vmatmul.mubr.msk.bf16.gmra.mrb[148].mxu1 %vm2840_vm3, %v2744_v35  ;;  %v2567_v60 = vmax.f32 %v6106_v52, 0.0  ;;  %v4329_v63 = vmax.f32 %v3435_v49, 0.0  ;;  %v4624_v7 = vsel %vm4542_vm4, %v4328_v55, -inf }
 0x21f   :  { %v4620_v56 = vsel %vm4542_vm4, %v4326_v48, -inf  ;;  %v4327_v57 = vmax.f32 %v3427_v50, 0.0  ;;  %v6107_v58 = vpop.f32.mrb[154].mxu0  ;;  %v2565_v1 = vmax.f32 %v1998_v54, 0.0 }
 0x220   :  { %v4621_v59 = vmax.f32 %v4619_v53, %v4620_v56  ;;  %v2568_v61 = vmax.f32 %v6107_v58, 0.0  ;;  %v2001_v62 = vpop.f32.mrb[155].mxu0  ;;  %v4626_v14 = vsel %vm4542_vm4, %v4329_v63, -inf }
 0x221   :  { %v4622_v0 = vsel %vm4542_vm4, %v4327_v57, -inf  ;;  %v2566_v2 = vmax.f32 %v2001_v62, 0.0  ;;  %v6264_v3 = vpop.f32.mrb[44].mxu1 }
 0x222   :  { %v4623_v4 = vmax.f32 %v4621_v59, %v4622_v0  ;;  %v2746_v5 = vpack.c.bf16 %v2568_v61, %v2567_v60  ;;  %v3439_v6 = vpop.f32.mrb[45].mxu1  ;;  %v3448_v9 = vadd.f32 %v6264_v3, %v7270_v16 }
 0x223   :  { %v2745_v8 = vpack.c.bf16 %v2566_v2, %v2565_v1  ;;  %v3440_v10 = vadd.f32 %v7270_v16, %v3439_v6  ;;  %v6265_v11 = vpop.f32.mrb[46].mxu1 }
 0x224   :  { %v4625_v12 = vmax.f32 %v4623_v4, %v4624_v7  ;;  %v3442_v13 = vpop.f32.mrb[47].mxu1  ;;  %v3451_v17 = vadd.f32 %v6265_v11, %v7270_v16  ;;  %v4332_v22 = vmax.f32 %v3448_v9, 0.0 }
 0x225   :  { %v4330_v15 = vmax.f32 %v3440_v10, 0.0  ;;  %v3443_v18 = vadd.f32 %v7270_v16, %v3442_v13  ;;  %v6110_v19 = vpop.f32.mrb[156].mxu0  ;;  %6370 = vmatprep.mubr.msk.bf16.mxu1 %vm2840_vm3, %v2745_v8 }
 0x226   :  { %v4627_v20 = vmax.f32 %v4625_v12, %v4626_v14  ;;  %v2014_v21 = vpop.f32.mrb[157].mxu0  ;;  %6371 = vmatmul.mubr.msk.bf16.gmra.mrb[152].mxu1 %vm2840_vm3, %v2746_v5  ;;  %v2571_v27 = vmax.f32 %v6110_v19, 0.0  ;;  %v4333_v31 = vmax.f32 %v3451_v17, 0.0  ;;  %v4632_v43 = vsel %vm4542_vm4, %v4332_v22, -inf }
 0x227   :  { %v4628_v23 = vsel %vm4542_vm4, %v4330_v15, -inf  ;;  %v4331_v24 = vmax.f32 %v3443_v18, 0.0  ;;  %v6111_v25 = vpop.f32.mrb[158].mxu0  ;;  %v2569_v34 = vmax.f32 %v2014_v21, 0.0 }
 0x228   :  { %v4629_v26 = vmax.f32 %v4627_v20, %v4628_v23  ;;  %v2572_v28 = vmax.f32 %v6111_v25, 0.0  ;;  %v2017_v29 = vpop.f32.mrb[159].mxu0  ;;  %v7503_v52 = vsel %vm4542_vm4, %v4333_v31, -inf }
 0x229   :  { %v4630_v32 = vsel %vm4542_vm4, %v4331_v24, -inf  ;;  %v2570_v35 = vmax.f32 %v2017_v29, 0.0  ;;  %v6268_v36 = vpop.f32.mrb[48].mxu1 }
 0x22a   :  { %v4631_v38 = vmax.f32 %v4629_v26, %v4630_v32  ;;  %v2748_v39 = vpack.c.bf16 %v2572_v28, %v2571_v27  ;;  %v3455_v40 = vpop.f32.mrb[49].mxu1  ;;  %v3464_v45 = vadd.f32 %v6268_v36, %v7270_v16 }
 0x22b   :  { %v2747_v44 = vpack.c.bf16 %v2570_v35, %v2569_v34  ;;  %v3456_v46 = vadd.f32 %v7270_v16, %v3455_v40  ;;  %v6269_v47 = vpop.f32.mrb[50].mxu1 }
 0x22c   :  { %v7499_v48 = vmax.f32 %v4631_v38, %v4632_v43  ;;  %v3467_v49 = vadd.f32 %v6269_v47, %v7270_v16  ;;  %v3458_v50 = vpop.f32.mrb[51].mxu1  ;;  %v4336_v58 = vmax.f32 %v3464_v45, 0.0 }
 0x22d   :  { %v4334_v53 = vmax.f32 %v3456_v46, 0.0  ;;  %v3459_v54 = vadd.f32 %v7270_v16, %v3458_v50  ;;  %v6114_v55 = vpop.f32.mrb[160].mxu0  ;;  %6374 = vmatprep.mubr.msk.bf16.mxu1 %vm2840_vm3, %v2747_v44 }
 0x22e   :  { %v2030_v56 = vpop.f32.mrb[161].mxu0  ;;  %6375 = vmatmul.mubr.msk.bf16.gmra.mrb[156].mxu1 %vm2840_vm3, %v2748_v39  ;;  %v4635_v57 = vmax.f32 %v7499_v48, %v7503_v52  ;;  %v4337_v61 = vmax.f32 %v3467_v49, 0.0  ;;  %v2575_v62 = vmax.f32 %v6114_v55, 0.0  ;;  %v4639_v9 = vsel %vm4542_vm4, %v4336_v58, -inf }
 0x22f   :  { %v4335_v59 = vmax.f32 %v3459_v54, 0.0  ;;  %v6115_v60 = vpop.f32.mrb[162].mxu0  ;;  %v4636_v1 = vsel %vm4542_vm4, %v4334_v53, -inf  ;;  %v2573_v3 = vmax.f32 %v2030_v56, 0.0 }
 0x230   :  { %v2576_v63 = vmax.f32 %v6115_v60, 0.0  ;;  %v2033_v0 = vpop.f32.mrb[163].mxu0  ;;  %v4641_v17 = vsel %vm4542_vm4, %v4337_v61, -inf }
 0x231   :  { %v4637_v2 = vsel %vm4542_vm4, %v4335_v59, -inf  ;;  %v2574_v4 = vmax.f32 %v2033_v0, 0.0  ;;  %v6272_v5 = vpop.f32.mrb[52].mxu1 }
 0x232   :  { %v4638_v6 = vmax.f32 %v4636_v1, %v4637_v2  ;;  %v2750_v7 = vpack.c.bf16 %v2576_v63, %v2575_v62  ;;  %v3471_v8 = vpop.f32.mrb[53].mxu1  ;;  %v3480_v11 = vadd.f32 %v6272_v5, %v7270_v16 }
 0x233   :  { %v2749_v10 = vpack.c.bf16 %v2574_v4, %v2573_v3  ;;  %v3472_v12 = vadd.f32 %v7270_v16, %v3471_v8  ;;  %v6273_v13 = vpop.f32.mrb[54].mxu1 }
 0x234   :  { %v4640_v14 = vmax.f32 %v4638_v6, %v4639_v9  ;;  %v3474_v15 = vpop.f32.mrb[55].mxu1  ;;  %v3483_v19 = vadd.f32 %v6273_v13, %v7270_v16  ;;  %v4340_v24 = vmax.f32 %v3480_v11, 0.0 }
 0x235   :  { %v4338_v18 = vmax.f32 %v3472_v12, 0.0  ;;  %v3475_v20 = vadd.f32 %v7270_v16, %v3474_v15  ;;  %v6118_v21 = vpop.f32.mrb[164].mxu0  ;;  %6378 = vmatprep.mubr.msk.bf16.mxu1 %vm2840_vm3, %v2749_v10 }
 0x236   :  { %v4642_v22 = vmax.f32 %v4640_v14, %v4641_v17  ;;  %v2046_v23 = vpop.f32.mrb[165].mxu0  ;;  %6379 = vmatmul.mubr.msk.bf16.gmra.mrb[160].mxu1 %vm2840_vm3, %v2750_v7  ;;  %v2579_v29 = vmax.f32 %v6118_v21, 0.0  ;;  %v4341_v34 = vmax.f32 %v3483_v19, 0.0  ;;  %v4647_v45 = vsel %vm4542_vm4, %v4340_v24, -inf  ;;  %v7536_v17 = vld [vmem:[%s8140_s3] ss:$0 sm:$0xff] }
 0x237   :  { %v4643_v25 = vsel %vm4542_vm4, %v4338_v18, -inf  ;;  %v4339_v26 = vmax.f32 %v3475_v20, 0.0  ;;  %v6119_v27 = vpop.f32.mrb[166].mxu0  ;;  %v2577_v36 = vmax.f32 %v2046_v23, 0.0 }
 0x238   :  { %v4644_v28 = vmax.f32 %v4642_v22, %v4643_v25  ;;  %v2580_v31 = vmax.f32 %v6119_v27, 0.0  ;;  %v2049_v32 = vpop.f32.mrb[167].mxu0  ;;  %v4649_v55 = vsel %vm4542_vm4, %v4341_v34, -inf }
 0x239   :  { %v4645_v35 = vsel %vm4542_vm4, %v4339_v26, -inf  ;;  %v2578_v38 = vmax.f32 %v2049_v32, 0.0  ;;  %v6276_v39 = vpop.f32.mrb[56].mxu1 }
 0x23a   :  { %v4646_v40 = vmax.f32 %v4644_v28, %v4645_v35  ;;  %v2752_v43 = vpack.c.bf16 %v2580_v31, %v2579_v29  ;;  %v3487_v44 = vpop.f32.mrb[57].mxu1  ;;  %v3496_v47 = vadd.f32 %v6276_v39, %v7270_v16 }
 0x23b   :  { %v2751_v46 = vpack.c.bf16 %v2578_v38, %v2577_v36  ;;  %v3488_v49 = vadd.f32 %v7270_v16, %v3487_v44  ;;  %v6277_v50 = vpop.f32.mrb[58].mxu1 }
 0x23c   :  { %v4648_v53 = vmax.f32 %v4646_v40, %v4647_v45  ;;  %v3490_v54 = vpop.f32.mrb[59].mxu1  ;;  %v3499_v58 = vadd.f32 %v6277_v50, %v7270_v16  ;;  %v4344_v63 = vmax.f32 %v3496_v47, 0.0 }
 0x23d   :  { %v4342_v56 = vmax.f32 %v3488_v49, 0.0  ;;  %v3491_v59 = vadd.f32 %v7270_v16, %v3490_v54  ;;  %v6122_v60 = vpop.f32.mrb[168].mxu0  ;;  %6382 = vmatprep.mubr.msk.bf16.mxu1 %vm2840_vm3, %v2751_v46 }
 0x23e   :  { %v4650_v61 = vmax.f32 %v4648_v53, %v4649_v55  ;;  %v2062_v62 = vpop.f32.mrb[169].mxu0  ;;  %6383 = vmatmul.mubr.msk.bf16.gmra.mrb[164].mxu1 %vm2840_vm3, %v2752_v43  ;;  %v2583_v4 = vmax.f32 %v6122_v60, 0.0  ;;  %v4345_v7 = vmax.f32 %v3499_v58, 0.0  ;;  %v4655_v14 = vsel %vm4542_vm4, %v4344_v63, -inf  ;;  %v5136_v63 = vld [vmem:[%s8141_s4 + $0xa8] sm:$0xff] }
 0x23f   :  { %v4651_v0 = vsel %vm4542_vm4, %v4342_v56, -inf  ;;  %v4343_v1 = vmax.f32 %v3491_v59, 0.0  ;;  %v6123_v2 = vpop.f32.mrb[170].mxu0  ;;  %v2581_v16 = vmax.f32 %v2062_v62, 0.0  ;;  %v5135_v62 = vld [vmem:[%s8141_s4 + $0xa0] sm:$0xff] }
 0x240   :  { %v4652_v3 = vmax.f32 %v4650_v61, %v4651_v0  ;;  %v2584_v5 = vmax.f32 %v6123_v2, 0.0  ;;  %v2065_v6 = vpop.f32.mrb[171].mxu0  ;;  %v4657_v23 = vsel %vm4542_vm4, %v4345_v7, -inf  ;;  %v5119_v7 = vld [vmem:[%s8141_s4 + $0x20] sm:$0xff] }
 0x241   :  { %v4653_v8 = vsel %vm4542_vm4, %v4343_v1, -inf  ;;  %v2582_v9 = vmax.f32 %v2065_v6, 0.0  ;;  %v6280_v10 = vpop.f32.mrb[60].mxu1 }
 0x242   :  { %v4654_v11 = vmax.f32 %v4652_v3, %v4653_v8  ;;  %v2754_v12 = vpack.c.bf16 %v2584_v5, %v2583_v4  ;;  %v3503_v13 = vpop.f32.mrb[61].mxu1  ;;  %v3512_v18 = vadd.f32 %v7536_v17, %v6280_v10  ;;  %v6482_v5 = vpack.c.bf16 %v5136_v63, %v5135_v62  ;;  %v5120_v8 = vld [vmem:[%s8141_s4 + $0x28] sm:$0xff] }
 0x243   :  { %v2753_v15 = vpack.c.bf16 %v2582_v9, %v2581_v16  ;;  %v3504_v19 = vadd.f32 %v7536_v17, %v3503_v13  ;;  %v6281_v20 = vpop.f32.mrb[62].mxu1 }
 0x244   :  { %v4656_v21 = vmax.f32 %v4654_v11, %v4655_v14  ;;  %v3506_v22 = vpop.f32.mrb[63].mxu1  ;;  %v3515_v25 = vadd.f32 %v7536_v17, %v6281_v20  ;;  %v4348_v31 = vmax.f32 %v3512_v18, 0.0  ;;  %6483 = vmatprep.subr.bf16.mxu1 %v6482_v5 }
 0x245   :  { %v4346_v24 = vmax.f32 %v3504_v19, 0.0  ;;  %v3507_v26 = vadd.f32 %v7536_v17, %v3506_v22  ;;  %v6126_v27 = vpop.f32.mrb[172].mxu0  ;;  %6386 = vmatprep.mubr.msk.bf16.mxu1 %vm2840_vm3, %v2753_v15 }
 0x246   :  { %v4658_v28 = vmax.f32 %v4656_v21, %v4657_v23  ;;  %v2078_v29 = vpop.f32.mrb[173].mxu0  ;;  %6387 = vmatmul.mubr.msk.bf16.gmra.mrb[168].mxu1 %vm2840_vm3, %v2754_v12  ;;  %v2587_v38 = vmax.f32 %v6126_v27, 0.0  ;;  %v4349_v43 = vmax.f32 %v3515_v25, 0.0  ;;  %v4663_v54 = vsel %vm4542_vm4, %v4348_v31, -inf }
 0x247   :  { %v4659_v32 = vsel %vm4542_vm4, %v4346_v24, -inf  ;;  %v4347_v34 = vmax.f32 %v3507_v26, 0.0  ;;  %v6127_v35 = vpop.f32.mrb[174].mxu0  ;;  %v2585_v45 = vmax.f32 %v2078_v29, 0.0  ;;  %v6484_v12 = vpack.c.bf16 %v5120_v8, %v5119_v7 }
 0x248   :  { %v4660_v36 = vmax.f32 %v4658_v28, %v4659_v32  ;;  %v2588_v39 = vmax.f32 %v6127_v35, 0.0  ;;  %v2081_v40 = vpop.f32.mrb[175].mxu0  ;;  %v7560_v1 = vsel %vm4542_vm4, %v4349_v43, -inf }
 0x249   :  { %v4661_v44 = vsel %vm4542_vm4, %v4347_v34, -inf  ;;  %v2586_v46 = vmax.f32 %v2081_v40, 0.0  ;;  %v6284_v47 = vpop.f32.mrb[64].mxu1  ;;  %6485 = vmatpush3.bf16.msra.mxu1 %v6484_v12 }
 0x24a   :  { %v4662_v49 = vmax.f32 %v4660_v36, %v4661_v44  ;;  %v2756_v50 = vpack.c.bf16 %v2588_v39, %v2587_v38  ;;  %v3519_v53 = vpop.f32.mrb[65].mxu1  ;;  %v3528_v56 = vadd.f32 %v7536_v17, %v6284_v47 }
 0x24b   :  { %v2755_v55 = vpack.c.bf16 %v2586_v46, %v2585_v45  ;;  %v3520_v58 = vadd.f32 %v7536_v17, %v3519_v53  ;;  %v6285_v59 = vpop.f32.mrb[66].mxu1 }
 0x24c   :  { %v3531_v60 = vadd.f32 %v7536_v17, %v6285_v59  ;;  %v3522_v61 = vpop.f32.mrb[67].mxu1  ;;  %v7557_v0 = vmax.f32 %v4662_v49, %v4663_v54  ;;  %v4352_v9 = vmax.f32 %v3528_v56, 0.0 }
 0x24d   :  { %v4350_v2 = vmax.f32 %v3520_v58, 0.0  ;;  %v3523_v3 = vadd.f32 %v7536_v17, %v3522_v61  ;;  %v6130_v4 = vpop.f32.mrb[176].mxu0  ;;  %6390 = vmatprep.mubr.msk.bf16.mxu1 %vm2840_vm3, %v2755_v55 }
 0x24e   :  { %v2094_v6 = vpop.f32.mrb[177].mxu0  ;;  %6391 = vmatmul.mubr.msk.bf16.gmra.mrb[172].mxu1 %vm2840_vm3, %v2756_v50  ;;  %v4666_v16 = vmax.f32 %v7557_v0, %v7560_v1  ;;  %v4353_v13 = vmax.f32 %v3531_v60, 0.0  ;;  %v2591_v14 = vmax.f32 %v6130_v4, 0.0  ;;  %v4670_v27 = vsel %vm4542_vm4, %v4352_v9, -inf }
 0x24f   :  { %v4351_v10 = vmax.f32 %v3523_v3, 0.0  ;;  %v6131_v11 = vpop.f32.mrb[178].mxu0  ;;  %v4667_v19 = vsel %vm4542_vm4, %v4350_v2, -inf  ;;  %v2589_v21 = vmax.f32 %v2094_v6, 0.0 }
 0x250   :  { %v2592_v15 = vmax.f32 %v6131_v11, 0.0  ;;  %v2097_v18 = vpop.f32.mrb[179].mxu0  ;;  %v4672_v36 = vsel %vm4542_vm4, %v4353_v13, -inf }
 0x251   :  { %v4668_v20 = vsel %vm4542_vm4, %v4351_v10, -inf  ;;  %v2590_v22 = vmax.f32 %v2097_v18, 0.0  ;;  %v6288_v23 = vpop.f32.mrb[68].mxu1 }
 0x252   :  { %v4669_v24 = vmax.f32 %v4667_v19, %v4668_v20  ;;  %v2758_v25 = vpack.c.bf16 %v2592_v15, %v2591_v14  ;;  %v3535_v26 = vpop.f32.mrb[69].mxu1  ;;  %v3544_v29 = vadd.f32 %v7536_v17, %v6288_v23 }
 0x253   :  { %v2757_v28 = vpack.c.bf16 %v2590_v22, %v2589_v21  ;;  %v3536_v31 = vadd.f32 %v7536_v17, %v3535_v26  ;;  %v6289_v32 = vpop.f32.mrb[70].mxu1 }
 0x254   :  { %v4671_v34 = vmax.f32 %v4669_v24, %v4670_v27  ;;  %v3538_v35 = vpop.f32.mrb[71].mxu1  ;;  %v3547_v39 = vadd.f32 %v7536_v17, %v6289_v32  ;;  %v4356_v46 = vmax.f32 %v3544_v29, 0.0 }
 0x255   :  { %v4354_v38 = vmax.f32 %v3536_v31, 0.0  ;;  %v3539_v40 = vadd.f32 %v7536_v17, %v3538_v35  ;;  %v6134_v43 = vpop.f32.mrb[180].mxu0  ;;  %6394 = vmatprep.mubr.msk.bf16.mxu1 %vm2840_vm3, %v2757_v28 }
 0x256   :  { %v4673_v44 = vmax.f32 %v4671_v34, %v4672_v36  ;;  %v2110_v45 = vpop.f32.mrb[181].mxu0  ;;  %6395 = vmatmul.mubr.msk.bf16.gmra.mrb[176].mxu1 %vm2840_vm3, %v2758_v25  ;;  %v2595_v54 = vmax.f32 %v6134_v43, 0.0  ;;  %v4357_v58 = vmax.f32 %v3547_v39, 0.0  ;;  %v4678_v4 = vsel %vm4542_vm4, %v4356_v46, -inf }
 0x257   :  { %v4674_v47 = vsel %vm4542_vm4, %v4354_v38, -inf  ;;  %v4355_v49 = vmax.f32 %v3539_v40, 0.0  ;;  %v6135_v50 = vpop.f32.mrb[182].mxu0  ;;  %v2593_v60 = vmax.f32 %v2110_v45, 0.0 }
 0x258   :  { %v4675_v53 = vmax.f32 %v4673_v44, %v4674_v47  ;;  %v2596_v55 = vmax.f32 %v6135_v50, 0.0  ;;  %v2113_v56 = vpop.f32.mrb[183].mxu0  ;;  %v4680_v11 = vsel %vm4542_vm4, %v4357_v58, -inf }
 0x259   :  { %v4676_v59 = vsel %vm4542_vm4, %v4355_v49, -inf  ;;  %v2594_v61 = vmax.f32 %v2113_v56, 0.0  ;;  %v6292_v62 = vpop.f32.mrb[72].mxu1 }
 0x25a   :  { %v4677_v63 = vmax.f32 %v4675_v53, %v4676_v59  ;;  %v2760_v2 = vpack.c.bf16 %v2596_v55, %v2595_v54  ;;  %v3551_v3 = vpop.f32.mrb[73].mxu1  ;;  %v3560_v6 = vadd.f32 %v7536_v17, %v6292_v62 }
 0x25b   :  { %v2759_v5 = vpack.c.bf16 %v2594_v61, %v2593_v60  ;;  %v3552_v7 = vadd.f32 %v7536_v17, %v3551_v3  ;;  %v6293_v8 = vpop.f32.mrb[74].mxu1 }
 0x25c   :  { %v4679_v9 = vmax.f32 %v4677_v63, %v4678_v4  ;;  %v3554_v10 = vpop.f32.mrb[75].mxu1  ;;  %v3563_v13 = vadd.f32 %v7536_v17, %v6293_v8  ;;  %v4360_v20 = vmax.f32 %v3560_v6, 0.0 }
 0x25d   :  { %v4358_v12 = vmax.f32 %v3552_v7, 0.0  ;;  %v3555_v14 = vadd.f32 %v7536_v17, %v3554_v10  ;;  %v6138_v15 = vpop.f32.mrb[184].mxu0  ;;  %6398 = vmatprep.mubr.msk.bf16.mxu1 %vm2840_vm3, %v2759_v5 }
 0x25e   :  { %v4681_v18 = vmax.f32 %v4679_v9, %v4680_v11  ;;  %v2126_v19 = vpop.f32.mrb[185].mxu0  ;;  %6399 = vmatmul.mubr.msk.bf16.gmra.mrb[180].mxu1 %vm2840_vm3, %v2760_v2  ;;  %v2599_v25 = vmax.f32 %v6138_v15, 0.0  ;;  %v4361_v28 = vmax.f32 %v3563_v13, 0.0  ;;  %v4686_v39 = vsel %vm4542_vm4, %v4360_v20, -inf }
 0x25f   :  { %v4682_v21 = vsel %vm4542_vm4, %v4358_v12, -inf  ;;  %v4359_v22 = vmax.f32 %v3555_v14, 0.0  ;;  %v6139_v23 = vpop.f32.mrb[186].mxu0  ;;  %v2597_v31 = vmax.f32 %v2126_v19, 0.0 }
 0x260   :  { %v4683_v24 = vmax.f32 %v4681_v18, %v4682_v21  ;;  %v2600_v26 = vmax.f32 %v6139_v23, 0.0  ;;  %v2129_v27 = vpop.f32.mrb[187].mxu0  ;;  %v4688_v49 = vsel %vm4542_vm4, %v4361_v28, -inf }
 0x261   :  { %v4684_v29 = vsel %vm4542_vm4, %v4359_v22, -inf  ;;  %v2598_v32 = vmax.f32 %v2129_v27, 0.0  ;;  %v6296_v34 = vpop.f32.mrb[76].mxu1 }
 0x262   :  { %v4685_v35 = vmax.f32 %v4683_v24, %v4684_v29  ;;  %v2762_v36 = vpack.c.bf16 %v2600_v26, %v2599_v25  ;;  %v3567_v38 = vpop.f32.mrb[77].mxu1  ;;  %v3576_v43 = vadd.f32 %v7536_v17, %v6296_v34 }
 0x263   :  { %v2761_v40 = vpack.c.bf16 %v2598_v32, %v2597_v31  ;;  %v3568_v44 = vadd.f32 %v7536_v17, %v3567_v38  ;;  %v6297_v45 = vpop.f32.mrb[78].mxu1 }
 0x264   :  { %v4687_v46 = vmax.f32 %v4685_v35, %v4686_v39  ;;  %v3570_v47 = vpop.f32.mrb[79].mxu1  ;;  %v3579_v53 = vadd.f32 %v7536_v17, %v6297_v45  ;;  %v4364_v59 = vmax.f32 %v3576_v43, 0.0 }
 0x265   :  { %v4362_v50 = vmax.f32 %v3568_v44, 0.0  ;;  %v3571_v54 = vadd.f32 %v7536_v17, %v3570_v47  ;;  %v6142_v55 = vpop.f32.mrb[188].mxu0  ;;  %6402 = vmatprep.mubr.msk.bf16.mxu1 %vm2840_vm3, %v2761_v40 }
 0x266   :  { %v4689_v56 = vmax.f32 %v4687_v46, %v4688_v49  ;;  %v2142_v58 = vpop.f32.mrb[189].mxu0  ;;  %6403 = vmatmul.mubr.msk.bf16.gmra.mrb[184].mxu1 %vm2840_vm3, %v2762_v36  ;;  %v2603_v2 = vmax.f32 %v6142_v55, 0.0  ;;  %v4365_v5 = vmax.f32 %v3579_v53, 0.0  ;;  %v4694_v13 = vsel %vm4542_vm4, %v4364_v59, -inf }
 0x267   :  { %v4690_v60 = vsel %vm4542_vm4, %v4362_v50, -inf  ;;  %v4363_v61 = vmax.f32 %v3571_v54, 0.0  ;;  %v6143_v62 = vpop.f32.mrb[190].mxu0  ;;  %v2601_v7 = vmax.f32 %v2142_v58, 0.0 }
 0x268   :  { %v4691_v63 = vmax.f32 %v4689_v56, %v4690_v60  ;;  %v2604_v3 = vmax.f32 %v6143_v62, 0.0  ;;  %v2145_v4 = vpop.f32.mrb[191].mxu0  ;;  %v7612_v23 = vsel %vm4542_vm4, %v4365_v5, -inf }
 0x269   :  { %v4692_v6 = vsel %vm4542_vm4, %v4363_v61, -inf  ;;  %v2602_v8 = vmax.f32 %v2145_v4, 0.0  ;;  %v6300_v9 = vpop.f32.mrb[80].mxu1 }
 0x26a   :  { %v4693_v10 = vmax.f32 %v4691_v63, %v4692_v6  ;;  %v2764_v11 = vpack.c.bf16 %v2604_v3, %v2603_v2  ;;  %v3583_v12 = vpop.f32.mrb[81].mxu1  ;;  %v3592_v15 = vadd.f32 %v7536_v17, %v6300_v9 }
 0x26b   :  { %v2763_v14 = vpack.c.bf16 %v2602_v8, %v2601_v7  ;;  %v3584_v18 = vadd.f32 %v7536_v17, %v3583_v12  ;;  %v6301_v19 = vpop.f32.mrb[82].mxu1 }
 0x26c   :  { %v7608_v20 = vmax.f32 %v4693_v10, %v4694_v13  ;;  %v3595_v21 = vadd.f32 %v7536_v17, %v6301_v19  ;;  %v3586_v22 = vpop.f32.mrb[83].mxu1  ;;  %v4368_v29 = vmax.f32 %v3592_v15, 0.0 }
 0x26d   :  { %v4366_v24 = vmax.f32 %v3584_v18, 0.0  ;;  %v3587_v25 = vadd.f32 %v7536_v17, %v3586_v22  ;;  %v6146_v26 = vpop.f32.mrb[192].mxu0  ;;  %6406 = vmatprep.mubr.msk.bf16.mxu1 %vm2840_vm3, %v2763_v14 }
 0x26e   :  { %v2158_v27 = vpop.f32.mrb[193].mxu0  ;;  %6407 = vmatmul.mubr.msk.bf16.gmra.mrb[188].mxu1 %vm2840_vm3, %v2764_v11  ;;  %v4697_v28 = vmax.f32 %v7608_v20, %v7612_v23  ;;  %v4369_v34 = vmax.f32 %v3595_v21, 0.0  ;;  %v2607_v35 = vmax.f32 %v6146_v26, 0.0  ;;  %v4701_v50 = vsel %vm4542_vm4, %v4368_v29, -inf }
 0x26f   :  { %v4367_v31 = vmax.f32 %v3587_v25, 0.0  ;;  %v6147_v32 = vpop.f32.mrb[194].mxu0  ;;  %v4698_v39 = vsel %vm4542_vm4, %v4366_v24, -inf  ;;  %v2605_v43 = vmax.f32 %v2158_v27, 0.0 }
 0x270   :  { %v2608_v36 = vmax.f32 %v6147_v32, 0.0  ;;  %v2161_v38 = vpop.f32.mrb[195].mxu0  ;;  %v4703_v60 = vsel %vm4542_vm4, %v4369_v34, -inf }
 0x271   :  { %v4699_v40 = vsel %vm4542_vm4, %v4367_v31, -inf  ;;  %v2606_v44 = vmax.f32 %v2161_v38, 0.0  ;;  %v6304_v45 = vpop.f32.mrb[84].mxu1 }
 0x272   :  { %v4700_v46 = vmax.f32 %v4698_v39, %v4699_v40  ;;  %v2766_v47 = vpack.c.bf16 %v2608_v36, %v2607_v35  ;;  %v3599_v49 = vpop.f32.mrb[85].mxu1  ;;  %v3608_v54 = vadd.f32 %v7536_v17, %v6304_v45 }
 0x273   :  { %v2765_v53 = vpack.c.bf16 %v2606_v44, %v2605_v43  ;;  %v3600_v55 = vadd.f32 %v7536_v17, %v3599_v49  ;;  %v6305_v56 = vpop.f32.mrb[86].mxu1 }
 0x274   :  { %v4702_v58 = vmax.f32 %v4700_v46, %v4701_v50  ;;  %v3602_v59 = vpop.f32.mrb[87].mxu1  ;;  %v3611_v62 = vadd.f32 %v7536_v17, %v6305_v56  ;;  %v4372_v5 = vmax.f32 %v3608_v54, 0.0 }
 0x275   :  { %v4370_v61 = vmax.f32 %v3600_v55, 0.0  ;;  %v3603_v63 = vadd.f32 %v7536_v17, %v3602_v59  ;;  %v6150_v2 = vpop.f32.mrb[196].mxu0  ;;  %6410 = vmatprep.mubr.msk.bf16.mxu1 %vm2840_vm3, %v2765_v53 }
 0x276   :  { %v4704_v3 = vmax.f32 %v4702_v58, %v4703_v60  ;;  %v2174_v4 = vpop.f32.mrb[197].mxu0  ;;  %6411 = vmatmul.mubr.msk.bf16.gmra.mrb[192].mxu1 %vm2840_vm3, %v2766_v47  ;;  %v2611_v10 = vmax.f32 %v6150_v2, 0.0  ;;  %v4373_v13 = vmax.f32 %v3611_v62, 0.0  ;;  %v4709_v25 = vsel %vm4542_vm4, %v4372_v5, -inf }
 0x277   :  { %v4705_v6 = vsel %vm4542_vm4, %v4370_v61, -inf  ;;  %v4371_v7 = vmax.f32 %v3603_v63, 0.0  ;;  %v6151_v8 = vpop.f32.mrb[198].mxu0  ;;  %v2609_v15 = vmax.f32 %v2174_v4, 0.0 }
 0x278   :  { %v4706_v9 = vmax.f32 %v4704_v3, %v4705_v6  ;;  %v2612_v11 = vmax.f32 %v6151_v8, 0.0  ;;  %v2177_v12 = vpop.f32.mrb[199].mxu0  ;;  %v4711_v35 = vsel %vm4542_vm4, %v4373_v13, -inf }
 0x279   :  { %v4707_v14 = vsel %vm4542_vm4, %v4371_v7, -inf  ;;  %v2610_v18 = vmax.f32 %v2177_v12, 0.0  ;;  %v6308_v19 = vpop.f32.mrb[88].mxu1 }
 0x27a   :  { %v4708_v21 = vmax.f32 %v4706_v9, %v4707_v14  ;;  %v2768_v22 = vpack.c.bf16 %v2612_v11, %v2611_v10  ;;  %v3615_v24 = vpop.f32.mrb[89].mxu1  ;;  %v3624_v27 = vadd.f32 %v7536_v17, %v6308_v19 }
 0x27b   :  { %v2767_v26 = vpack.c.bf16 %v2610_v18, %v2609_v15  ;;  %v3616_v29 = vadd.f32 %v7536_v17, %v3615_v24  ;;  %v6309_v31 = vpop.f32.mrb[90].mxu1 }
 0x27c   :  { %v4710_v32 = vmax.f32 %v4708_v21, %v4709_v25  ;;  %v3618_v34 = vpop.f32.mrb[91].mxu1  ;;  %v3627_v38 = vadd.f32 %v7536_v17, %v6309_v31  ;;  %v4376_v45 = vmax.f32 %v3624_v27, 0.0 }
 0x27d   :  { %v4374_v36 = vmax.f32 %v3616_v29, 0.0  ;;  %v3619_v39 = vadd.f32 %v7536_v17, %v3618_v34  ;;  %v6154_v40 = vpop.f32.mrb[200].mxu0  ;;  %6414 = vmatprep.mubr.msk.bf16.mxu1 %vm2840_vm3, %v2767_v26 }
 0x27e   :  { %v4712_v43 = vmax.f32 %v4710_v32, %v4711_v35  ;;  %v2190_v44 = vpop.f32.mrb[201].mxu0  ;;  %6415 = vmatmul.mubr.msk.bf16.gmra.mrb[196].mxu1 %vm2840_vm3, %v2768_v22  ;;  %v2615_v53 = vmax.f32 %v6154_v40, 0.0  ;;  %v4377_v56 = vmax.f32 %v3627_v38, 0.0  ;;  %v4717_v4 = vsel %vm4542_vm4, %v4376_v45, -inf  ;;  %v5138_v45 = vld [vmem:[%s8141_s4 + $0xb8] sm:$0xff] }
 0x27f   :  { %v4713_v46 = vsel %vm4542_vm4, %v4374_v36, -inf  ;;  %v4375_v47 = vmax.f32 %v3619_v39, 0.0  ;;  %v6155_v49 = vpop.f32.mrb[202].mxu0  ;;  %v2613_v59 = vmax.f32 %v2190_v44, 0.0  ;;  %v5137_v44 = vld [vmem:[%s8141_s4 + $0xb0] sm:$0xff] }
 0x280   :  { %v4714_v50 = vmax.f32 %v4712_v43, %v4713_v46  ;;  %v2616_v54 = vmax.f32 %v6155_v49, 0.0  ;;  %v2193_v55 = vpop.f32.mrb[203].mxu0  ;;  %v4719_v10 = vsel %vm4542_vm4, %v4377_v56, -inf }
 0x281   :  { %v4715_v58 = vsel %vm4542_vm4, %v4375_v47, -inf  ;;  %v2614_v60 = vmax.f32 %v2193_v55, 0.0  ;;  %v6312_v61 = vpop.f32.mrb[92].mxu1 }
 0x282   :  { %v4716_v62 = vmax.f32 %v4714_v50, %v4715_v58  ;;  %v2770_v63 = vpack.c.bf16 %v2616_v54, %v2615_v53  ;;  %v3640_v2 = vadd.f32 %v7536_v17, %v6312_v61  ;;  %v3631_v3 = vpop.f32.mrb[93].mxu1  ;;  %v6486_v53 = vpack.c.bf16 %v5138_v45, %v5137_v44 }
 0x283   :  { %v2769_v5 = vpack.c.bf16 %v2614_v60, %v2613_v59  ;;  %v3632_v6 = vadd.f32 %v7536_v17, %v3631_v3  ;;  %v6313_v7 = vpop.f32.mrb[94].mxu1 }
 0x284   :  { %v4718_v8 = vmax.f32 %v4716_v62, %v4717_v4  ;;  %v3634_v9 = vpop.f32.mrb[95].mxu1  ;;  %v3643_v12 = vadd.f32 %v7536_v17, %v6313_v7  ;;  %v4380_v15 = vmax.f32 %v3640_v2, 0.0  ;;  %6487 = vmatprep.subr.bf16.mxu1 %v6486_v53  ;;  %v5122_v2 = vld [vmem:[%s8141_s4 + $0x38] sm:$0xff] }
 0x285   :  { %v4378_v11 = vmax.f32 %v3632_v6, 0.0  ;;  %v3635_v13 = vadd.f32 %v7536_v17, %v3634_v9  ;;  %v6158_v14 = vpop.f32.mrb[204].mxu0  ;;  %6418 = vmatprep.mubr.msk.bf16.mxu1 %vm2840_vm3, %v2769_v5 }
 0x286   :  { %v4720_v18 = vmax.f32 %v4718_v8, %v4719_v10  ;;  %v2206_v19 = vpop.f32.mrb[205].mxu0  ;;  %6419 = vmatmul.mubr.msk.bf16.gmra.mrb[200].mxu1 %vm2840_vm3, %v2770_v63  ;;  %v2619_v26 = vmax.f32 %v6158_v14, 0.0  ;;  %v4381_v31 = vmax.f32 %v3643_v12, 0.0  ;;  %v4725_v38 = vsel %vm4542_vm4, %v4380_v15, -inf  ;;  %v5121_v63 = vld [vmem:[%s8141_s4 + $0x30] sm:$0xff] }
 0x287   :  { %v4721_v21 = vsel %vm4542_vm4, %v4378_v11, -inf  ;;  %v4379_v22 = vmax.f32 %v3635_v13, 0.0  ;;  %v6159_v24 = vpop.f32.mrb[206].mxu0  ;;  %v2617_v34 = vmax.f32 %v2206_v19, 0.0  ;;  %v6488_v7 = vpack.c.bf16 %v5122_v2, %v5121_v63 }
 0x288   :  { %v4722_v25 = vmax.f32 %v4720_v18, %v4721_v21  ;;  %v2620_v27 = vmax.f32 %v6159_v24, 0.0  ;;  %v2209_v29 = vpop.f32.mrb[207].mxu0  ;;  %v7664_v58 = vsel %vm4542_vm4, %v4381_v31, -inf }
 0x289   :  { %v4723_v32 = vsel %vm4542_vm4, %v4379_v22, -inf  ;;  %v2618_v35 = vmax.f32 %v2209_v29, 0.0  ;;  %v6316_v36 = vpop.f32.mrb[96].mxu1  ;;  %6489 = vmatpush3.bf16.msra.mxu1 %v6488_v7 }
 0x28a   :  { %v4724_v39 = vmax.f32 %v4722_v25, %v4723_v32  ;;  %v2772_v40 = vpack.c.bf16 %v2620_v27, %v2619_v26  ;;  %v3647_v43 = vpop.f32.mrb[97].mxu1  ;;  %v3656_v47 = vadd.f32 %v7536_v17, %v6316_v36 }
 0x28b   :  { %v2771_v46 = vpack.c.bf16 %v2618_v35, %v2617_v34  ;;  %v3648_v49 = vadd.f32 %v7536_v17, %v3647_v43  ;;  %v6317_v50 = vpop.f32.mrb[98].mxu1 }
 0x28c   :  { %v7660_v54 = vmax.f32 %v4724_v39, %v4725_v38  ;;  %v3659_v55 = vadd.f32 %v7536_v17, %v6317_v50  ;;  %v3650_v56 = vpop.f32.mrb[99].mxu1  ;;  %v4384_v4 = vmax.f32 %v3656_v47, 0.0 }
 0x28d   :  { %v4382_v59 = vmax.f32 %v3648_v49, 0.0  ;;  %v3651_v60 = vadd.f32 %v7536_v17, %v3650_v56  ;;  %v6162_v61 = vpop.f32.mrb[208].mxu0  ;;  %6422 = vmatprep.mubr.msk.bf16.mxu1 %vm2840_vm3, %v2771_v46 }
 0x28e   :  { %v2222_v62 = vpop.f32.mrb[209].mxu0  ;;  %6423 = vmatmul.mubr.msk.bf16.gmra.mrb[204].mxu1 %vm2840_vm3, %v2772_v40  ;;  %v4728_v3 = vmax.f32 %v7660_v54, %v7664_v58  ;;  %v4385_v8 = vmax.f32 %v3659_v55, 0.0  ;;  %v2623_v9 = vmax.f32 %v6162_v61, 0.0  ;;  %v4732_v24 = vsel %vm4542_vm4, %v4384_v4, -inf }
 0x28f   :  { %v4383_v5 = vmax.f32 %v3651_v60, 0.0  ;;  %v6163_v6 = vpop.f32.mrb[210].mxu0  ;;  %v4729_v12 = vsel %vm4542_vm4, %v4382_v59, -inf  ;;  %v2621_v14 = vmax.f32 %v2222_v62, 0.0 }
 0x290   :  { %v2624_v10 = vmax.f32 %v6163_v6, 0.0  ;;  %v2225_v11 = vpop.f32.mrb[211].mxu0  ;;  %v4734_v34 = vsel %vm4542_vm4, %v4385_v8, -inf }
 0x291   :  { %v4730_v13 = vsel %vm4542_vm4, %v4383_v5, -inf  ;;  %v2622_v15 = vmax.f32 %v2225_v11, 0.0  ;;  %v6320_v18 = vpop.f32.mrb[100].mxu1 }
 0x292   :  { %v4731_v19 = vmax.f32 %v4729_v12, %v4730_v13  ;;  %v2774_v21 = vpack.c.bf16 %v2624_v10, %v2623_v9  ;;  %v3663_v22 = vpop.f32.mrb[101].mxu1  ;;  %v3672_v26 = vadd.f32 %v7536_v17, %v6320_v18 }
 0x293   :  { %v2773_v25 = vpack.c.bf16 %v2622_v15, %v2621_v14  ;;  %v3664_v27 = vadd.f32 %v7536_v17, %v3663_v22  ;;  %v6321_v29 = vpop.f32.mrb[102].mxu1 }
 0x294   :  { %v4733_v31 = vmax.f32 %v4731_v19, %v4732_v24  ;;  %v3666_v32 = vpop.f32.mrb[103].mxu1  ;;  %v3675_v36 = vadd.f32 %v7536_v17, %v6321_v29  ;;  %v4388_v44 = vmax.f32 %v3672_v26, 0.0 }
 0x295   :  { %v4386_v35 = vmax.f32 %v3664_v27, 0.0  ;;  %v3667_v38 = vadd.f32 %v7536_v17, %v3666_v32  ;;  %v6166_v39 = vpop.f32.mrb[212].mxu0  ;;  %6426 = vmatprep.mubr.msk.bf16.mxu1 %vm2840_vm3, %v2773_v25 }
 0x296   :  { %v4735_v40 = vmax.f32 %v4733_v31, %v4734_v34  ;;  %v2238_v43 = vpop.f32.mrb[213].mxu0  ;;  %6427 = vmatmul.mubr.msk.bf16.gmra.mrb[208].mxu1 %vm2840_vm3, %v2774_v21  ;;  %v2627_v50 = vmax.f32 %v6166_v39, 0.0  ;;  %v4389_v56 = vmax.f32 %v3675_v36, 0.0  ;;  %v4740_v5 = vsel %vm4542_vm4, %v4388_v44, -inf }
 0x297   :  { %v4736_v45 = vsel %vm4542_vm4, %v4386_v35, -inf  ;;  %v4387_v46 = vmax.f32 %v3667_v38, 0.0  ;;  %v6167_v47 = vpop.f32.mrb[214].mxu0  ;;  %v2625_v60 = vmax.f32 %v2238_v43, 0.0 }
 0x298   :  { %v4737_v49 = vmax.f32 %v4735_v40, %v4736_v45  ;;  %v2628_v53 = vmax.f32 %v6167_v47, 0.0  ;;  %v2241_v55 = vpop.f32.mrb[215].mxu0  ;;  %v4742_v12 = vsel %vm4542_vm4, %v4389_v56, -inf }
 0x299   :  { %v4738_v59 = vsel %vm4542_vm4, %v4387_v46, -inf  ;;  %v2626_v61 = vmax.f32 %v2241_v55, 0.0  ;;  %v6324_v62 = vpop.f32.mrb[104].mxu1 }
 0x29a   :  { %v4739_v63 = vmax.f32 %v4737_v49, %v4738_v59  ;;  %v2776_v2 = vpack.c.bf16 %v2628_v53, %v2627_v50  ;;  %v3679_v4 = vpop.f32.mrb[105].mxu1  ;;  %v3688_v7 = vadd.f32 %v7536_v17, %v6324_v62 }
 0x29b   :  { %v2775_v6 = vpack.c.bf16 %v2626_v61, %v2625_v60  ;;  %v3680_v8 = vadd.f32 %v7536_v17, %v3679_v4  ;;  %v6325_v9 = vpop.f32.mrb[106].mxu1 }
 0x29c   :  { %v4741_v10 = vmax.f32 %v4739_v63, %v4740_v5  ;;  %v3682_v11 = vpop.f32.mrb[107].mxu1  ;;  %v3691_v14 = vadd.f32 %v7536_v17, %v6325_v9  ;;  %v4392_v22 = vmax.f32 %v3688_v7, 0.0 }
 0x29d   :  { %v4390_v13 = vmax.f32 %v3680_v8, 0.0  ;;  %v3683_v15 = vadd.f32 %v7536_v17, %v3682_v11  ;;  %v6170_v18 = vpop.f32.mrb[216].mxu0  ;;  %6430 = vmatprep.mubr.msk.bf16.mxu1 %vm2840_vm3, %v2775_v6 }
 0x29e   :  { %v4743_v19 = vmax.f32 %v4741_v10, %v4742_v12  ;;  %v2254_v21 = vpop.f32.mrb[217].mxu0  ;;  %6431 = vmatmul.mubr.msk.bf16.gmra.mrb[212].mxu1 %vm2840_vm3, %v2776_v2  ;;  %v2631_v29 = vmax.f32 %v6170_v18, 0.0  ;;  %v4393_v34 = vmax.f32 %v3691_v14, 0.0  ;;  %v4748_v45 = vsel %vm4542_vm4, %v4392_v22, -inf }
 0x29f   :  { %v4744_v24 = vsel %vm4542_vm4, %v4390_v13, -inf  ;;  %v4391_v25 = vmax.f32 %v3683_v15, 0.0  ;;  %v6171_v26 = vpop.f32.mrb[218].mxu0  ;;  %v2629_v36 = vmax.f32 %v2254_v21, 0.0 }
 0x2a0   :  { %v4745_v27 = vmax.f32 %v4743_v19, %v4744_v24  ;;  %v2632_v31 = vmax.f32 %v6171_v26, 0.0  ;;  %v2257_v32 = vpop.f32.mrb[219].mxu0  ;;  %v4750_v56 = vsel %vm4542_vm4, %v4393_v34, -inf }
 0x2a1   :  { %v4746_v35 = vsel %vm4542_vm4, %v4391_v25, -inf  ;;  %v2630_v38 = vmax.f32 %v2257_v32, 0.0  ;;  %v6328_v39 = vpop.f32.mrb[108].mxu1 }
 0x2a2   :  { %v4747_v40 = vmax.f32 %v4745_v27, %v4746_v35  ;;  %v2778_v43 = vpack.c.bf16 %v2632_v31, %v2631_v29  ;;  %v3695_v44 = vpop.f32.mrb[109].mxu1  ;;  %v3704_v47 = vadd.f32 %v7536_v17, %v6328_v39 }
 0x2a3   :  { %v2777_v46 = vpack.c.bf16 %v2630_v38, %v2629_v36  ;;  %v3696_v49 = vadd.f32 %v7536_v17, %v3695_v44  ;;  %v6329_v50 = vpop.f32.mrb[110].mxu1 }
 0x2a4   :  { %v4749_v53 = vmax.f32 %v4747_v40, %v4748_v45  ;;  %v3698_v55 = vpop.f32.mrb[111].mxu1  ;;  %v3707_v60 = vadd.f32 %v7536_v17, %v6329_v50  ;;  %v4396_v4 = vmax.f32 %v3704_v47, 0.0 }
 0x2a5   :  { %v4394_v59 = vmax.f32 %v3696_v49, 0.0  ;;  %v3699_v61 = vadd.f32 %v7536_v17, %v3698_v55  ;;  %v6174_v62 = vpop.f32.mrb[220].mxu0  ;;  %6434 = vmatprep.mubr.msk.bf16.mxu1 %vm2840_vm3, %v2777_v46 }
 0x2a6   :  { %v4751_v63 = vmax.f32 %v4749_v53, %v4750_v56  ;;  %v2270_v2 = vpop.f32.mrb[221].mxu0  ;;  %6435 = vmatmul.mubr.msk.bf16.gmra.mrb[216].mxu1 %vm2840_vm3, %v2778_v43  ;;  %v2635_v9 = vmax.f32 %v6174_v62, 0.0  ;;  %v4397_v12 = vmax.f32 %v3707_v60, 0.0  ;;  %v4756_v24 = vsel %vm4542_vm4, %v4396_v4, -inf }
 0x2a7   :  { %v4752_v5 = vsel %vm4542_vm4, %v4394_v59, -inf  ;;  %v4395_v6 = vmax.f32 %v3699_v61, 0.0  ;;  %v6175_v7 = vpop.f32.mrb[222].mxu0  ;;  %v2633_v14 = vmax.f32 %v2270_v2, 0.0 }
 0x2a8   :  { %v4753_v8 = vmax.f32 %v4751_v63, %v4752_v5  ;;  %v2636_v10 = vmax.f32 %v6175_v7, 0.0  ;;  %v2273_v11 = vpop.f32.mrb[223].mxu0  ;;  %v7716_v35 = vsel %vm4542_vm4, %v4397_v12, -inf }
 0x2a9   :  { %v4754_v13 = vsel %vm4542_vm4, %v4395_v6, -inf  ;;  %v2634_v15 = vmax.f32 %v2273_v11, 0.0  ;;  %v6332_v18 = vpop.f32.mrb[112].mxu1 }
 0x2aa   :  { %v4755_v19 = vmax.f32 %v4753_v8, %v4754_v13  ;;  %v2780_v21 = vpack.c.bf16 %v2636_v10, %v2635_v9  ;;  %v3711_v22 = vpop.f32.mrb[113].mxu1  ;;  %v3720_v26 = vadd.f32 %v7536_v17, %v6332_v18 }
 0x2ab   :  { %v2779_v25 = vpack.c.bf16 %v2634_v15, %v2633_v14  ;;  %v3712_v27 = vadd.f32 %v7536_v17, %v3711_v22  ;;  %v6333_v29 = vpop.f32.mrb[114].mxu1 }
 0x2ac   :  { %v7712_v31 = vmax.f32 %v4755_v19, %v4756_v24  ;;  %v3723_v32 = vadd.f32 %v7536_v17, %v6333_v29  ;;  %v3714_v34 = vpop.f32.mrb[115].mxu1  ;;  %v4400_v44 = vmax.f32 %v3720_v26, 0.0 }
 0x2ad   :  { %v4398_v36 = vmax.f32 %v3712_v27, 0.0  ;;  %v3715_v38 = vadd.f32 %v7536_v17, %v3714_v34  ;;  %v6178_v39 = vpop.f32.mrb[224].mxu0  ;;  %6438 = vmatprep.mubr.msk.bf16.mxu1 %vm2840_vm3, %v2779_v25 }
 0x2ae   :  { %v2286_v40 = vpop.f32.mrb[225].mxu0  ;;  %6439 = vmatmul.mubr.msk.bf16.gmra.mrb[220].mxu1 %vm2840_vm3, %v2780_v21  ;;  %v4759_v43 = vmax.f32 %v7712_v31, %v7716_v35  ;;  %v4401_v47 = vmax.f32 %v3723_v32, 0.0  ;;  %v2639_v49 = vmax.f32 %v6178_v39, 0.0  ;;  %v4763_v4 = vsel %vm4542_vm4, %v4400_v44, -inf }
 0x2af   :  { %v4399_v45 = vmax.f32 %v3715_v38, 0.0  ;;  %v6179_v46 = vpop.f32.mrb[226].mxu0  ;;  %v4760_v55 = vsel %vm4542_vm4, %v4398_v36, -inf  ;;  %v2637_v59 = vmax.f32 %v2286_v40, 0.0 }
 0x2b0   :  { %v2640_v50 = vmax.f32 %v6179_v46, 0.0  ;;  %v2289_v53 = vpop.f32.mrb[227].mxu0  ;;  %v4765_v11 = vsel %vm4542_vm4, %v4401_v47, -inf }
 0x2b1   :  { %v4761_v56 = vsel %vm4542_vm4, %v4399_v45, -inf  ;;  %v2638_v60 = vmax.f32 %v2289_v53, 0.0  ;;  %v6336_v61 = vpop.f32.mrb[116].mxu1 }
 0x2b2   :  { %v4762_v62 = vmax.f32 %v4760_v55, %v4761_v56  ;;  %v2782_v63 = vpack.c.bf16 %v2640_v50, %v2639_v49  ;;  %v3727_v2 = vpop.f32.mrb[117].mxu1  ;;  %v3736_v6 = vadd.f32 %v7536_v17, %v6336_v61 }
 0x2b3   :  { %v2781_v5 = vpack.c.bf16 %v2638_v60, %v2637_v59  ;;  %v3728_v7 = vadd.f32 %v7536_v17, %v3727_v2  ;;  %v6337_v8 = vpop.f32.mrb[118].mxu1 }
 0x2b4   :  { %v4764_v9 = vmax.f32 %v4762_v62, %v4763_v4  ;;  %v3730_v10 = vpop.f32.mrb[119].mxu1  ;;  %v3739_v13 = vadd.f32 %v7536_v17, %v6337_v8  ;;  %v4404_v21 = vmax.f32 %v3736_v6, 0.0 }
 0x2b5   :  { %v4402_v12 = vmax.f32 %v3728_v7, 0.0  ;;  %v3731_v14 = vadd.f32 %v7536_v17, %v3730_v10  ;;  %v6182_v15 = vpop.f32.mrb[228].mxu0  ;;  %6442 = vmatprep.mubr.msk.bf16.mxu1 %vm2840_vm3, %v2781_v5 }
 0x2b6   :  { %v4766_v18 = vmax.f32 %v4764_v9, %v4765_v11  ;;  %v2302_v19 = vpop.f32.mrb[229].mxu0  ;;  %6443 = vmatmul.mubr.msk.bf16.gmra.mrb[224].mxu1 %vm2840_vm3, %v2782_v63  ;;  %v2643_v27 = vmax.f32 %v6182_v15, 0.0  ;;  %v4405_v34 = vmax.f32 %v3739_v13, 0.0  ;;  %v4771_v47 = vsel %vm4542_vm4, %v4404_v21, -inf }
 0x2b7   :  { %v4767_v22 = vsel %vm4542_vm4, %v4402_v12, -inf  ;;  %v4403_v24 = vmax.f32 %v3731_v14, 0.0  ;;  %v6183_v25 = vpop.f32.mrb[230].mxu0  ;;  %v2641_v38 = vmax.f32 %v2302_v19, 0.0 }
 0x2b8   :  { %v4768_v26 = vmax.f32 %v4766_v18, %v4767_v22  ;;  %v2644_v29 = vmax.f32 %v6183_v25, 0.0  ;;  %v2305_v32 = vpop.f32.mrb[231].mxu0  ;;  %v4773_v60 = vsel %vm4542_vm4, %v4405_v34, -inf }
 0x2b9   :  { %v4769_v36 = vsel %vm4542_vm4, %v4403_v24, -inf  ;;  %v2642_v39 = vmax.f32 %v2305_v32, 0.0  ;;  %v6340_v40 = vpop.f32.mrb[120].mxu1  ;;  %v7748_v24 = vld [vmem:[%s8140_s3] ss:$0 sm:$0xff] }
 0x2ba   :  { %v4770_v44 = vmax.f32 %v4768_v26, %v4769_v36  ;;  %v2784_v45 = vpack.c.bf16 %v2644_v29, %v2643_v27  ;;  %v3743_v46 = vpop.f32.mrb[121].mxu1  ;;  %v3752_v50 = vadd.f32 %v7536_v17, %v6340_v40 }
 0x2bb   :  { %v2783_v49 = vpack.c.bf16 %v2642_v39, %v2641_v38  ;;  %v3744_v53 = vadd.f32 %v7536_v17, %v3743_v46  ;;  %v6341_v55 = vpop.f32.mrb[122].mxu1 }
 0x2bc   :  { %v4772_v56 = vmax.f32 %v4770_v44, %v4771_v47  ;;  %v3746_v59 = vpop.f32.mrb[123].mxu1  ;;  %v3755_v62 = vadd.f32 %v7536_v17, %v6341_v55  ;;  %v4408_v6 = vmax.f32 %v3752_v50, 0.0 }
 0x2bd   :  { %v4406_v61 = vmax.f32 %v3744_v53, 0.0  ;;  %v3747_v63 = vadd.f32 %v7536_v17, %v3746_v59  ;;  %v6186_v2 = vpop.f32.mrb[232].mxu0  ;;  %6446 = vmatprep.mubr.msk.bf16.mxu1 %vm2840_vm3, %v2783_v49 }
 0x2be   :  { %v4774_v4 = vmax.f32 %v4772_v56, %v4773_v60  ;;  %v2318_v5 = vpop.f32.mrb[233].mxu0  ;;  %6447 = vmatmul.mubr.msk.bf16.gmra.mrb[228].mxu1 %vm2840_vm3, %v2784_v45  ;;  %v2647_v11 = vmax.f32 %v6186_v2, 0.0  ;;  %v4409_v14 = vmax.f32 %v3755_v62, 0.0  ;;  %v4779_v27 = vsel %vm4542_vm4, %v4408_v6, -inf }
 0x2bf   :  { %v4775_v7 = vsel %vm4542_vm4, %v4406_v61, -inf  ;;  %v4407_v8 = vmax.f32 %v3747_v63, 0.0  ;;  %v6187_v9 = vpop.f32.mrb[234].mxu0  ;;  %v2645_v17 = vmax.f32 %v2318_v5, 0.0 }
 0x2c0   :  { %v4776_v10 = vmax.f32 %v4774_v4, %v4775_v7  ;;  %v2648_v12 = vmax.f32 %v6187_v9, 0.0  ;;  %v2321_v13 = vpop.f32.mrb[235].mxu0  ;;  %v4781_v39 = vsel %vm4542_vm4, %v4409_v14, -inf }
 0x2c1   :  { %v4777_v15 = vsel %vm4542_vm4, %v4407_v8, -inf  ;;  %v2646_v18 = vmax.f32 %v2321_v13, 0.0  ;;  %v6344_v19 = vpop.f32.mrb[124].mxu1 }
 0x2c2   :  { %v4778_v21 = vmax.f32 %v4776_v10, %v4777_v15  ;;  %v2786_v22 = vpack.c.bf16 %v2648_v12, %v2647_v11  ;;  %v3768_v25 = vadd.f32 %v7748_v24, %v6344_v19  ;;  %v3759_v26 = vpop.f32.mrb[125].mxu1  ;;  %v5139_v11 = vld [vmem:[%s8141_s4 + $0xc0] sm:$0xff]  ;;  %v5140_v12 = vld [vmem:[%s8141_s4 + $0xc8] sm:$0xff] }
 0x2c3   :  { %v2785_v29 = vpack.c.bf16 %v2646_v18, %v2645_v17  ;;  %v3760_v32 = vadd.f32 %v7748_v24, %v3759_v26  ;;  %v6345_v34 = vpop.f32.mrb[126].mxu1  ;;  %v6490_v18 = vpack.c.bf16 %v5140_v12, %v5139_v11 }
 0x2c4   :  { %v4780_v36 = vmax.f32 %v4778_v21, %v4779_v27  ;;  %v3762_v38 = vpop.f32.mrb[127].mxu1  ;;  %v3771_v44 = vadd.f32 %v7748_v24, %v6345_v34  ;;  %v4412_v47 = vmax.f32 %v3768_v25, 0.0  ;;  %v5123_v34 = vld [vmem:[%s8141_s4 + $0x40] sm:$0xff] }
 0x2c5   :  { %v4410_v40 = vmax.f32 %v3760_v32, 0.0  ;;  %v3763_v45 = vadd.f32 %v7748_v24, %v3762_v38  ;;  %v6190_v46 = vpop.f32.mrb[236].mxu0  ;;  %6450 = vmatprep.mubr.msk.bf16.mxu1 %vm2840_vm3, %v2785_v29  ;;  %6491 = vmatprep.subr.bf16.mxu1 %v6490_v18 }
 0x2c6   :  { %v4782_v49 = vmax.f32 %v4780_v36, %v4781_v39  ;;  %v2334_v50 = vpop.f32.mrb[237].mxu0  ;;  %6451 = vmatmul.mubr.msk.bf16.gmra.mrb[232].mxu1 %vm2840_vm3, %v2786_v22  ;;  %v2651_v60 = vmax.f32 %v6190_v46, 0.0  ;;  %v4413_v63 = vmax.f32 %v3771_v44, 0.0  ;;  %v4787_v7 = vsel %vm4542_vm4, %v4412_v47, -inf  ;;  %v5124_v36 = vld [vmem:[%s8141_s4 + $0x48] sm:$0xff] }
 0x2c7   :  { %v4783_v53 = vsel %vm4542_vm4, %v4410_v40, -inf  ;;  %v4411_v55 = vmax.f32 %v3763_v45, 0.0  ;;  %v6191_v56 = vpop.f32.mrb[238].mxu0  ;;  %v2649_v4 = vmax.f32 %v2334_v50, 0.0  ;;  %v6492_v45 = vpack.c.bf16 %v5124_v36, %v5123_v34 }
 0x2c8   :  { %v4784_v59 = vmax.f32 %v4782_v49, %v4783_v53  ;;  %v2652_v61 = vmax.f32 %v6191_v56, 0.0  ;;  %v2337_v62 = vpop.f32.mrb[239].mxu0  ;;  %v7773_v25 = vsel %vm4542_vm4, %v4413_v63, -inf }
 0x2c9   :  { %v4785_v2 = vsel %vm4542_vm4, %v4411_v55, -inf  ;;  %v2650_v5 = vmax.f32 %v2337_v62, 0.0  ;;  %v6348_v6 = vpop.f32.mrb[128].mxu1  ;;  %6493 = vmatpush3.bf16.msra.mxu1 %v6492_v45 }
 0x2ca   :  { %v4786_v8 = vmax.f32 %v4784_v59, %v4785_v2  ;;  %v2788_v9 = vpack.c.bf16 %v2652_v61, %v2651_v60  ;;  %v3775_v10 = vpop.f32.mrb[129].mxu1  ;;  %v3784_v14 = vadd.f32 %v7748_v24, %v6348_v6 }
 0x2cb   :  { %v2787_v13 = vpack.c.bf16 %v2650_v5, %v2649_v4  ;;  %v3776_v15 = vadd.f32 %v7748_v24, %v3775_v10  ;;  %v6349_v17 = vpop.f32.mrb[130].mxu1 }
 0x2cc   :  { %v7769_v19 = vmax.f32 %v4786_v8, %v4787_v7  ;;  %v3787_v21 = vadd.f32 %v7748_v24, %v6349_v17  ;;  %v3778_v22 = vpop.f32.mrb[131].mxu1  ;;  %v4416_v39 = vmax.f32 %v3784_v14, 0.0 }
 0x2cd   :  { %v4414_v26 = vmax.f32 %v3776_v15, 0.0  ;;  %v3779_v27 = vadd.f32 %v7748_v24, %v3778_v22  ;;  %v6194_v29 = vpop.f32.mrb[240].mxu0  ;;  %6454 = vmatprep.mubr.msk.bf16.mxu1 %vm2840_vm3, %v2787_v13 }
 0x2ce   :  { %v2350_v32 = vpop.f32.mrb[241].mxu0  ;;  %6455 = vmatmul.mubr.msk.bf16.gmra.mrb[236].mxu1 %vm2840_vm3, %v2788_v9  ;;  %v4790_v38 = vmax.f32 %v7769_v19, %v7773_v25  ;;  %v4417_v46 = vmax.f32 %v3787_v21, 0.0  ;;  %v2655_v47 = vmax.f32 %v6194_v29, 0.0  ;;  %v4794_v2 = vsel %vm4542_vm4, %v4416_v39, -inf }
 0x2cf   :  { %v4415_v40 = vmax.f32 %v3779_v27, 0.0  ;;  %v6195_v44 = vpop.f32.mrb[242].mxu0  ;;  %v4791_v53 = vsel %vm4542_vm4, %v4414_v26, -inf  ;;  %v2653_v56 = vmax.f32 %v2350_v32, 0.0 }
 0x2d0   :  { %v2656_v49 = vmax.f32 %v6195_v44, 0.0  ;;  %v2353_v50 = vpop.f32.mrb[243].mxu0  ;;  %v4796_v10 = vsel %vm4542_vm4, %v4417_v46, -inf }
 0x2d1   :  { %v4792_v55 = vsel %vm4542_vm4, %v4415_v40, -inf  ;;  %v2654_v59 = vmax.f32 %v2353_v50, 0.0  ;;  %v6352_v60 = vpop.f32.mrb[132].mxu1 }
 0x2d2   :  { %v4793_v61 = vmax.f32 %v4791_v53, %v4792_v55  ;;  %v2790_v62 = vpack.c.bf16 %v2656_v49, %v2655_v47  ;;  %v3791_v63 = vpop.f32.mrb[133].mxu1  ;;  %v3800_v5 = vadd.f32 %v7748_v24, %v6352_v60 }
 0x2d3   :  { %v2789_v4 = vpack.c.bf16 %v2654_v59, %v2653_v56  ;;  %v3792_v6 = vadd.f32 %v7748_v24, %v3791_v63  ;;  %v6353_v7 = vpop.f32.mrb[134].mxu1 }
 0x2d4   :  { %v4795_v8 = vmax.f32 %v4793_v61, %v4794_v2  ;;  %v3794_v9 = vpop.f32.mrb[135].mxu1  ;;  %v3803_v12 = vadd.f32 %v7748_v24, %v6353_v7  ;;  %v4420_v18 = vmax.f32 %v3800_v5, 0.0 }
 0x2d5   :  { %v4418_v11 = vmax.f32 %v3792_v6, 0.0  ;;  %v3795_v13 = vadd.f32 %v7748_v24, %v3794_v9  ;;  %v6198_v14 = vpop.f32.mrb[244].mxu0  ;;  %6458 = vmatprep.mubr.msk.bf16.mxu1 %vm2840_vm3, %v2789_v4 }
 0x2d6   :  { %v4797_v15 = vmax.f32 %v4795_v8, %v4796_v10  ;;  %v2366_v17 = vpop.f32.mrb[245].mxu0  ;;  %6459 = vmatmul.mubr.msk.bf16.gmra.mrb[240].mxu1 %vm2840_vm3, %v2790_v62  ;;  %v2659_v29 = vmax.f32 %v6198_v14, 0.0  ;;  %v4421_v36 = vmax.f32 %v3803_v12, 0.0  ;;  %v4802_v50 = vsel %vm4542_vm4, %v4420_v18, -inf }
 0x2d7   :  { %v4798_v21 = vsel %vm4542_vm4, %v4418_v11, -inf  ;;  %v4419_v22 = vmax.f32 %v3795_v13, 0.0  ;;  %v6199_v26 = vpop.f32.mrb[246].mxu0  ;;  %v2657_v40 = vmax.f32 %v2366_v17, 0.0 }
 0x2d8   :  { %v4799_v27 = vmax.f32 %v4797_v15, %v4798_v21  ;;  %v2660_v32 = vmax.f32 %v6199_v26, 0.0  ;;  %v2369_v34 = vpop.f32.mrb[247].mxu0  ;;  %v4804_v62 = vsel %vm4542_vm4, %v4421_v36, -inf }
 0x2d9   :  { %v4800_v39 = vsel %vm4542_vm4, %v4419_v22, -inf  ;;  %v2658_v44 = vmax.f32 %v2369_v34, 0.0  ;;  %v6356_v45 = vpop.f32.mrb[136].mxu1 }
 0x2da   :  { %v4801_v46 = vmax.f32 %v4799_v27, %v4800_v39  ;;  %v2792_v47 = vpack.c.bf16 %v2660_v32, %v2659_v29  ;;  %v3807_v49 = vpop.f32.mrb[137].mxu1  ;;  %v3816_v55 = vadd.f32 %v7748_v24, %v6356_v45 }
 0x2db   :  { %v2791_v53 = vpack.c.bf16 %v2658_v44, %v2657_v40  ;;  %v3808_v56 = vadd.f32 %v7748_v24, %v3807_v49  ;;  %v6357_v59 = vpop.f32.mrb[138].mxu1 }
 0x2dc   :  { %v4803_v60 = vmax.f32 %v4801_v46, %v4802_v50  ;;  %v3810_v61 = vpop.f32.mrb[139].mxu1  ;;  %v3819_v2 = vadd.f32 %v7748_v24, %v6357_v59  ;;  %v4424_v8 = vmax.f32 %v3816_v55, 0.0 }
 0x2dd   :  { %v4422_v63 = vmax.f32 %v3808_v56, 0.0  ;;  %v3811_v4 = vadd.f32 %v7748_v24, %v3810_v61  ;;  %v6202_v5 = vpop.f32.mrb[248].mxu0  ;;  %6462 = vmatprep.mubr.msk.bf16.mxu1 %vm2840_vm3, %v2791_v53 }
 0x2de   :  { %v4805_v6 = vmax.f32 %v4803_v60, %v4804_v62  ;;  %v2382_v7 = vpop.f32.mrb[249].mxu0  ;;  %6463 = vmatmul.mubr.msk.bf16.gmra.mrb[244].mxu1 %vm2840_vm3, %v2792_v47  ;;  %v2663_v13 = vmax.f32 %v6202_v5, 0.0  ;;  %v4425_v17 = vmax.f32 %v3819_v2, 0.0  ;;  %v4810_v34 = vsel %vm4542_vm4, %v4424_v8, -inf }
 0x2df   :  { %v4806_v9 = vsel %vm4542_vm4, %v4422_v63, -inf  ;;  %v4423_v10 = vmax.f32 %v3811_v4, 0.0  ;;  %v6203_v11 = vpop.f32.mrb[250].mxu0  ;;  %v2661_v21 = vmax.f32 %v2382_v7, 0.0 }
 0x2e0   :  { %v4807_v12 = vmax.f32 %v4805_v6, %v4806_v9  ;;  %v2664_v14 = vmax.f32 %v6203_v11, 0.0  ;;  %v2385_v15 = vpop.f32.mrb[251].mxu0  ;;  %v4812_v47 = vsel %vm4542_vm4, %v4425_v17, -inf }
 0x2e1   :  { %v4808_v18 = vsel %vm4542_vm4, %v4423_v10, -inf  ;;  %v2662_v22 = vmax.f32 %v2385_v15, 0.0  ;;  %v6360_v26 = vpop.f32.mrb[140].mxu1 }
 0x2e2   :  { %v4809_v27 = vmax.f32 %v4807_v12, %v4808_v18  ;;  %v2794_v29 = vpack.c.bf16 %v2664_v14, %v2663_v13  ;;  %v3823_v32 = vpop.f32.mrb[141].mxu1  ;;  %v3832_v39 = vadd.f32 %v7748_v24, %v6360_v26 }
 0x2e3   :  { %v2793_v36 = vpack.c.bf16 %v2662_v22, %v2661_v21  ;;  %v3824_v40 = vadd.f32 %v7748_v24, %v3823_v32  ;;  %v6361_v44 = vpop.f32.mrb[142].mxu1 }
 0x2e4   :  { %v4811_v45 = vmax.f32 %v4809_v27, %v4810_v34  ;;  %v3826_v46 = vpop.f32.mrb[143].mxu1  ;;  %v3835_v50 = vadd.f32 %v7748_v24, %v6361_v44  ;;  %v4428_v60 = vmax.f32 %v3832_v39, 0.0 }
 0x2e5   :  { %v4426_v49 = vmax.f32 %v3824_v40, 0.0  ;;  %v3827_v53 = vadd.f32 %v7748_v24, %v3826_v46  ;;  %v6206_v55 = vpop.f32.mrb[252].mxu0  ;;  %6466 = vmatprep.mubr.msk.bf16.mxu1 %vm2840_vm3, %v2793_v36 }
 0x2e6   :  { %v4813_v56 = vmax.f32 %v4811_v45, %v4812_v47  ;;  %v2398_v59 = vpop.f32.mrb[253].mxu0  ;;  %6467 = vmatmul.mubr.msk.bf16.gmra.mrb[248].mxu1 %vm2840_vm3, %v2794_v29  ;;  %v2667_v4 = vmax.f32 %v6206_v55, 0.0  ;;  %v4429_v7 = vmax.f32 %v3835_v50, 0.0  ;;  %v4818_v15 = vsel %vm4542_vm4, %v4428_v60, -inf }
 0x2e7   :  { %v4814_v61 = vsel %vm4542_vm4, %v4426_v49, -inf  ;;  %v4427_v62 = vmax.f32 %v3827_v53, 0.0  ;;  %v6207_v63 = vpop.f32.mrb[254].mxu0  ;;  %v2665_v9 = vmax.f32 %v2398_v59, 0.0 }
 0x2e8   :  { %v4815_v2 = vmax.f32 %v4813_v56, %v4814_v61  ;;  %v2668_v5 = vmax.f32 %v6207_v63, 0.0  ;;  %v2401_v6 = vpop.f32.mrb[255].mxu0  ;;  %v7824_v29 = vsel %vm4542_vm4, %v4429_v7, -inf }
 0x2e9   :  { %v4816_v8 = vsel %vm4542_vm4, %v4427_v62, -inf  ;;  %v2666_v10 = vmax.f32 %v2401_v6, 0.0  ;;  %v6364_v11 = vpop.f32.mrb[144].mxu1 }
 0x2ea   :  { %v4817_v12 = vmax.f32 %v4815_v2, %v4816_v8  ;;  %v2796_v13 = vpack.c.bf16 %v2668_v5, %v2667_v4  ;;  %v3839_v14 = vpop.f32.mrb[145].mxu1  ;;  %v3848_v18 = vadd.f32 %v7748_v24, %v6364_v11 }
 0x2eb   :  { %v2795_v17 = vpack.c.bf16 %v2666_v10, %v2665_v9  ;;  %v3840_v21 = vadd.f32 %v7748_v24, %v3839_v14  ;;  %v6365_v22 = vpop.f32.mrb[146].mxu1 }
 0x2ec   :  { %v7821_v26 = vmax.f32 %v4817_v12, %v4818_v15  ;;  %v3842_v27 = vpop.f32.mrb[147].mxu1  ;;  %v3851_v34 = vadd.f32 %v7748_v24, %v6365_v22  ;;  %v4432_v40 = vmax.f32 %v3848_v18, 0.0 }
 0x2ed   :  { %v4430_v32 = vmax.f32 %v3840_v21, 0.0  ;;  %v3843_v36 = vadd.f32 %v7748_v24, %v3842_v27  ;;  %6470 = vmatprep.mubr.msk.bf16.mxu1 %vm2840_vm3, %v2795_v17 }
 0x2ee   :  { %v4821_v39 = vmax.f32 %v7821_v26, %v7824_v29  ;;  %6471 = vmatmul.mubr.msk.bf16.gmra.mrb[252].mxu1 %vm2840_vm3, %v2796_v13  ;;  %v4433_v46 = vmax.f32 %v3851_v34, 0.0  ;;  %v4825_v55 = vsel %vm4542_vm4, %v4432_v40, -inf }
 0x2ef   :  { %v4431_v44 = vmax.f32 %v3843_v36, 0.0  ;;  %v4822_v45 = vsel %vm4542_vm4, %v4430_v32, -inf }
 0x2f0   :  { %v4827_v63 = vsel %vm4542_vm4, %v4433_v46, -inf }
 0x2f1   :  { %v4823_v47 = vsel %vm4542_vm4, %v4431_v44, -inf  ;;  %v6368_v49 = vpop.f32.mrb[148].mxu1 }
 0x2f2   :  { %v4824_v50 = vmax.f32 %v4822_v45, %v4823_v47  ;;  %v3855_v53 = vpop.f32.mrb[149].mxu1  ;;  %v3864_v56 = vadd.f32 %v7748_v24, %v6368_v49 }
 0x2f3   :  { %v3856_v59 = vadd.f32 %v7748_v24, %v3855_v53  ;;  %v6369_v60 = vpop.f32.mrb[150].mxu1 }
 0x2f4   :  { %v4826_v61 = vmax.f32 %v4824_v50, %v4825_v55  ;;  %v3858_v62 = vpop.f32.mrb[151].mxu1  ;;  %v3867_v4 = vadd.f32 %v7748_v24, %v6369_v60  ;;  %v4436_v7 = vmax.f32 %v3864_v56, 0.0 }
 0x2f5   :  { %v4434_v2 = vmax.f32 %v3856_v59, 0.0  ;;  %v3859_v5 = vadd.f32 %v7748_v24, %v3858_v62 }
 0x2f6   :  { %v4828_v6 = vmax.f32 %v4826_v61, %v4827_v63  ;;  %v4437_v11 = vmax.f32 %v3867_v4, 0.0  ;;  %v4833_v17 = vsel %vm4542_vm4, %v4436_v7, -inf }
 0x2f7   :  { %v4829_v8 = vsel %vm4542_vm4, %v4434_v2, -inf  ;;  %v4435_v9 = vmax.f32 %v3859_v5, 0.0 }
 0x2f8   :  { %v4830_v10 = vmax.f32 %v4828_v6, %v4829_v8  ;;  %v4835_v34 = vsel %vm4542_vm4, %v4437_v11, -inf }
 0x2f9   :  { %v4831_v12 = vsel %vm4542_vm4, %v4435_v9, -inf  ;;  %v6372_v13 = vpop.f32.mrb[152].mxu1 }
 0x2fa   :  { %v4832_v14 = vmax.f32 %v4830_v10, %v4831_v12  ;;  %v3871_v15 = vpop.f32.mrb[153].mxu1  ;;  %v3880_v18 = vadd.f32 %v7748_v24, %v6372_v13 }
 0x2fb   :  { %v3872_v21 = vadd.f32 %v7748_v24, %v3871_v15  ;;  %v6373_v22 = vpop.f32.mrb[154].mxu1 }
 0x2fc   :  { %v4834_v27 = vmax.f32 %v4832_v14, %v4833_v17  ;;  %v3874_v32 = vpop.f32.mrb[155].mxu1  ;;  %v3883_v40 = vadd.f32 %v7748_v24, %v6373_v22  ;;  %v4440_v46 = vmax.f32 %v3880_v18, 0.0 }
 0x2fd   :  { %v4438_v36 = vmax.f32 %v3872_v21, 0.0  ;;  %v3875_v44 = vadd.f32 %v7748_v24, %v3874_v32 }
 0x2fe   :  { %v4836_v45 = vmax.f32 %v4834_v27, %v4835_v34  ;;  %v4441_v53 = vmax.f32 %v3883_v40, 0.0  ;;  %v4841_v61 = vsel %vm4542_vm4, %v4440_v46, -inf  ;;  %v5141_v46 = vld [vmem:[%s8141_s4 + $0xd0] sm:$0xff] }
 0x2ff   :  { %v4837_v47 = vsel %vm4542_vm4, %v4438_v36, -inf  ;;  %v4439_v49 = vmax.f32 %v3875_v44, 0.0 }
 0x300   :  { %v4838_v50 = vmax.f32 %v4836_v45, %v4837_v47  ;;  %v4843_v7 = vsel %vm4542_vm4, %v4441_v53, -inf  ;;  %v5142_v47 = vld [vmem:[%s8141_s4 + $0xd8] sm:$0xff] }
 0x301   :  { %v4839_v55 = vsel %vm4542_vm4, %v4439_v49, -inf  ;;  %v6376_v56 = vpop.f32.mrb[156].mxu1 }
 0x302   :  { %v4840_v59 = vmax.f32 %v4838_v50, %v4839_v55  ;;  %v3887_v60 = vpop.f32.mrb[157].mxu1  ;;  %v3896_v62 = vadd.f32 %v7748_v24, %v6376_v56  ;;  %v6494_v55 = vpack.c.bf16 %v5142_v47, %v5141_v46 }
 0x303   :  { %v3888_v63 = vadd.f32 %v7748_v24, %v3887_v60  ;;  %v6377_v2 = vpop.f32.mrb[158].mxu1  ;;  %v5126_v60 = vld [vmem:[%s8141_s4 + $0x58] sm:$0xff] }
 0x304   :  { %v4842_v4 = vmax.f32 %v4840_v59, %v4841_v61  ;;  %v3899_v5 = vadd.f32 %v7748_v24, %v6377_v2  ;;  %v3890_v6 = vpop.f32.mrb[159].mxu1  ;;  %v4444_v11 = vmax.f32 %v3896_v62, 0.0  ;;  %v5125_v59 = vld [vmem:[%s8141_s4 + $0x50] sm:$0xff]  ;;  %6495 = vmatprep.subr.bf16.mxu1 %v6494_v55 }
 0x305   :  { %v4442_v8 = vmax.f32 %v3888_v63, 0.0  ;;  %v3891_v9 = vadd.f32 %v7748_v24, %v3890_v6  ;;  %v6496_v63 = vpack.c.bf16 %v5126_v60, %v5125_v59 }
 0x306   :  { %v4844_v10 = vmax.f32 %v4842_v4, %v4843_v7  ;;  %v4445_v15 = vmax.f32 %v3899_v5, 0.0  ;;  %v4849_v27 = vsel %vm4542_vm4, %v4444_v11, -inf }
 0x307   :  { %v4845_v12 = vsel %vm4542_vm4, %v4442_v8, -inf  ;;  %v4443_v13 = vmax.f32 %v3891_v9, 0.0  ;;  %6497 = vmatpush3.bf16.msra.mxu1 %v6496_v63 }
 0x308   :  { %v4846_v14 = vmax.f32 %v4844_v10, %v4845_v12  ;;  %v4851_v40 = vsel %vm4542_vm4, %v4445_v15, -inf }
 0x309   :  { %v4847_v17 = vsel %vm4542_vm4, %v4443_v13, -inf  ;;  %v6380_v18 = vpop.f32.mrb[160].mxu1 }
 0x30a   :  { %v4848_v21 = vmax.f32 %v4846_v14, %v4847_v17  ;;  %v3903_v22 = vpop.f32.mrb[161].mxu1  ;;  %v3912_v32 = vadd.f32 %v7748_v24, %v6380_v18 }
 0x30b   :  { %v3904_v34 = vadd.f32 %v7748_v24, %v3903_v22  ;;  %v6381_v36 = vpop.f32.mrb[162].mxu1 }
 0x30c   :  { %v3906_v44 = vpop.f32.mrb[163].mxu1  ;;  %v4850_v45 = vmax.f32 %v4848_v21, %v4849_v27  ;;  %v3915_v50 = vadd.f32 %v7748_v24, %v6381_v36  ;;  %v4448_v61 = vmax.f32 %v3912_v32, 0.0 }
 0x30d   :  { %v4446_v49 = vmax.f32 %v3904_v34, 0.0  ;;  %v3907_v53 = vadd.f32 %v7748_v24, %v3906_v44 }
 0x30e   :  { %v4852_v56 = vmax.f32 %v4850_v45, %v4851_v40  ;;  %v4449_v5 = vmax.f32 %v3915_v50, 0.0  ;;  %v4856_v10 = vsel %vm4542_vm4, %v4448_v61, -inf }
 0x30f   :  { %v4447_v62 = vmax.f32 %v3907_v53, 0.0  ;;  %v4853_v4 = vsel %vm4542_vm4, %v4446_v49, -inf }
 0x310   :  { %v6515_v2 = vpack.i.bf16 %v4604_v51, %v4852_v56  ;;  %v4858_v51 = vsel %vm4542_vm4, %v4449_v5, -inf }
 0x311   :  { %v4854_v6 = vsel %vm4542_vm4, %v4447_v62, -inf  ;;  %v6384_v7 = vpop.f32.mrb[164].mxu1 }
 0x312   :  { %v4855_v8 = vmax.f32 %v4853_v4, %v4854_v6  ;;  %6516 = vrot.lane.b32.xlu0 %v6515_v2, %s6696_s1  ;;  %v3919_v9 = vpop.f32.mrb[165].mxu1  ;;  %v3928_v11 = vadd.f32 %v7748_v24, %v6384_v7 }
 0x313   :  { %v3920_v12 = vadd.f32 %v7748_v24, %v3919_v9  ;;  %v6385_v13 = vpop.f32.mrb[166].mxu1 }
 0x314   :  { %v4857_v41 = vmax.f32 %v4855_v8, %v4856_v10  ;;  %v3922_v42 = vpop.f32.mrb[167].mxu1  ;;  %v3931_v15 = vadd.f32 %v7748_v24, %v6385_v13  ;;  %v4452_v21 = vmax.f32 %v3928_v11, 0.0 }
 0x315   :  { %v4450_v14 = vmax.f32 %v3920_v12, 0.0  ;;  %v3923_v17 = vadd.f32 %v7748_v24, %v3922_v42 }
 0x316   :  { %v4859_v18 = vmax.f32 %v4857_v41, %v4858_v51  ;;  %v4453_v34 = vmax.f32 %v3931_v15, 0.0  ;;  %v4864_v46 = vsel %vm4542_vm4, %v4452_v21, -inf }
 0x317   :  { %v4860_v22 = vsel %vm4542_vm4, %v4450_v14, -inf  ;;  %v4451_v27 = vmax.f32 %v3923_v17, 0.0 }
 0x318   :  { %v4861_v32 = vmax.f32 %v4859_v18, %v4860_v22  ;;  %v4866_v56 = vsel %vm4542_vm4, %v4453_v34, -inf }
 0x319   :  { %v4862_v36 = vsel %vm4542_vm4, %v4451_v27, -inf  ;;  %v6388_v40 = vpop.f32.mrb[168].mxu1 }
 0x31a   :  { %v4863_v44 = vmax.f32 %v4861_v32, %v4862_v36  ;;  %v3935_v45 = vpop.f32.mrb[169].mxu1  ;;  %v3944_v47 = vadd.f32 %v7748_v24, %v6388_v40 }
 0x31b   :  { %v3936_v49 = vadd.f32 %v7748_v24, %v3935_v45  ;;  %v6389_v50 = vpop.f32.mrb[170].mxu1 }
 0x31c   :  { %v4865_v53 = vmax.f32 %v4863_v44, %v4864_v46  ;;  %v3938_v55 = vpop.f32.mrb[171].mxu1  ;;  %v3947_v60 = vadd.f32 %v7748_v24, %v6389_v50  ;;  %v4456_v63 = vmax.f32 %v3944_v47, 0.0 }
 0x31d   :  { %v4454_v59 = vmax.f32 %v3936_v49, 0.0  ;;  %v3939_v61 = vadd.f32 %v7748_v24, %v3938_v55 }
 0x31e   :  { %v4867_v62 = vmax.f32 %v4865_v53, %v4866_v56  ;;  %v4457_v6 = vmax.f32 %v3947_v60, 0.0  ;;  %v4872_v11 = vsel %vm4542_vm4, %v4456_v63, -inf }
 0x31f   :  { %v4868_v2 = vsel %vm4542_vm4, %v4454_v59, -inf  ;;  %v4455_v4 = vmax.f32 %v3939_v61, 0.0 }
 0x320   :  { %v4869_v5 = vmax.f32 %v4867_v62, %v4868_v2  ;;  %v4874_v14 = vsel %vm4542_vm4, %v4457_v6, -inf }
 0x321   :  { %v4870_v7 = vsel %vm4542_vm4, %v4455_v4, -inf  ;;  %v6392_v8 = vpop.f32.mrb[172].mxu1 }
 0x322   :  { %v4871_v9 = vmax.f32 %v4869_v5, %v4870_v7  ;;  %v3951_v10 = vpop.f32.mrb[173].mxu1  ;;  %v3960_v12 = vadd.f32 %v7748_v24, %v6392_v8 }
 0x323   :  { %v3952_v13 = vadd.f32 %v7748_v24, %v3951_v10  ;;  %v6393_v41 = vpop.f32.mrb[174].mxu1 }
 0x324   :  { %v4873_v42 = vmax.f32 %v4871_v9, %v4872_v11  ;;  %v3954_v51 = vpop.f32.mrb[175].mxu1  ;;  %v3963_v17 = vadd.f32 %v7748_v24, %v6393_v41  ;;  %v4460_v22 = vmax.f32 %v3960_v12, 0.0 }
 0x325   :  { %v4458_v15 = vmax.f32 %v3952_v13, 0.0  ;;  %v3955_v18 = vadd.f32 %v7748_v24, %v3954_v51 }
 0x326   :  { %v4875_v21 = vmax.f32 %v4873_v42, %v4874_v14  ;;  %v4461_v36 = vmax.f32 %v3963_v17, 0.0  ;;  %v4880_v47 = vsel %vm4542_vm4, %v4460_v22, -inf }
 0x327   :  { %v4876_v27 = vsel %vm4542_vm4, %v4458_v15, -inf  ;;  %v4459_v32 = vmax.f32 %v3955_v18, 0.0 }
 0x328   :  { %v4877_v34 = vmax.f32 %v4875_v21, %v4876_v27  ;;  %v4882_v59 = vsel %vm4542_vm4, %v4461_v36, -inf }
 0x329   :  { %v4878_v40 = vsel %vm4542_vm4, %v4459_v32, -inf  ;;  %v6396_v44 = vpop.f32.mrb[176].mxu1 }
 0x32a   :  { %v4879_v45 = vmax.f32 %v4877_v34, %v4878_v40  ;;  %v3967_v46 = vpop.f32.mrb[177].mxu1  ;;  %v3976_v49 = vadd.f32 %v7748_v24, %v6396_v44 }
 0x32b   :  { %v3968_v50 = vadd.f32 %v7748_v24, %v3967_v46  ;;  %v6397_v53 = vpop.f32.mrb[178].mxu1 }
 0x32c   :  { %v4881_v55 = vmax.f32 %v4879_v45, %v4880_v47  ;;  %v3970_v56 = vpop.f32.mrb[179].mxu1  ;;  %v3979_v61 = vadd.f32 %v7748_v24, %v6397_v53  ;;  %v4464_v2 = vmax.f32 %v3976_v49, 0.0 }
 0x32d   :  { %v4462_v60 = vmax.f32 %v3968_v50, 0.0  ;;  %v3971_v62 = vadd.f32 %v7748_v24, %v3970_v56 }
 0x32e   :  { %v4883_v63 = vmax.f32 %v4881_v55, %v4882_v59  ;;  %v4465_v7 = vmax.f32 %v3979_v61, 0.0  ;;  %v4887_v12 = vsel %vm4542_vm4, %v4464_v2, -inf }
 0x32f   :  { %v4463_v4 = vmax.f32 %v3971_v62, 0.0  ;;  %v4884_v6 = vsel %vm4542_vm4, %v4462_v60, -inf }
 0x330   :  { %v6520_v5 = vpack.i.bf16 %v4635_v57, %v4883_v63  ;;  %v4889_v52 = vsel %vm4542_vm4, %v4465_v7, -inf }
 0x331   :  { %v4885_v8 = vsel %vm4542_vm4, %v4463_v4, -inf  ;;  %v6400_v9 = vpop.f32.mrb[180].mxu1 }
 0x332   :  { %v4886_v10 = vmax.f32 %v4884_v6, %v4885_v8  ;;  %6521 = vrot.lane.b32.xlu0 %v6520_v5, %s6697_s17  ;;  %v3983_v11 = vpop.f32.mrb[181].mxu1  ;;  %v3992_v13 = vadd.f32 %v7748_v24, %v6400_v9 }
 0x333   :  { %v3984_v41 = vadd.f32 %v7748_v24, %v3983_v11  ;;  %v6401_v42 = vpop.f32.mrb[182].mxu1 }
 0x334   :  { %v4888_v51 = vmax.f32 %v4886_v10, %v4887_v12  ;;  %v3986_v48 = vpop.f32.mrb[183].mxu1  ;;  %v3995_v14 = vadd.f32 %v7748_v24, %v6401_v42  ;;  %v4468_v18 = vmax.f32 %v3992_v13, 0.0 }
 0x335   :  { %v4466_v57 = vmax.f32 %v3984_v41, 0.0  ;;  %v3987_v15 = vadd.f32 %v7748_v24, %v3986_v48 }
 0x336   :  { %v4890_v17 = vmax.f32 %v4888_v51, %v4889_v52  ;;  %v4469_v32 = vmax.f32 %v3995_v14, 0.0  ;;  %v4895_v45 = vsel %vm4542_vm4, %v4468_v18, -inf }
 0x337   :  { %v4891_v21 = vsel %vm4542_vm4, %v4466_v57, -inf  ;;  %v4467_v22 = vmax.f32 %v3987_v15, 0.0 }
 0x338   :  { %v4892_v27 = vmax.f32 %v4890_v17, %v4891_v21  ;;  %v4897_v55 = vsel %vm4542_vm4, %v4469_v32, -inf }
 0x339   :  { %v4893_v34 = vsel %vm4542_vm4, %v4467_v22, -inf  ;;  %v6404_v36 = vpop.f32.mrb[184].mxu1 }
 0x33a   :  { %v4894_v40 = vmax.f32 %v4892_v27, %v4893_v34  ;;  %v3999_v44 = vpop.f32.mrb[185].mxu1  ;;  %v4008_v46 = vadd.f32 %v7748_v24, %v6404_v36 }
 0x33b   :  { %v4000_v47 = vadd.f32 %v7748_v24, %v3999_v44  ;;  %v6405_v49 = vpop.f32.mrb[186].mxu1 }
 0x33c   :  { %v4896_v50 = vmax.f32 %v4894_v40, %v4895_v45  ;;  %v4002_v53 = vpop.f32.mrb[187].mxu1  ;;  %v4011_v59 = vadd.f32 %v7748_v24, %v6405_v49  ;;  %v4472_v62 = vmax.f32 %v4008_v46, 0.0 }
 0x33d   :  { %v4470_v56 = vmax.f32 %v4000_v47, 0.0  ;;  %v4003_v60 = vadd.f32 %v7748_v24, %v4002_v53  ;;  %v5143_v53 = vld [vmem:[%s8141_s4 + $0xe0] sm:$0xff] }
 0x33e   :  { %v4898_v61 = vmax.f32 %v4896_v50, %v4897_v55  ;;  %v4473_v5 = vmax.f32 %v4011_v59, 0.0  ;;  %v4903_v10 = vsel %vm4542_vm4, %v4472_v62, -inf  ;;  %v5144_v55 = vld [vmem:[%s8141_s4 + $0xe8] sm:$0xff] }
 0x33f   :  { %v4899_v63 = vsel %vm4542_vm4, %v4470_v56, -inf  ;;  %v4471_v2 = vmax.f32 %v4003_v60, 0.0  ;;  %v5127_v56 = vld [vmem:[%s8141_s4 + $0x60] sm:$0xff]  ;;  %v6498_v62 = vpack.c.bf16 %v5144_v55, %v5143_v53 }
 0x340   :  { %v4900_v4 = vmax.f32 %v4898_v61, %v4899_v63  ;;  %v4905_v48 = vsel %vm4542_vm4, %v4473_v5, -inf  ;;  %v5128_v63 = vld [vmem:[%s8141_s4 + $0x68] sm:$0xff] }
 0x341   :  { %v4901_v6 = vsel %vm4542_vm4, %v4471_v2, -inf  ;;  %v6408_v7 = vpop.f32.mrb[188].mxu1  ;;  %6499 = vmatprep.subr.bf16.mxu1 %v6498_v62 }
 0x342   :  { %v4902_v8 = vmax.f32 %v4900_v4, %v4901_v6  ;;  %v4015_v9 = vpop.f32.mrb[189].mxu1  ;;  %v4024_v11 = vadd.f32 %v7748_v24, %v6408_v7  ;;  %v6500_v4 = vpack.c.bf16 %v5128_v63, %v5127_v56 }
 0x343   :  { %v4016_v12 = vadd.f32 %v7748_v24, %v4015_v9  ;;  %v6409_v13 = vpop.f32.mrb[190].mxu1 }
 0x344   :  { %v4904_v41 = vmax.f32 %v4902_v8, %v4903_v10  ;;  %v4027_v42 = vadd.f32 %v7748_v24, %v6409_v13  ;;  %v4018_v51 = vpop.f32.mrb[191].mxu1  ;;  %v4476_v15 = vmax.f32 %v4024_v11, 0.0  ;;  %6501 = vmatpush3.bf16.msra.mxu1 %v6500_v4 }
 0x345   :  { %v4474_v52 = vmax.f32 %v4016_v12, 0.0  ;;  %v4019_v57 = vadd.f32 %v7748_v24, %v4018_v51 }
 0x346   :  { %v4906_v14 = vmax.f32 %v4904_v41, %v4905_v48  ;;  %v4477_v22 = vmax.f32 %v4027_v42, 0.0  ;;  %v4911_v40 = vsel %vm4542_vm4, %v4476_v15, -inf }
 0x347   :  { %v4907_v17 = vsel %vm4542_vm4, %v4474_v52, -inf  ;;  %v4475_v18 = vmax.f32 %v4019_v57, 0.0 }
 0x348   :  { %v4908_v21 = vmax.f32 %v4906_v14, %v4907_v17  ;;  %v4913_v47 = vsel %vm4542_vm4, %v4477_v22, -inf }
 0x349   :  { %v4909_v27 = vsel %vm4542_vm4, %v4475_v18, -inf  ;;  %v6412_v32 = vpop.f32.mrb[192].mxu1 }
 0x34a   :  { %v4910_v34 = vmax.f32 %v4908_v21, %v4909_v27  ;;  %v4031_v36 = vpop.f32.mrb[193].mxu1  ;;  %v4040_v44 = vadd.f32 %v7748_v24, %v6412_v32 }
 0x34b   :  { %v4032_v45 = vadd.f32 %v7748_v24, %v4031_v36  ;;  %v6413_v46 = vpop.f32.mrb[194].mxu1 }
 0x34c   :  { %v4034_v49 = vpop.f32.mrb[195].mxu1  ;;  %v4912_v50 = vmax.f32 %v4910_v34, %v4911_v40  ;;  %v4043_v60 = vadd.f32 %v7748_v24, %v6413_v46  ;;  %v4480_v5 = vmax.f32 %v4040_v44, 0.0 }
 0x34d   :  { %v4478_v59 = vmax.f32 %v4032_v45, 0.0  ;;  %v4035_v61 = vadd.f32 %v7748_v24, %v4034_v49 }
 0x34e   :  { %v4914_v2 = vmax.f32 %v4912_v50, %v4913_v47  ;;  %v4481_v9 = vmax.f32 %v4043_v60, 0.0  ;;  %v4918_v41 = vsel %vm4542_vm4, %v4480_v5, -inf }
 0x34f   :  { %v4479_v6 = vmax.f32 %v4035_v61, 0.0  ;;  %v4915_v8 = vsel %vm4542_vm4, %v4478_v59, -inf }
 0x350   :  { %v6525_v7 = vpack.i.bf16 %v4666_v16, %v4914_v2  ;;  %v4920_v16 = vsel %vm4542_vm4, %v4481_v9, -inf }
 0x351   :  { %v4916_v10 = vsel %vm4542_vm4, %v4479_v6, -inf  ;;  %v6416_v11 = vpop.f32.mrb[196].mxu1 }
 0x352   :  { %v4917_v12 = vmax.f32 %v4915_v8, %v4916_v10  ;;  %6526 = vrot.lane.b32.xlu1 %v6525_v7, %s6698_s25  ;;  %v4047_v13 = vpop.f32.mrb[197].mxu1  ;;  %v4056_v42 = vadd.f32 %v7748_v24, %v6416_v11 }
 0x353   :  { %v4048_v51 = vadd.f32 %v7748_v24, %v4047_v13  ;;  %v6417_v48 = vpop.f32.mrb[198].mxu1 }
 0x354   :  { %v4919_v0 = vmax.f32 %v4917_v12, %v4918_v41  ;;  %v4050_v1 = vpop.f32.mrb[199].mxu1  ;;  %v4059_v57 = vadd.f32 %v7748_v24, %v6417_v48  ;;  %v4484_v17 = vmax.f32 %v4056_v42, 0.0 }
 0x355   :  { %v4482_v52 = vmax.f32 %v4048_v51, 0.0  ;;  %v4051_v14 = vadd.f32 %v7748_v24, %v4050_v1 }
 0x356   :  { %v4921_v15 = vmax.f32 %v4919_v0, %v4920_v16  ;;  %v4485_v27 = vmax.f32 %v4059_v57, 0.0  ;;  %v4926_v44 = vsel %vm4542_vm4, %v4484_v17, -inf }
 0x357   :  { %v4922_v18 = vsel %vm4542_vm4, %v4482_v52, -inf  ;;  %v4483_v21 = vmax.f32 %v4051_v14, 0.0 }
 0x358   :  { %v4923_v22 = vmax.f32 %v4921_v15, %v4922_v18  ;;  %v4928_v53 = vsel %vm4542_vm4, %v4485_v27, -inf }
 0x359   :  { %v4924_v32 = vsel %vm4542_vm4, %v4483_v21, -inf  ;;  %v6420_v34 = vpop.f32.mrb[200].mxu1 }
 0x35a   :  { %v4925_v36 = vmax.f32 %v4923_v22, %v4924_v32  ;;  %v4063_v40 = vpop.f32.mrb[201].mxu1  ;;  %v4072_v45 = vadd.f32 %v7748_v24, %v6420_v34  ;;  %v7991_v32 = vld [vmem:[%s8140_s3] ss:$0 sm:$0xff]  ;;  %s6699_s3 = smov 64  }
 0x35b   :  { %v4064_v46 = vadd.f32 %v7748_v24, %v4063_v40  ;;  %v6421_v47 = vpop.f32.mrb[202].mxu1 }
 0x35c   :  { %v4927_v49 = vmax.f32 %v4925_v36, %v4926_v44  ;;  %v4066_v50 = vpop.f32.mrb[203].mxu1  ;;  %v4075_v56 = vadd.f32 %v7748_v24, %v6421_v47  ;;  %v4488_v61 = vmax.f32 %v4072_v45, 0.0 }
 0x35d   :  { %v4486_v55 = vmax.f32 %v4064_v46, 0.0  ;;  %v4067_v59 = vadd.f32 %v7748_v24, %v4066_v50 }
 0x35e   :  { %v4929_v60 = vmax.f32 %v4927_v49, %v4928_v53  ;;  %v4489_v4 = vmax.f32 %v4075_v56, 0.0  ;;  %v4934_v9 = vsel %vm4542_vm4, %v4488_v61, -inf }
 0x35f   :  { %v4930_v62 = vsel %vm4542_vm4, %v4486_v55, -inf  ;;  %v4487_v63 = vmax.f32 %v4067_v59, 0.0 }
 0x360   :  { %v4931_v2 = vmax.f32 %v4929_v60, %v4930_v62  ;;  %v4936_v42 = vsel %vm4542_vm4, %v4489_v4, -inf }
 0x361   :  { %v4932_v5 = vsel %vm4542_vm4, %v4487_v63, -inf  ;;  %v6424_v6 = vpop.f32.mrb[204].mxu1 }
 0x362   :  { %v4933_v7 = vmax.f32 %v4931_v2, %v4932_v5  ;;  %v4079_v8 = vpop.f32.mrb[205].mxu1  ;;  %v4088_v10 = vadd.f32 %v7748_v24, %v6424_v6 }
 0x363   :  { %v4080_v11 = vadd.f32 %v7748_v24, %v4079_v8  ;;  %v6425_v12 = vpop.f32.mrb[206].mxu1 }
 0x364   :  { %v4935_v13 = vmax.f32 %v4933_v7, %v4934_v9  ;;  %v4082_v41 = vpop.f32.mrb[207].mxu1  ;;  %v4091_v48 = vadd.f32 %v7748_v24, %v6425_v12  ;;  %v4492_v16 = vmax.f32 %v4088_v10, 0.0 }
 0x365   :  { %v4490_v51 = vmax.f32 %v4080_v11, 0.0  ;;  %v4083_v0 = vadd.f32 %v7748_v24, %v4082_v41 }
 0x366   :  { %v4937_v1 = vmax.f32 %v4935_v13, %v4936_v42  ;;  %v4493_v15 = vmax.f32 %v4091_v48, 0.0  ;;  %v4942_v27 = vsel %vm4542_vm4, %v4492_v16, -inf }
 0x367   :  { %v4938_v52 = vsel %vm4542_vm4, %v4490_v51, -inf  ;;  %v4491_v57 = vmax.f32 %v4083_v0, 0.0 }
 0x368   :  { %v4939_v14 = vmax.f32 %v4937_v1, %v4938_v52  ;;  %v4944_v45 = vsel %vm4542_vm4, %v4493_v15, -inf }
 0x369   :  { %v4940_v17 = vsel %vm4542_vm4, %v4491_v57, -inf  ;;  %v6428_v18 = vpop.f32.mrb[208].mxu1 }
 0x36a   :  { %v4941_v21 = vmax.f32 %v4939_v14, %v4940_v17  ;;  %v4095_v22 = vpop.f32.mrb[209].mxu1  ;;  %v4104_v24 = vadd.f32 %v7991_v32, %v6428_v18 }
 0x36b   :  { %v4096_v34 = vadd.f32 %v7991_v32, %v4095_v22  ;;  %v6429_v36 = vpop.f32.mrb[210].mxu1 }
 0x36c   :  { %v4943_v40 = vmax.f32 %v4941_v21, %v4942_v27  ;;  %v4098_v44 = vpop.f32.mrb[211].mxu1  ;;  %v4107_v47 = vadd.f32 %v7991_v32, %v6429_v36  ;;  %v4496_v53 = vmax.f32 %v4104_v24, 0.0 }
 0x36d   :  { %v4494_v46 = vmax.f32 %v4096_v34, 0.0  ;;  %v4099_v49 = vadd.f32 %v7991_v32, %v4098_v44 }
 0x36e   :  { %v4945_v50 = vmax.f32 %v4943_v40, %v4944_v45  ;;  %v4497_v60 = vmax.f32 %v4107_v47, 0.0  ;;  %v4949_v4 = vsel %vm4542_vm4, %v4496_v53, -inf }
 0x36f   :  { %v4495_v55 = vmax.f32 %v4099_v49, 0.0  ;;  %v4946_v59 = vsel %vm4542_vm4, %v4494_v46, -inf }
 0x370   :  { %v6530_v56 = vpack.i.bf16 %v4697_v28, %v4945_v50  ;;  %v4951_v23 = vsel %vm4542_vm4, %v4497_v60, -inf }
 0x371   :  { %v4947_v61 = vsel %vm4542_vm4, %v4495_v55, -inf  ;;  %v6432_v62 = vpop.f32.mrb[212].mxu1 }
 0x372   :  { %v4948_v63 = vmax.f32 %v4946_v59, %v4947_v61  ;;  %6531 = vrot.lane.b32.xlu1 %v6530_v56, %s6699_s3  ;;  %v4111_v2 = vpop.f32.mrb[213].mxu1  ;;  %v4120_v5 = vadd.f32 %v7991_v32, %v6432_v62 }
 0x373   :  { %v4112_v6 = vadd.f32 %v7991_v32, %v4111_v2  ;;  %v6433_v7 = vpop.f32.mrb[214].mxu1 }
 0x374   :  { %v4950_v8 = vmax.f32 %v4948_v63, %v4949_v4  ;;  %v4114_v20 = vpop.f32.mrb[215].mxu1  ;;  %v4123_v9 = vadd.f32 %v7991_v32, %v6433_v7  ;;  %v4500_v12 = vmax.f32 %v4120_v5, 0.0 }
 0x375   :  { %v4498_v28 = vmax.f32 %v4112_v6, 0.0  ;;  %v4115_v10 = vadd.f32 %v7991_v32, %v4114_v20 }
 0x376   :  { %v4952_v11 = vmax.f32 %v4950_v8, %v4951_v23  ;;  %v4501_v51 = vmax.f32 %v4123_v9, 0.0  ;;  %v4957_v52 = vsel %vm4542_vm4, %v4500_v12, -inf  ;;  %v5145_v23 = vld [vmem:[%s8141_s4 + $0xf0] sm:$0xff]  ;;  %v5130_v12 = vld [vmem:[%s8141_s4 + $0x78] sm:$0xff] }
 0x377   :  { %v4953_v13 = vsel %vm4542_vm4, %v4498_v28, -inf  ;;  %v4499_v41 = vmax.f32 %v4115_v10, 0.0  ;;  %v5146_v28 = vld [vmem:[%s8141_s4 + $0xf8] sm:$0xff]  ;;  %v5129_v9 = vld [vmem:[%s8141_s4 + $0x70] sm:$0xff]  ;;  %s6700_s4 = smov 80  }
 0x378   :  { %v4954_v42 = vmax.f32 %v4952_v11, %v4953_v13  ;;  %v4959_v21 = vsel %vm4542_vm4, %v4501_v51, -inf  ;;  %v6502_v11 = vpack.c.bf16 %v5146_v28, %v5145_v23  ;;  %v6504_v51 = vpack.c.bf16 %v5130_v12, %v5129_v9 }
 0x379   :  { %v4955_v48 = vsel %vm4542_vm4, %v4499_v41, -inf  ;;  %v6436_v0 = vpop.f32.mrb[216].mxu1 }
 0x37a   :  { %v4956_v1 = vmax.f32 %v4954_v42, %v4955_v48  ;;  %v4127_v16 = vpop.f32.mrb[217].mxu1  ;;  %v4136_v57 = vadd.f32 %v7991_v32, %v6436_v0  ;;  %6503 = vmatprep.subr.bf16.mxu1 %v6502_v11 }
 0x37b   :  { %v4128_v14 = vadd.f32 %v7991_v32, %v4127_v16  ;;  %v6437_v15 = vpop.f32.mrb[218].mxu1  ;;  %6505 = vmatpush3.bf16.msra.mxu1 %v6504_v51 }
 0x37c   :  { %v4958_v17 = vmax.f32 %v4956_v1, %v4957_v52  ;;  %v4130_v18 = vpop.f32.mrb[219].mxu1  ;;  %v4139_v27 = vadd.f32 %v7991_v32, %v6437_v15  ;;  %v4504_v36 = vmax.f32 %v4136_v57, 0.0 }
 0x37d   :  { %v4502_v22 = vmax.f32 %v4128_v14, 0.0  ;;  %v4131_v24 = vadd.f32 %v7991_v32, %v4130_v18 }
 0x37e   :  { %v4960_v34 = vmax.f32 %v4958_v17, %v4959_v21  ;;  %v4505_v46 = vmax.f32 %v4139_v27, 0.0  ;;  %v4965_v55 = vsel %vm4542_vm4, %v4504_v36, -inf }
 0x37f   :  { %v4961_v40 = vsel %vm4542_vm4, %v4502_v22, -inf  ;;  %v4503_v44 = vmax.f32 %v4131_v24, 0.0 }
 0x380   :  { %v4962_v45 = vmax.f32 %v4960_v34, %v4961_v40  ;;  %v4967_v63 = vsel %vm4542_vm4, %v4505_v46, -inf }
 0x381   :  { %v4963_v47 = vsel %vm4542_vm4, %v4503_v44, -inf  ;;  %v6440_v49 = vpop.f32.mrb[220].mxu1 }
 0x382   :  { %v4964_v50 = vmax.f32 %v4962_v45, %v4963_v47  ;;  %v4143_v53 = vpop.f32.mrb[221].mxu1  ;;  %v4152_v56 = vadd.f32 %v7991_v32, %v6440_v49 }
 0x383   :  { %v4144_v59 = vadd.f32 %v7991_v32, %v4143_v53  ;;  %v6441_v60 = vpop.f32.mrb[222].mxu1 }
 0x384   :  { %v4966_v61 = vmax.f32 %v4964_v50, %v4965_v55  ;;  %v4146_v62 = vpop.f32.mrb[223].mxu1  ;;  %v4155_v4 = vadd.f32 %v7991_v32, %v6441_v60  ;;  %v4508_v7 = vmax.f32 %v4152_v56, 0.0 }
 0x385   :  { %v4506_v2 = vmax.f32 %v4144_v59, 0.0  ;;  %v4147_v5 = vadd.f32 %v7991_v32, %v4146_v62 }
 0x386   :  { %v4968_v6 = vmax.f32 %v4966_v61, %v4967_v63  ;;  %v4509_v13 = vmax.f32 %v4155_v4, 0.0  ;;  %v4973_v1 = vsel %vm4542_vm4, %v4508_v7, -inf }
 0x387   :  { %v4969_v8 = vsel %vm4542_vm4, %v4506_v2, -inf  ;;  %v4507_v20 = vmax.f32 %v4147_v5, 0.0 }
 0x388   :  { %v4970_v10 = vmax.f32 %v4968_v6, %v4969_v8  ;;  %v4975_v17 = vsel %vm4542_vm4, %v4509_v13, -inf }
 0x389   :  { %v4971_v41 = vsel %vm4542_vm4, %v4507_v20, -inf  ;;  %v6444_v42 = vpop.f32.mrb[224].mxu1 }
 0x38a   :  { %v4972_v48 = vmax.f32 %v4970_v10, %v4971_v41  ;;  %v4159_v0 = vpop.f32.mrb[225].mxu1  ;;  %v4168_v16 = vadd.f32 %v7991_v32, %v6444_v42 }
 0x38b   :  { %v4160_v52 = vadd.f32 %v7991_v32, %v4159_v0  ;;  %v6445_v57 = vpop.f32.mrb[226].mxu1 }
 0x38c   :  { %v4974_v14 = vmax.f32 %v4972_v48, %v4973_v1  ;;  %v4162_v15 = vpop.f32.mrb[227].mxu1  ;;  %v4171_v21 = vadd.f32 %v7991_v32, %v6445_v57  ;;  %v4512_v24 = vmax.f32 %v4168_v16, 0.0 }
 0x38d   :  { %v4510_v18 = vmax.f32 %v4160_v52, 0.0  ;;  %v4163_v22 = vadd.f32 %v7991_v32, %v4162_v15 }
 0x38e   :  { %v4976_v27 = vmax.f32 %v4974_v14, %v4975_v17  ;;  %v4513_v44 = vmax.f32 %v4171_v21, 0.0  ;;  %v4980_v50 = vsel %vm4542_vm4, %v4512_v24, -inf }
 0x38f   :  { %v4511_v34 = vmax.f32 %v4163_v22, 0.0  ;;  %v4977_v40 = vsel %vm4542_vm4, %v4510_v18, -inf }
 0x390   :  { %v6535_v36 = vpack.i.bf16 %v4728_v3, %v4976_v27  ;;  %v4982_v58 = vsel %vm4542_vm4, %v4513_v44, -inf }
 0x391   :  { %v4978_v45 = vsel %vm4542_vm4, %v4511_v34, -inf  ;;  %v6448_v46 = vpop.f32.mrb[228].mxu1 }
 0x392   :  { %v4979_v47 = vmax.f32 %v4977_v40, %v4978_v45  ;;  %6536 = vrot.lane.b32.xlu0 %v6535_v36, %s6700_s4  ;;  %v4175_v49 = vpop.f32.mrb[229].mxu1  ;;  %v4184_v53 = vadd.f32 %v7991_v32, %v6448_v46 }
 0x393   :  { %v4176_v55 = vadd.f32 %v7991_v32, %v4175_v49  ;;  %v6449_v56 = vpop.f32.mrb[230].mxu1 }
 0x394   :  { %v4981_v59 = vmax.f32 %v4979_v47, %v4980_v50  ;;  %v4178_v54 = vpop.f32.mrb[231].mxu1  ;;  %v4187_v60 = vadd.f32 %v7991_v32, %v6449_v56  ;;  %v4516_v63 = vmax.f32 %v4184_v53, 0.0 }
 0x395   :  { %v4514_v3 = vmax.f32 %v4176_v55, 0.0  ;;  %v4179_v61 = vadd.f32 %v7991_v32, %v4178_v54 }
 0x396   :  { %v4983_v62 = vmax.f32 %v4981_v59, %v4982_v58  ;;  %v4517_v6 = vmax.f32 %v4187_v60, 0.0  ;;  %v4988_v28 = vsel %vm4542_vm4, %v4516_v63, -inf }
 0x397   :  { %v4984_v2 = vsel %vm4542_vm4, %v4514_v3, -inf  ;;  %v4515_v4 = vmax.f32 %v4179_v61, 0.0 }
 0x398   :  { %v4985_v5 = vmax.f32 %v4983_v62, %v4984_v2  ;;  %v4990_v41 = vsel %vm4542_vm4, %v4517_v6, -inf }
 0x399   :  { %v4986_v7 = vsel %vm4542_vm4, %v4515_v4, -inf  ;;  %v6452_v8 = vpop.f32.mrb[232].mxu1 }
 0x39a   :  { %v4987_v20 = vmax.f32 %v4985_v5, %v4986_v7  ;;  %v4191_v23 = vpop.f32.mrb[233].mxu1  ;;  %v4200_v9 = vadd.f32 %v7991_v32, %v6452_v8 }
 0x39b   :  { %v4192_v10 = vadd.f32 %v7991_v32, %v4191_v23  ;;  %v6453_v11 = vpop.f32.mrb[234].mxu1 }
 0x39c   :  { %v4989_v12 = vmax.f32 %v4987_v20, %v4988_v28  ;;  %v4194_v13 = vpop.f32.mrb[235].mxu1  ;;  %v4203_v51 = vadd.f32 %v7991_v32, %v6453_v11  ;;  %v4520_v1 = vmax.f32 %v4200_v9, 0.0 }
 0x39d   :  { %v4518_v42 = vmax.f32 %v4192_v10, 0.0  ;;  %v4195_v48 = vadd.f32 %v7991_v32, %v4194_v13 }
 0x39e   :  { %v4991_v0 = vmax.f32 %v4989_v12, %v4990_v41  ;;  %v4521_v14 = vmax.f32 %v4203_v51, 0.0  ;;  %v4996_v22 = vsel %vm4542_vm4, %v4520_v1, -inf }
 0x39f   :  { %v4992_v16 = vsel %vm4542_vm4, %v4518_v42, -inf  ;;  %v4519_v52 = vmax.f32 %v4195_v48, 0.0 }
 0x3a0   :  { %v4993_v57 = vmax.f32 %v4991_v0, %v4992_v16  ;;  %v4998_v44 = vsel %vm4542_vm4, %v4521_v14, -inf }
 0x3a1   :  { %v4994_v15 = vsel %vm4542_vm4, %v4519_v52, -inf  ;;  %v6456_v17 = vpop.f32.mrb[236].mxu1 }
 0x3a2   :  { %v4995_v18 = vmax.f32 %v4993_v57, %v4994_v15  ;;  %v4207_v21 = vpop.f32.mrb[237].mxu1  ;;  %v4216_v27 = vadd.f32 %v7991_v32, %v6456_v17 }
 0x3a3   :  { %v4208_v24 = vadd.f32 %v7991_v32, %v4207_v21  ;;  %v6457_v34 = vpop.f32.mrb[238].mxu1 }
 0x3a4   :  { %v4997_v36 = vmax.f32 %v4995_v18, %v4996_v22  ;;  %v4210_v40 = vpop.f32.mrb[239].mxu1  ;;  %v4219_v46 = vadd.f32 %v7991_v32, %v6457_v34  ;;  %v4524_v50 = vmax.f32 %v4216_v27, 0.0 }
 0x3a5   :  { %v4522_v45 = vmax.f32 %v4208_v24, 0.0  ;;  %v4211_v47 = vadd.f32 %v7991_v32, %v4210_v40 }
 0x3a6   :  { %v4999_v49 = vmax.f32 %v4997_v36, %v4998_v44  ;;  %v4525_v59 = vmax.f32 %v4219_v46, 0.0  ;;  %v5004_v61 = vsel %vm4542_vm4, %v4524_v50, -inf }
 0x3a7   :  { %v5000_v53 = vsel %vm4542_vm4, %v4522_v45, -inf  ;;  %v4523_v55 = vmax.f32 %v4211_v47, 0.0 }
 0x3a8   :  { %v5001_v56 = vmax.f32 %v4999_v49, %v5000_v53  ;;  %v5006_v6 = vsel %vm4542_vm4, %v4525_v59, -inf }
 0x3a9   :  { %v5002_v54 = vsel %vm4542_vm4, %v4523_v55, -inf  ;;  %v6460_v58 = vpop.f32.mrb[240].mxu1 }
 0x3aa   :  { %v5003_v3 = vmax.f32 %v5001_v56, %v5002_v54  ;;  %v4223_v60 = vpop.f32.mrb[241].mxu1  ;;  %v4232_v62 = vadd.f32 %v7991_v32, %v6460_v58 }
 0x3ab   :  { %v4224_v63 = vadd.f32 %v7991_v32, %v4223_v60  ;;  %v6461_v2 = vpop.f32.mrb[242].mxu1 }
 0x3ac   :  { %v5005_v4 = vmax.f32 %v5003_v3, %v5004_v61  ;;  %v4226_v5 = vpop.f32.mrb[243].mxu1  ;;  %v4235_v8 = vadd.f32 %v7991_v32, %v6461_v2  ;;  %v4528_v28 = vmax.f32 %v4232_v62, 0.0 }
 0x3ad   :  { %v4526_v7 = vmax.f32 %v4224_v63, 0.0  ;;  %v4227_v20 = vadd.f32 %v7991_v32, %v4226_v5 }
 0x3ae   :  { %v5007_v23 = vmax.f32 %v5005_v4, %v5006_v6  ;;  %v4529_v12 = vmax.f32 %v4235_v8, 0.0  ;;  %v5011_v48 = vsel %vm4542_vm4, %v4528_v28, -inf }
 0x3af   :  { %v4527_v9 = vmax.f32 %v4227_v20, 0.0  ;;  %v5008_v11 = vsel %vm4542_vm4, %v4526_v7, -inf }
 0x3b0   :  { %v6540_v10 = vpack.i.bf16 %v4759_v43, %v5007_v23  ;;  %v5013_v35 = vsel %vm4542_vm4, %v4529_v12, -inf }
 0x3b1   :  { %v5009_v13 = vsel %vm4542_vm4, %v4527_v9, -inf  ;;  %v6464_v41 = vpop.f32.mrb[244].mxu1 }
 0x3b2   :  { %v5010_v42 = vmax.f32 %v5008_v11, %v5009_v13  ;;  %6541 = vrot.lane.b32.xlu1 %v6540_v10, %s6701_s11  ;;  %v4239_v51 = vpop.f32.mrb[245].mxu1  ;;  %v4248_v0 = vadd.f32 %v7991_v32, %v6464_v41 }
 0x3b3   :  { %v4240_v1 = vadd.f32 %v7991_v32, %v4239_v51  ;;  %v6465_v16 = vpop.f32.mrb[246].mxu1 }
 0x3b4   :  { %v5012_v52 = vmax.f32 %v5010_v42, %v5011_v48  ;;  %v4242_v31 = vpop.f32.mrb[247].mxu1  ;;  %v4251_v57 = vadd.f32 %v7991_v32, %v6465_v16  ;;  %v4532_v17 = vmax.f32 %v4248_v0, 0.0 }
 0x3b5   :  { %v4530_v43 = vmax.f32 %v4240_v1, 0.0  ;;  %v4243_v14 = vadd.f32 %v7991_v32, %v4242_v31 }
 0x3b6   :  { %v5014_v15 = vmax.f32 %v5012_v52, %v5013_v35  ;;  %v4533_v27 = vmax.f32 %v4251_v57, 0.0  ;;  %v5019_v44 = vsel %vm4542_vm4, %v4532_v17, -inf  ;;  %v6517_v57 = vpop.permute.xlu0 %6516 }
 0x3b7   :  { %v5015_v18 = vsel %vm4542_vm4, %v4530_v43, -inf  ;;  %v4531_v21 = vmax.f32 %v4243_v14, 0.0 }
 0x3b8   :  { %v5016_v22 = vmax.f32 %v5014_v15, %v5015_v18  ;;  %v5021_v53 = vsel %vm4542_vm4, %v4533_v27, -inf  ;;  %v6519_v18 = vunpack.i.h.bf16 %v6517_v57 }
 0x3b9   :  { %v5017_v24 = vsel %vm4542_vm4, %v4531_v21, -inf  ;;  %v6468_v34 = vpop.f32.mrb[248].mxu1  ;;  %v6518_v21 = vunpack.i.l.bf16 %v6517_v57 }
 0x3ba   :  { %v5018_v36 = vmax.f32 %v5016_v22, %v5017_v24  ;;  %v4255_v40 = vpop.f32.mrb[249].mxu1  ;;  %v4264_v45 = vadd.f32 %v7991_v32, %v6468_v34  ;;  %v6522_v15 = vpop.permute.xlu0 %6521  ;;  %v5095_v25 = vsel %vm4542_vm4, %v4573_v37, %v6519_v18 }
 0x3bb   :  { %v4256_v46 = vadd.f32 %v7991_v32, %v4255_v40  ;;  %v6469_v47 = vpop.f32.mrb[250].mxu1  ;;  %v6524_v22 = vunpack.i.h.bf16 %v6522_v15  ;;  %v6523_v27 = vunpack.i.l.bf16 %v6522_v15 }
 0x3bc   :  { %v5020_v49 = vmax.f32 %v5018_v36, %v5019_v44  ;;  %v4258_v50 = vpop.f32.mrb[251].mxu1  ;;  %v4267_v56 = vadd.f32 %v7991_v32, %v6469_v47  ;;  %v4536_v58 = vmax.f32 %v4264_v45, 0.0 }
 0x3bd   :  { %v4534_v55 = vmax.f32 %v4256_v46, 0.0  ;;  %v4259_v59 = vadd.f32 %v7991_v32, %v4258_v50  ;;  %v5097_v47 = vsel %vm5096_vm5, %v5095_v25, %v6524_v22 }
 0x3be   :  { %v5022_v54 = vmax.f32 %v5020_v49, %v5021_v53  ;;  %v4537_v62 = vmax.f32 %v4267_v56, 0.0  ;;  %v5027_v6 = vsel %vm4542_vm4, %v4536_v58, -inf }
 0x3bf   :  { %v5023_v3 = vsel %vm4542_vm4, %v4534_v55, -inf  ;;  %v4535_v60 = vmax.f32 %v4259_v59, 0.0 }
 0x3c0   :  { %v5024_v61 = vmax.f32 %v5022_v54, %v5023_v3  ;;  %v5029_v9 = vsel %vm4542_vm4, %v4537_v62, -inf }
 0x3c1   :  { %v5025_v63 = vsel %vm4542_vm4, %v4535_v60, -inf  ;;  %v6472_v2 = vpop.f32.mrb[252].mxu1 }
 0x3c2   :  { %v5026_v4 = vmax.f32 %v5024_v61, %v5025_v63  ;;  %v4271_v5 = vpop.f32.mrb[253].mxu1  ;;  %v4280_v7 = vadd.f32 %v7991_v32, %v6472_v2  ;;  %v5637_v63 = vld [vmem:[%s8142_s5] ss:$0 sm:$0xff] }
 0x3c3   :  { %v4272_v8 = vadd.f32 %v7991_v32, %v4271_v5  ;;  %v6473_v20 = vpop.f32.mrb[254].mxu1 }
 0x3c4   :  { %v5028_v23 = vmax.f32 %v5026_v4, %v5027_v6  ;;  %v4274_v28 = vpop.f32.mrb[255].mxu1  ;;  %v4283_v11 = vadd.f32 %v7991_v32, %v6473_v20  ;;  %v4540_v41 = vmax.f32 %v4280_v7, 0.0  ;;  %v6527_v14 = vpop.permute.xlu1 %6526 }
 0x3c5   :  { %v4538_v10 = vmax.f32 %v4272_v8, 0.0  ;;  %v4275_v12 = vadd.f32 %v7991_v32, %v4274_v28  ;;  %v6529_v34 = vunpack.i.h.bf16 %v6527_v14  ;;  %v6528_v36 = vunpack.i.l.bf16 %v6527_v14 }
 0x3c6   :  { %v5030_v13 = vmax.f32 %v5028_v23, %v5029_v9  ;;  %v4541_v0 = vmax.f32 %v4283_v11, 0.0  ;;  %v5035_v52 = vsel %vm4542_vm4, %v4540_v41, -inf }
 0x3c7   :  { %v5031_v42 = vsel %vm4542_vm4, %v4538_v10, -inf  ;;  %v4539_v51 = vmax.f32 %v4275_v12, 0.0  ;;  %v5099_v55 = vsel %vm5098_vm6, %v5097_v47, %v6529_v34 }
 0x3c8   :  { %v5032_v48 = vmax.f32 %v5030_v13, %v5031_v42  ;;  %v5037_v35 = vsel %vm4542_vm4, %v4541_v0, -inf }
 0x3c9   :  { %v5033_v1 = vsel %vm4542_vm4, %v4539_v51, -inf }
 0x3ca   :  { %v5034_v16 = vmax.f32 %v5032_v48, %v5033_v1 }
 0x3cc   :  { %v5036_v31 = vmax.f32 %v5034_v16, %v5035_v52 }
 0x3ce   :  { %v5038_v43 = vmax.f32 %v5036_v31, %v5037_v35 }
 0x3d0   :  { %v6545_v32 = vpack.i.bf16 %v4790_v38, %v5038_v43  ;;  %v5108_v38 = vsel %vm4542_vm4, %v4821_v39, %v6518_v21 }
 0x3d1   :  { %v5109_v49 = vsel %vm5096_vm5, %v5108_v38, %v6523_v27 }
 0x3d2   :  { %6546 = vrot.lane.b32.xlu0 %v6545_v32, %s6702_s12  ;;  %v5110_v56 = vsel %vm5098_vm6, %v5109_v49, %v6528_v36 }
 0x3e4   :  { %v6532_v17 = vpop.permute.xlu1 %6531 }
 0x3e5   :  { %v6534_v44 = vunpack.i.h.bf16 %v6532_v17  ;;  %v6533_v19 = vunpack.i.l.bf16 %v6532_v17 }
 0x3e7   :  { %v5101_v30 = vsel %vm5100_vm7, %v5099_v55, %v6534_v44  ;;  %v5111_v33 = vsel %vm5100_vm7, %v5110_v56, %v6533_v19 }
 0x404   :  { %v6537_v24 = vpop.permute.xlu0 %6536 }
 0x405   :  { %v6539_v45 = vunpack.i.h.bf16 %v6537_v24  ;;  %v6538_v46 = vunpack.i.l.bf16 %v6537_v24 }
 0x407   :  { %v5103_v26 = vsel %vm5102_vm8, %v5101_v30, %v6539_v45  ;;  %v5112_v59 = vsel %vm5102_vm8, %v5111_v33, %v6538_v46 }
 0x424   :  { %v6542_v40 = vpop.permute.xlu1 %6541 }
 0x425   :  { %v6544_v50 = vunpack.i.h.bf16 %v6542_v40  ;;  %v6543_v53 = vunpack.i.l.bf16 %v6542_v40 }
 0x427   :  { %v5105_v54 = vsel %vm5104_vm9, %v5103_v26, %v6544_v50  ;;  %v5113_v58 = vsel %vm5104_vm9, %v5112_v59, %v6543_v53 }
 0x444   :  { %v6547_v37 = vpop.permute.xlu0 %6546 }
 0x445   :  { %v6549_v29 = vunpack.i.h.bf16 %v6547_v37  ;;  %v6548_v39 = vunpack.i.l.bf16 %v6547_v37 }
 0x447   :  { %v5107_v3 = vsel %vm5106_vm10, %v5105_v54, %v6549_v29  ;;  %v5114_v60 = vsel %vm5106_vm10, %v5113_v58, %v6548_v39 }
 0x448   :  { %5218 = vmatprep.mubr.f32.mxu1 %v5114_v60 }
 0x449   :  { %5219 = vmatmul.mubr.f32.vlgmr.msra.gmra.mrb[0].mxu1 %v5107_v3 }
 0x51c   :  { %v5937_v61 = vpop.f32.mrb[0].mxu1 }
 0x51d   :  { %v5938_v62 = vpop.f32.mrb[1].mxu1 }
 0x51e   :  { %v5939_v2 = vadd.f32 %v5938_v62, %v5937_v61 }
 0x520   :  { %v5221_v4 = vadd.f32 %v5939_v2, %v5637_v63 }
 0x522   :  { %v5225_v5 = vsel %vm5224_vm11, %v5221_v4, -inf }
 0x523   :  { %5226 = vmax.xlane.f32.xlu1 %v5225_v5 }
 0x5b0   :  { %v5227_v6 = vpop.xlane.xlu1 %5226 }
 0x5b1   :  { %v5228_v7 = vsub.f32 %v5221_v4, %v5227_v6 }
 0x5b3   :  { %v5229_v8 = vmul.f32 1.442695, %v5228_v7 }
 0x5b5   :  { %6689 = vpow2.f32 %v5229_v8 }
 0x5bf   :  { %v6690_v20 = vpop.eup %6689 }
 0x5c0   :  { %v5231_v23 = vsel %vm5224_vm11, %v6690_v20, 0.0 }
 0x5c1   :  { %5232 = vadd.xlane.f32.xlu0 %v5231_v23 }
 0x64e   :  { %v5233_v28 = vpop.xlane.xlu0 %5232 }
 0x64f   :  { %6691 = vrcp.f32 %v5233_v28 }
 0x659   :  { %v6692_v9 = vpop.eup %6691 }
 0x65a   :  { %v5235_v10 = vmul.f32 %v6692_v9, %v6690_v20 }
 0x65c   :  { %5236 = vst.msk [vmem:[%s8143_s6] sm:$0xff] %vm5224_vm11, %v5235_v10 }

</bundles_post_ra>
